<compile_context>
chip_gen: v7x
topology: tpu7x:2x2x1
jax: 0.10.0
libtpu: 0.0.40
codegen_flags: <defaults>
</compile_context>

<pallas_src>
import functools

import jax
import jax.numpy as jnp
from jax.experimental import pallas as pl
from jax.experimental.pallas import tpu as pltpu

IN_FEAT = 1024    # size[0]
HID_FEAT = 512    # size[1]
MID_FEAT = 384    # size[2]
N_CLASSES = 2

_PART_ROWS = 8    # sublane-padded rows per part in the partial outputs
_STAT_W = 128     # lane-padded width for the per-part m / s outputs


def clam0_kernel(x_ref, wfc_ref, bfc_ref, wab_ref, bab_ref, wc_ref,
                 pooled_out_ref, m_out_ref, s_out_ref,
                 m_ref, s_ref, pooled_ref,
                 *, n_valid, tile_n, tiles_per_part):
    p = pl.program_id(0)    # part index (maps to a TensorCore on v7x)
    ki = pl.program_id(1)   # instance-tile index within this part

    @pl.when(ki == 0)
    def _init():
        m_ref[...] = jnp.full_like(m_ref, -jnp.inf)
        s_ref[...] = jnp.zeros_like(s_ref)
        pooled_ref[...] = jnp.zeros_like(pooled_ref)

    # Global row ids of this tile.  There is no wrapper-side padding, so the
    # last real tile may be partial and the last part may see phantom tiles;
    # both are handled purely by this mask.
    row = ((p * tiles_per_part + ki) * tile_n
           + jax.lax.broadcasted_iota(jnp.int32, (tile_n, 1), 0))
    valid = row < n_valid

    x = x_ref[...]                                                 # (tile_n, 1024) bf16

    # fc: Linear(1024->512) + ReLU (dropout = identity in eval).
    # bf16 operands on the MXU, f32 accumulation + f32 bias/activation.
    h = jnp.maximum(
        jnp.dot(x, wfc_ref[...], preferred_element_type=jnp.float32)
        + bfc_ref[...], 0.0)                                       # (tile_n, 512) f32
    # Zero invalid rows: e is masked too, but 0 * garbage(NaN/Inf) in the
    # pooled contraction would still poison the accumulator.
    h = jnp.where(valid, h, 0.0)

    # attention_a | attention_b packed into a single 512->768 bf16 matmul;
    # split on a 128-lane boundary (384), so the halves are free static slices.
    hab = (jnp.dot(h.astype(jnp.bfloat16), wab_ref[...],
                   preferred_element_type=jnp.float32)
           + bab_ref[...])                                         # (tile_n, 768) f32
    ha = jnp.tanh(hab[:, :MID_FEAT])
    hb = jax.nn.sigmoid(hab[:, MID_FEAT:])

    # attention_c as a f32 VPU multiply + lane reduction (a lane-width-1 MXU
    # matmul wastes the MXU).  Its bias is a no-op under the instance softmax
    # (shift-invariance) and is dropped.
    logits = jnp.sum((ha * hb) * wc_ref[...], axis=-1, keepdims=True)  # (tile_n, 1)

    # Online softmax over the instance axis (all state in f32).
    m_prev = m_ref[...]                                            # (1, 1)
    m_tile = jnp.max(jnp.where(valid, logits, -jnp.inf))
    m_new = jnp.maximum(m_prev, m_tile)                            # (1, 1)
    # Guard the all-invalid (phantom) tile case: m stays -inf and
    # exp(-inf - -inf) would be NaN; s/pooled are still zero so corr=0 is safe.
    corr = jnp.where(m_new > -jnp.inf, jnp.exp(m_prev - m_new), 0.0)
    e = jnp.where(valid, jnp.exp(logits - m_new), 0.0)             # (tile_n, 1)

    s_ref[...] = corr * s_ref[...] + jnp.sum(e)
    # Unnormalized pooled partial as an MXU contraction over rows:
    # (tile_n,1)^T @ (tile_n,512) -> (1,512), f32.
    pooled_ref[...] = corr * pooled_ref[...] + jax.lax.dot_general(
        e, h, dimension_numbers=(((0,), (0,)), ((), ())),
        preferred_element_type=jnp.float32)
    m_ref[...] = m_new

    @pl.when(ki == pl.num_programs(1) - 1)
    def _finalize():
        # Write this part's partial-softmax state.  Broadcasting over the
        # sublane-padded rows gives full-tile, unmasked stores.
        pooled_out_ref[...] = jnp.broadcast_to(pooled_ref[...],
                                               (_PART_ROWS, HID_FEAT))
        m_out_ref[...] = jnp.broadcast_to(m_ref[...], (_PART_ROWS, _STAT_W))
        s_out_ref[...] = jnp.broadcast_to(s_ref[...], (_PART_ROWS, _STAT_W))


def _pallas_partials(x_bf, wfc_bf, bfc, wab_bf, bab, wc_row, *,
                     n, tile_n, num_parts, n_tiles, tiles_per_part,
                     single_buffer_weights):
    """Runs the Pallas kernel; returns per-part (pooled, m, s) partials."""

    def x_index_map(p, ki):
        # Clamp phantom tiles of the last part onto the last real tile; their
        # rows are fully masked inside the kernel.
        return (jnp.minimum(p * tiles_per_part + ki, n_tiles - 1), 0)

    def whole(shape):
        # Grid-invariant weights.  Single-buffering them saves VMEM headroom
        # (matters on v7x's 64 MiB) since their index_map never changes.
        if single_buffer_weights:
            return pl.BlockSpec(shape, lambda p, ki: (0,) * len(shape),
                                pipeline_mode=pl.Buffered(1))
        return pl.BlockSpec(shape, lambda p, ki: (0,) * len(shape))

    # Explicit VMEM budget: weights (+copies), double-buffered bf16 x tile,
    # generous per-row headroom for f32 intermediates (h, hab, ha, hb, ...).
    param_bytes = (IN_FEAT * HID_FEAT * 2 + HID_FEAT * 4
                   + HID_FEAT * 2 * MID_FEAT * 2 + 2 * MID_FEAT * 4
                   + MID_FEAT * 4)
    weight_bufs = 1 if single_buffer_weights else 2
    x_tile_bytes = tile_n * IN_FEAT * 2
    interm_bytes = tile_n * 16 * 1024
    vmem_limit = (weight_bufs * param_bytes + 2 * x_tile_bytes
                  + interm_bytes + (4 << 20))
    vmem_limit = int(min(max(vmem_limit, 16 << 20), 48 << 20))

    kernel = functools.partial(clam0_kernel, n_valid=n, tile_n=tile_n,
                               tiles_per_part=tiles_per_part)

    return pl.pallas_call(
        kernel,
        out_shape=(
            jax.ShapeDtypeStruct((num_parts * _PART_ROWS, HID_FEAT), jnp.float32),
            jax.ShapeDtypeStruct((num_parts * _PART_ROWS, _STAT_W), jnp.float32),
            jax.ShapeDtypeStruct((num_parts * _PART_ROWS, _STAT_W), jnp.float32),
        ),
        grid_spec=pltpu.PrefetchScalarGridSpec(
            num_scalar_prefetch=0,
            grid=(num_parts, tiles_per_part),
            in_specs=[
                pl.BlockSpec((tile_n, IN_FEAT), x_index_map),           # x (tiled, bf16)
                whole((IN_FEAT, HID_FEAT)), whole((1, HID_FEAT)),       # fc (bf16 w, f32 b)
                whole((HID_FEAT, 2 * MID_FEAT)), whole((1, 2 * MID_FEAT)),  # attn a|b
                whole((1, MID_FEAT)),                                   # attn c weight
            ],
            out_specs=(
                pl.BlockSpec((_PART_ROWS, HID_FEAT), lambda p, ki: (p, 0)),
                pl.BlockSpec((_PART_ROWS, _STAT_W), lambda p, ki: (p, 0)),
                pl.BlockSpec((_PART_ROWS, _STAT_W), lambda p, ki: (p, 0)),
            ),
            scratch_shapes=[
                pltpu.VMEM((1, 1), jnp.float32),          # running max m
                pltpu.VMEM((1, 1), jnp.float32),          # running sum s
                pltpu.VMEM((1, HID_FEAT), jnp.float32),   # unnormalized pooled
            ]),
        compiler_params=pltpu.CompilerParams(
            dimension_semantics=("parallel", "arbitrary"),
            vmem_limit_bytes=vmem_limit),
    )(x_bf, wfc_bf, bfc, wab_bf, bab, wc_row)


def clam0_forward(x, params, *, tile_n=1024, num_parts=2):
    """x: (N, 1024).  Returns (2,) float32 logits (eval-mode CLAM_0)."""
    wfc, bfc, wa, ba, wb, bb, wc, bc, wcls, bcls = params
    del bc  # mathematical no-op under the instance softmax (shift invariance)

    n = x.shape[0]

    # Clamp the tile to the bag; sublane dim must be a multiple of 8.
    # (Perf note: keep >=128 on v5e and >=256 on v6e/v7x for large bags; the
    #  default 1024 satisfies both.)
    tile_n = min(int(tile_n), pl.cdiv(n, 8) * 8)
    tile_n = max(8, (tile_n // 8) * 8)

    n_tiles = pl.cdiv(n, tile_n)                    # no wrapper-side pad copy
    num_parts = max(1, min(int(num_parts), n_tiles))
    tiles_per_part = pl.cdiv(n_tiles, num_parts)

    # bf16 MXU path: stream x as bf16 and keep the big matmul weights bf16.
    # (In production the features would usually already be bf16 in HBM.)
    if x.dtype != jnp.bfloat16:
        x = x.astype(jnp.bfloat16)
    wfc_bf = wfc.astype(jnp.bfloat16)
    # Pack the two 512->384 attention projections into one 512->768 matmul.
    wab_bf = jnp.concatenate([wa, wb], axis=1).astype(jnp.bfloat16)   # (512, 768)
    bab = jnp.concatenate([ba, bb], axis=1)                           # (1, 768) f32
    wc_row = wc.reshape(1, MID_FEAT)                                  # (1, 384) f32

    kwargs = dict(n=n, tile_n=tile_n, num_parts=num_parts,
                  n_tiles=n_tiles, tiles_per_part=tiles_per_part)
    try:
        pooled_parts, m_parts, s_parts = _pallas_partials(
            x, wfc_bf, bfc, wab_bf, bab, wc_row,
            single_buffer_weights=True, **kwargs)
    except Exception:
        # pl.Buffered(1) (single-buffered grid-invariant weights) unsupported
        # on this jax version -> fall back to default double buffering.
        pooled_parts, m_parts, s_parts = _pallas_partials(
            x, wfc_bf, bfc, wab_bf, bab, wc_row,
            single_buffer_weights=False, **kwargs)

    # Merge the per-part partial-softmax states, normalize and classify.
    # Tiny (O(num_parts*512) FLOPs), pure JAX, all f32.
    pooled_p = pooled_parts.reshape(num_parts, _PART_ROWS, HID_FEAT)[:, 0, :]
    m_p = m_parts.reshape(num_parts, _PART_ROWS, _STAT_W)[:, 0, 0]
    s_p = s_parts.reshape(num_parts, _PART_ROWS, _STAT_W)[:, 0, 0]

    m_tot = jnp.max(m_p)
    scale = jnp.exp(m_p - m_tot)                    # exp(-inf - finite) -> 0
    s_tot = jnp.sum(scale * s_p)
    pooled = jnp.sum(scale[:, None] * pooled_p, axis=0) / s_tot       # (512,)
    return pooled @ wcls + bcls.reshape(-1)                           # (2,)


def init_params(key):
    """Deterministic init.  PyTorch Linear weights are (out, in); stored here
    pre-transposed as (in, out).  Biases are small nonzero values so the
    correctness check exercises them (incl. shift-invariance of bc)."""
    ks = jax.random.split(key, 10)

    def xavier(k, shape):
        fan_in, fan_out = shape
        std = (2.0 / (fan_in + fan_out)) ** 0.5
        return std * jax.random.normal(k, shape, jnp.float32)

    wfc = xavier(ks[0], (IN_FEAT, HID_FEAT))
    bfc = 0.01 * jax.random.normal(ks[1], (1, HID_FEAT), jnp.float32)
    wa = xavier(ks[2], (HID_FEAT, MID_FEAT))
    ba = 0.01 * jax.random.normal(ks[3], (1, MID_FEAT), jnp.float32)
    wb = xavier(ks[4], (HID_FEAT, MID_FEAT))
    bb = 0.01 * jax.random.normal(ks[5], (1, MID_FEAT), jnp.float32)
    wc = xavier(ks[6], (MID_FEAT, 1))
    bc = 0.01 * jax.random.normal(ks[7], (1, 1), jnp.float32)
    wcls = xavier(ks[8], (HID_FEAT, N_CLASSES))
    bcls = 0.01 * jax.random.normal(ks[9], (1, N_CLASSES), jnp.float32)
    return (wfc, bfc, wa, ba, wb, bb, wc, bc, wcls, bcls)


def reference_forward(x, params):
    """Pure-JAX f32 reference of the PyTorch CLAM_0 forward (eval mode)."""
    wfc, bfc, wa, ba, wb, bb, wc, bc, wcls, bcls = params
    h = jax.nn.relu(x @ wfc + bfc)                     # fc (dropout = identity)
    a = jnp.tanh(h @ wa + ba)
    b = jax.nn.sigmoid(h @ wb + bb)
    logits = (a * b) @ wc + bc                         # (N, 1)
    attn = jax.nn.softmax(logits, axis=0).squeeze()    # (N,)
    pooled = attn @ h                                  # (512,)
    return pooled @ wcls + bcls.reshape(-1)            # (2,)


if __name__ == "__main__":
    key = jax.random.PRNGKey(0)
    k_x, k_p = jax.random.split(key)

    N = 40  # small bag; deliberately NOT a multiple of tile_n
    x = jax.random.normal(k_x, (N, IN_FEAT), jnp.float32)
    params = init_params(k_p)
    ref = reference_forward(x, params)

    # Small tiles: exercises the multi-tile online softmax, the partial last
    # tile, a phantom tile in the 2-part split, and the part-merge epilogue.
    out = jax.block_until_ready(clam0_forward(x, params, tile_n=16, num_parts=2))
    assert out.shape == (N_CLASSES,)
    # bf16 matmul path -> loosened tolerance vs the f32 reference.
    assert jnp.allclose(out, ref, atol=3e-2, rtol=3e-2), (out, ref)

    # Default config (tile clamped to the bag -> single tile, single part).
    out2 = jax.block_until_ready(clam0_forward(x, params))
    assert jnp.allclose(out2, ref, atol=3e-2, rtol=3e-2), (out2, ref)

    print("KERNEL_OK")
</pallas_src>

<mosaic_0001>
module attributes {stable_mosaic.version = 11 : i64} {
  func.func @clam0_kernel(%arg0: i32, %arg1: i32, %arg2: memref<16x1024xbf16, #tpu.memory_space<vmem>>, %arg3: memref<1024x512xbf16, #tpu.memory_space<vmem>>, %arg4: memref<1x512xf32, #tpu.memory_space<vmem>>, %arg5: memref<512x768xbf16, #tpu.memory_space<vmem>>, %arg6: memref<1x768xf32, #tpu.memory_space<vmem>>, %arg7: memref<1x384xf32, #tpu.memory_space<vmem>>, %arg8: memref<8x512xf32, #tpu.memory_space<vmem>>, %arg9: memref<8x128xf32, #tpu.memory_space<vmem>>, %arg10: memref<8x128xf32, #tpu.memory_space<vmem>>, %arg11: memref<1x1xf32, #tpu.memory_space<vmem>>, %arg12: memref<1x1xf32, #tpu.memory_space<vmem>>, %arg13: memref<1x512xf32, #tpu.memory_space<vmem>>) attributes {dimension_semantics = [#tpu.dimension_semantics<parallel>, #tpu.dimension_semantics<arbitrary>], iteration_bounds = array<i64: 2, 2>, scalar_prefetch = 0 : i64, scratch_operands = 3 : i64, tpu.core_type = #tpu.core_type<tc>, window_params = [{transform_indices = @transform_0, window_bounds = array<i64: 16, 1024>}, {pipeline_mode = #tpu.pipeline_mode<synchronous>, transform_indices = @transform_1, window_bounds = array<i64: 1024, 512>}, {pipeline_mode = #tpu.pipeline_mode<synchronous>, transform_indices = @transform_2, window_bounds = array<i64: 1, 512>}, {pipeline_mode = #tpu.pipeline_mode<synchronous>, transform_indices = @transform_3, window_bounds = array<i64: 512, 768>}, {pipeline_mode = #tpu.pipeline_mode<synchronous>, transform_indices = @transform_4, window_bounds = array<i64: 1, 768>}, {pipeline_mode = #tpu.pipeline_mode<synchronous>, transform_indices = @transform_5, window_bounds = array<i64: 1, 384>}, {transform_indices = @transform_6, window_bounds = array<i64: 8, 512>}, {transform_indices = @transform_7, window_bounds = array<i64: 8, 128>}, {transform_indices = @transform_8, window_bounds = array<i64: 8, 128>}]} {
    %c0_i32 = arith.constant 0 : i32
    %0 = arith.cmpi eq, %arg1, %c0_i32 : i32
    %1 = arith.extui %0 : i1 to i32
    %c0_i32_0 = arith.constant 0 : i32
    %2 = arith.cmpi ne, %1, %c0_i32_0 : i32
    scf.if %2 {
      %cst_37 = arith.constant 0xFF800000 : f32
      %82 = vector.broadcast %cst_37 : f32 to vector<1x1xf32>
      %c0_38 = arith.constant 0 : index
      %c0_39 = arith.constant 0 : index
      %83 = vector.load %arg11[%c0_38, %c0_39] : memref<1x1xf32, #tpu.memory_space<vmem>>, vector<1x1xf32>
      tpu.vector_store %arg11[%c0_38, %c0_39], %82 {strides = array<i32>} : memref<1x1xf32, #tpu.memory_space<vmem>>, vector<1x1xf32>,
      %cst_40 = arith.constant 0.000000e+00 : f32
      %84 = vector.broadcast %cst_40 : f32 to vector<1x1xf32>
      %c0_41 = arith.constant 0 : index
      %c0_42 = arith.constant 0 : index
      %85 = vector.load %arg12[%c0_41, %c0_42] : memref<1x1xf32, #tpu.memory_space<vmem>>, vector<1x1xf32>
      tpu.vector_store %arg12[%c0_41, %c0_42], %84 {strides = array<i32>} : memref<1x1xf32, #tpu.memory_space<vmem>>, vector<1x1xf32>,
      %cst_43 = arith.constant 0.000000e+00 : f32
      %86 = vector.broadcast %cst_43 : f32 to vector<1x512xf32>
      %c0_44 = arith.constant 0 : index
      %c0_45 = arith.constant 0 : index
      %87 = vector.load %arg13[%c0_44, %c0_45] : memref<1x512xf32, #tpu.memory_space<vmem>>, vector<1x512xf32>
      tpu.vector_store %arg13[%c0_44, %c0_45], %86 {strides = array<i32>} : memref<1x512xf32, #tpu.memory_space<vmem>>, vector<1x512xf32>,
    } else {
    }
    %c2_i32 = arith.constant 2 : i32
    %3 = arith.muli %arg0, %c2_i32 : i32
    %4 = arith.addi %3, %arg1 : i32
    %c16_i32 = arith.constant 16 : i32
    %5 = arith.muli %4, %c16_i32 : i32
    %6 = tpu.iota {dimensions = array<i32: 0>} : vector<16x1xi32>
    %7 = vector.broadcast %5 : i32 to vector<16x1xi32>
    %8 = arith.addi %7, %6 : vector<16x1xi32>
    %c40_i32 = arith.constant 40 : i32
    %9 = vector.broadcast %c40_i32 : i32 to vector<16x1xi32>
    %10 = arith.cmpi slt, %8, %9 : vector<16x1xi32>
    %c0 = arith.constant 0 : index
    %c0_1 = arith.constant 0 : index
    %11 = vector.load %arg2[%c0, %c0_1] : memref<16x1024xbf16, #tpu.memory_space<vmem>>, vector<16x1024xbf16>
    %c0_2 = arith.constant 0 : index
    %c0_3 = arith.constant 0 : index
    %12 = vector.load %arg3[%c0_2, %c0_3] : memref<1024x512xbf16, #tpu.memory_space<vmem>>, vector<1024x512xbf16>
    %cst = arith.constant dense<0.000000e+00> : vector<16x512xf32>
    %13 = tpu.matmul %11, %12, %cst {dimension_numbers = #tpu.dot_dimension_numbers<[1], [0], [0], [1], [0, 0, 1, 1], [], []>} : vector<16x1024xbf16>, vector<1024x512xbf16>, vector<16x512xf32> -> vector<16x512xf32>
    %c0_4 = arith.constant 0 : index
    %c0_5 = arith.constant 0 : index
    %14 = vector.load %arg4[%c0_4, %c0_5] : memref<1x512xf32, #tpu.memory_space<vmem>>, vector<1x512xf32>
    %15 = vector.broadcast %14 : vector<1x512xf32> to vector<16x512xf32>
    %16 = arith.addf %13, %15 : vector<16x512xf32>
    %cst_6 = arith.constant 0.000000e+00 : f32
    %17 = vector.broadcast %cst_6 : f32 to vector<16x512xf32>
    %18 = arith.maximumf %16, %17 : vector<16x512xf32>
    %cst_7 = arith.constant 0.000000e+00 : f32
    %19 = vector.shape_cast %10 : vector<16x1xi1> to vector<16x1xi1>
    %20 = vector.broadcast %19 : vector<16x1xi1> to vector<16x512xi1>
    %21 = vector.broadcast %cst_7 : f32 to vector<16x512xf32>
    %22 = arith.select %20, %18, %21 : vector<16x512xi1>, vector<16x512xf32>
    %23 = arith.truncf %22 : vector<16x512xf32> to vector<16x512xbf16>
    %c0_8 = arith.constant 0 : index
    %c0_9 = arith.constant 0 : index
    %24 = vector.load %arg5[%c0_8, %c0_9] : memref<512x768xbf16, #tpu.memory_space<vmem>>, vector<512x768xbf16>
    %cst_10 = arith.constant dense<0.000000e+00> : vector<16x768xf32>
    %25 = tpu.matmul %23, %24, %cst_10 {dimension_numbers = #tpu.dot_dimension_numbers<[1], [0], [0], [1], [0, 0, 1, 1], [], []>} : vector<16x512xbf16>, vector<512x768xbf16>, vector<16x768xf32> -> vector<16x768xf32>
    %c0_11 = arith.constant 0 : index
    %c0_12 = arith.constant 0 : index
    %26 = vector.load %arg6[%c0_11, %c0_12] : memref<1x768xf32, #tpu.memory_space<vmem>>, vector<1x768xf32>
    %27 = vector.broadcast %26 : vector<1x768xf32> to vector<16x768xf32>
    %28 = arith.addf %25, %27 : vector<16x768xf32>
    %29 = vector.extract_strided_slice %28 {offsets = [0, 0], sizes = [16, 384], strides = [1, 1]} : vector<16x768xf32> to vector<16x384xf32>
    %30 = math.tanh %29 : vector<16x384xf32>
    %31 = vector.extract_strided_slice %28 {offsets = [0, 384], sizes = [16, 384], strides = [1, 1]} : vector<16x768xf32> to vector<16x384xf32>
    %32 = arith.negf %31 : vector<16x384xf32>
    %33 = math.exp %32 : vector<16x384xf32>
    %cst_13 = arith.constant 1.000000e+00 : f32
    %34 = vector.broadcast %cst_13 : f32 to vector<16x384xf32>
    %35 = arith.addf %34, %33 : vector<16x384xf32>
    %36 = arith.divf %34, %35 : vector<16x384xf32>
    %37 = arith.mulf %30, %36 : vector<16x384xf32>
    %c0_14 = arith.constant 0 : index
    %c0_15 = arith.constant 0 : index
    %38 = vector.load %arg7[%c0_14, %c0_15] : memref<1x384xf32, #tpu.memory_space<vmem>>, vector<1x384xf32>
    %39 = vector.broadcast %38 : vector<1x384xf32> to vector<16x384xf32>
    %40 = arith.mulf %37, %39 : vector<16x384xf32>
    %cst_16 = arith.constant dense<0.000000e+00> : vector<16xf32>
    %41 = vector.multi_reduction <add>, %40, %cst_16 [1] : vector<16x384xf32> to vector<16xf32>
    %42 = vector.shape_cast %41 : vector<16xf32> to vector<16x1xf32>
    %c0_17 = arith.constant 0 : index
    %c0_18 = arith.constant 0 : index
    %43 = vector.load %arg11[%c0_17, %c0_18] : memref<1x1xf32, #tpu.memory_space<vmem>>, vector<1x1xf32>
    %cst_19 = arith.constant 0xFF800000 : f32
    %44 = vector.broadcast %cst_19 : f32 to vector<16x1xf32>
    %45 = arith.select %10, %42, %44 : vector<16x1xi1>, vector<16x1xf32>
    %46 = vector.shape_cast %45 : vector<16x1xf32> to vector<1x16x1xf32>
    %cst_20 = arith.constant dense<0xFF800000> : vector<1xf32>
    %47 = vector.multi_reduction <maximumf>, %46, %cst_20 [1, 2] : vector<1x16x1xf32> to vector<1xf32>
    %48 = vector.shape_cast %47 : vector<1xf32> to vector<1x1x1xf32>
    %49 = vector.extract %48[0, 0, 0] : f32 from vector<1x1x1xf32>
    %50 = vector.broadcast %49 : f32 to vector<1x1xf32>
    %51 = arith.maximumf %43, %50 : vector<1x1xf32>
    %cst_21 = arith.constant 0xFF800000 : f32
    %52 = vector.broadcast %cst_21 : f32 to vector<1x1xf32>
    %53 = arith.cmpf ogt, %51, %52 : vector<1x1xf32>
    %54 = arith.subf %43, %51 : vector<1x1xf32>
    %55 = math.exp %54 : vector<1x1xf32>
    %cst_22 = arith.constant 0.000000e+00 : f32
    %56 = vector.broadcast %cst_22 : f32 to vector<1x1xf32>
    %57 = arith.select %53, %55, %56 : vector<1x1xi1>, vector<1x1xf32>
    %58 = vector.broadcast %51 : vector<1x1xf32> to vector<16x1xf32>
    %59 = arith.subf %42, %58 : vector<16x1xf32>
    %60 = math.exp %59 : vector<16x1xf32>
    %cst_23 = arith.constant 0.000000e+00 : f32
    %61 = vector.broadcast %cst_23 : f32 to vector<16x1xf32>
    %62 = arith.select %10, %60, %61 : vector<16x1xi1>, vector<16x1xf32>
    %c0_24 = arith.constant 0 : index
    %c0_25 = arith.constant 0 : index
    %63 = vector.load %arg12[%c0_24, %c0_25] : memref<1x1xf32, #tpu.memory_space<vmem>>, vector<1x1xf32>
    %64 = arith.mulf %57, %63 : vector<1x1xf32>
    %65 = vector.shape_cast %62 : vector<16x1xf32> to vector<1x16x1xf32>
    %cst_26 = arith.constant dense<0.000000e+00> : vector<1xf32>
    %66 = vector.multi_reduction <add>, %65, %cst_26 [1, 2] : vector<1x16x1xf32> to vector<1xf32>
    %67 = vector.shape_cast %66 : vector<1xf32> to vector<1x1x1xf32>
    %68 = vector.extract %67[0, 0, 0] : f32 from vector<1x1x1xf32>
    %69 = vector.broadcast %68 : f32 to vector<1x1xf32>
    %70 = arith.addf %64, %69 : vector<1x1xf32>
    %c0_27 = arith.constant 0 : index
    %c0_28 = arith.constant 0 : index
    %71 = vector.load %arg12[%c0_27, %c0_28] : memref<1x1xf32, #tpu.memory_space<vmem>>, vector<1x1xf32>
    tpu.vector_store %arg12[%c0_27, %c0_28], %70 {strides = array<i32>} : memref<1x1xf32, #tpu.memory_space<vmem>>, vector<1x1xf32>,
    %c0_29 = arith.constant 0 : index
    %c0_30 = arith.constant 0 : index
    %72 = vector.load %arg13[%c0_29, %c0_30] : memref<1x512xf32, #tpu.memory_space<vmem>>, vector<1x512xf32>
    %73 = vector.broadcast %57 : vector<1x1xf32> to vector<1x512xf32>
    %74 = arith.mulf %73, %72 : vector<1x512xf32>
    %cst_31 = arith.constant dense<0.000000e+00> : vector<1x512xf32>
    %75 = tpu.matmul %62, %22, %cst_31 {dimension_numbers = #tpu.dot_dimension_numbers<[0], [0], [1], [1], [0, 1, 1, 1], [], []>} : vector<16x1xf32>, vector<16x512xf32>, vector<1x512xf32> -> vector<1x512xf32>
    %76 = arith.addf %74, %75 : vector<1x512xf32>
    %c0_32 = arith.constant 0 : index
    %c0_33 = arith.constant 0 : index
    %77 = vector.load %arg13[%c0_32, %c0_33] : memref<1x512xf32, #tpu.memory_space<vmem>>, vector<1x512xf32>
    tpu.vector_store %arg13[%c0_32, %c0_33], %76 {strides = array<i32>} : memref<1x512xf32, #tpu.memory_space<vmem>>, vector<1x512xf32>,
    %c0_34 = arith.constant 0 : index
    %c0_35 = arith.constant 0 : index
    %78 = vector.load %arg11[%c0_34, %c0_35] : memref<1x1xf32, #tpu.memory_space<vmem>>, vector<1x1xf32>
    tpu.vector_store %arg11[%c0_34, %c0_35], %51 {strides = array<i32>} : memref<1x1xf32, #tpu.memory_space<vmem>>, vector<1x1xf32>,
    %c1_i32 = arith.constant 1 : i32
    %79 = arith.cmpi eq, %arg1, %c1_i32 : i32
    %80 = arith.extui %79 : i1 to i32
    %c0_i32_36 = arith.constant 0 : i32
    %81 = arith.cmpi ne, %80, %c0_i32_36 : i32
    scf.if %81 {
      %c0_37 = arith.constant 0 : index
      %c0_38 = arith.constant 0 : index
      %82 = vector.load %arg13[%c0_37, %c0_38] : memref<1x512xf32, #tpu.memory_space<vmem>>, vector<1x512xf32>
      %83 = vector.shape_cast %82 : vector<1x512xf32> to vector<1x512xf32>
      %84 = vector.broadcast %83 : vector<1x512xf32> to vector<8x512xf32>
      %c0_39 = arith.constant 0 : index
      %c0_40 = arith.constant 0 : index
      %85 = vector.load %arg8[%c0_39, %c0_40] : memref<8x512xf32, #tpu.memory_space<vmem>>, vector<8x512xf32>
      tpu.vector_store %arg8[%c0_39, %c0_40], %84 {strides = array<i32>} : memref<8x512xf32, #tpu.memory_space<vmem>>, vector<8x512xf32>,
      %c0_41 = arith.constant 0 : index
      %c0_42 = arith.constant 0 : index
      %86 = vector.load %arg11[%c0_41, %c0_42] : memref<1x1xf32, #tpu.memory_space<vmem>>, vector<1x1xf32>
      %87 = vector.shape_cast %86 : vector<1x1xf32> to vector<1x1xf32>
      %88 = vector.broadcast %87 : vector<1x1xf32> to vector<8x128xf32>
      %c0_43 = arith.constant 0 : index
      %c0_44 = arith.constant 0 : index
      %89 = vector.load %arg9[%c0_43, %c0_44] : memref<8x128xf32, #tpu.memory_space<vmem>>, vector<8x128xf32>
      tpu.vector_store %arg9[%c0_43, %c0_44], %88 {strides = array<i32>} : memref<8x128xf32, #tpu.memory_space<vmem>>, vector<8x128xf32>,
      %c0_45 = arith.constant 0 : index
      %c0_46 = arith.constant 0 : index
      %90 = vector.load %arg12[%c0_45, %c0_46] : memref<1x1xf32, #tpu.memory_space<vmem>>, vector<1x1xf32>
      %91 = vector.shape_cast %90 : vector<1x1xf32> to vector<1x1xf32>
      %92 = vector.broadcast %91 : vector<1x1xf32> to vector<8x128xf32>
      %c0_47 = arith.constant 0 : index
      %c0_48 = arith.constant 0 : index
      %93 = vector.load %arg10[%c0_47, %c0_48] : memref<8x128xf32, #tpu.memory_space<vmem>>, vector<8x128xf32>
      tpu.vector_store %arg10[%c0_47, %c0_48], %92 {strides = array<i32>} : memref<8x128xf32, #tpu.memory_space<vmem>>, vector<8x128xf32>,
    } else {
    }
    return
  }
  func.func @transform_0(%arg0: i32, %arg1: i32) -> (i32, i32) {
    %c2_i32 = arith.constant 2 : i32
    %0 = arith.muli %arg0, %c2_i32 : i32
    %1 = arith.addi %0, %arg1 : i32
    %c2_i32_0 = arith.constant 2 : i32
    %2 = arith.minsi %1, %c2_i32_0 : i32
    %c0_i32 = arith.constant 0 : i32
    %c0_i32_1 = arith.constant 0 : i32
    return %2, %c0_i32 : i32, i32
  }
  func.func @transform_1(%arg0: i32, %arg1: i32) -> (i32, i32) {
    %c0_i32 = arith.constant 0 : i32
    %c0_i32_0 = arith.constant 0 : i32
    %c0_i32_1 = arith.constant 0 : i32
    return %c0_i32, %c0_i32_0 : i32, i32
  }
  func.func @transform_2(%arg0: i32, %arg1: i32) -> (i32, i32) {
    %c0_i32 = arith.constant 0 : i32
    %c0_i32_0 = arith.constant 0 : i32
    %c0_i32_1 = arith.constant 0 : i32
    return %c0_i32, %c0_i32_0 : i32, i32
  }
  func.func @transform_3(%arg0: i32, %arg1: i32) -> (i32, i32) {
    %c0_i32 = arith.constant 0 : i32
    %c0_i32_0 = arith.constant 0 : i32
    %c0_i32_1 = arith.constant 0 : i32
    return %c0_i32, %c0_i32_0 : i32, i32
  }
  func.func @transform_4(%arg0: i32, %arg1: i32) -> (i32, i32) {
    %c0_i32 = arith.constant 0 : i32
    %c0_i32_0 = arith.constant 0 : i32
    %c0_i32_1 = arith.constant 0 : i32
    return %c0_i32, %c0_i32_0 : i32, i32
  }
  func.func @transform_5(%arg0: i32, %arg1: i32) -> (i32, i32) {
    %c0_i32 = arith.constant 0 : i32
    %c0_i32_0 = arith.constant 0 : i32
    %c0_i32_1 = arith.constant 0 : i32
    return %c0_i32, %c0_i32_0 : i32, i32
  }
  func.func @transform_6(%arg0: i32, %arg1: i32) -> (i32, i32) {
    %c0_i32 = arith.constant 0 : i32
    %c0_i32_0 = arith.constant 0 : i32
    return %arg0, %c0_i32 : i32, i32
  }
  func.func @transform_7(%arg0: i32, %arg1: i32) -> (i32, i32) {
    %c0_i32 = arith.constant 0 : i32
    %c0_i32_0 = arith.constant 0 : i32
    return %arg0, %c0_i32 : i32, i32
  }
  func.func @transform_8(%arg0: i32, %arg1: i32) -> (i32, i32) {
    %c0_i32 = arith.constant 0 : i32
    %c0_i32_0 = arith.constant 0 : i32
    return %arg0, %c0_i32 : i32, i32
  }
}

module attributes {stable_mosaic.version = 11 : i64} {
  func.func @clam0_kernel(%arg0: i32, %arg1: i32, %arg2: memref<16x1024xbf16, #tpu.memory_space<vmem>>, %arg3: memref<1024x512xbf16, #tpu.memory_space<vmem>>, %arg4: memref<1x512xf32, #tpu.memory_space<vmem>>, %arg5: memref<512x768xbf16, #tpu.memory_space<vmem>>, %arg6: memref<1x768xf32, #tpu.memory_space<vmem>>, %arg7: memref<1x384xf32, #tpu.memory_space<vmem>>, %arg8: memref<8x512xf32, #tpu.memory_space<vmem>>, %arg9: memref<8x128xf32, #tpu.memory_space<vmem>>, %arg10: memref<8x128xf32, #tpu.memory_space<vmem>>, %arg11: memref<1x1xf32, #tpu.memory_space<vmem>>, %arg12: memref<1x1xf32, #tpu.memory_space<vmem>>, %arg13: memref<1x512xf32, #tpu.memory_space<vmem>>) attributes {dimension_semantics = [#tpu.dimension_semantics<parallel>, #tpu.dimension_semantics<arbitrary>], iteration_bounds = array<i64: 2, 2>, scalar_prefetch = 0 : i64, scratch_operands = 3 : i64, tpu.core_type = #tpu.core_type<tc>, window_params = [{transform_indices = @transform_0, window_bounds = array<i64: 16, 1024>}, {pipeline_mode = #tpu.pipeline_mode<synchronous>, transform_indices = @transform_1, window_bounds = array<i64: 1024, 512>}, {pipeline_mode = #tpu.pipeline_mode<synchronous>, transform_indices = @transform_2, window_bounds = array<i64: 1, 512>}, {pipeline_mode = #tpu.pipeline_mode<synchronous>, transform_indices = @transform_3, window_bounds = array<i64: 512, 768>}, {pipeline_mode = #tpu.pipeline_mode<synchronous>, transform_indices = @transform_4, window_bounds = array<i64: 1, 768>}, {pipeline_mode = #tpu.pipeline_mode<synchronous>, transform_indices = @transform_5, window_bounds = array<i64: 1, 384>}, {transform_indices = @transform_6, window_bounds = array<i64: 8, 512>}, {transform_indices = @transform_7, window_bounds = array<i64: 8, 128>}, {transform_indices = @transform_8, window_bounds = array<i64: 8, 128>}]} {
    %c0_i32 = arith.constant 0 : i32
    %0 = arith.cmpi eq, %arg1, %c0_i32 : i32
    %1 = arith.extui %0 : i1 to i32
    %c0_i32_0 = arith.constant 0 : i32
    %2 = arith.cmpi ne, %1, %c0_i32_0 : i32
    scf.if %2 {
      %cst_37 = arith.constant 0xFF800000 : f32
      %82 = vector.broadcast %cst_37 : f32 to vector<1x1xf32>
      %c0_38 = arith.constant 0 : index
      %c0_39 = arith.constant 0 : index
      %83 = vector.load %arg11[%c0_38, %c0_39] : memref<1x1xf32, #tpu.memory_space<vmem>>, vector<1x1xf32>
      tpu.vector_store %arg11[%c0_38, %c0_39], %82 {strides = array<i32>} : memref<1x1xf32, #tpu.memory_space<vmem>>, vector<1x1xf32>,
      %cst_40 = arith.constant 0.000000e+00 : f32
      %84 = vector.broadcast %cst_40 : f32 to vector<1x1xf32>
      %c0_41 = arith.constant 0 : index
      %c0_42 = arith.constant 0 : index
      %85 = vector.load %arg12[%c0_41, %c0_42] : memref<1x1xf32, #tpu.memory_space<vmem>>, vector<1x1xf32>
      tpu.vector_store %arg12[%c0_41, %c0_42], %84 {strides = array<i32>} : memref<1x1xf32, #tpu.memory_space<vmem>>, vector<1x1xf32>,
      %cst_43 = arith.constant 0.000000e+00 : f32
      %86 = vector.broadcast %cst_43 : f32 to vector<1x512xf32>
      %c0_44 = arith.constant 0 : index
      %c0_45 = arith.constant 0 : index
      %87 = vector.load %arg13[%c0_44, %c0_45] : memref<1x512xf32, #tpu.memory_space<vmem>>, vector<1x512xf32>
      tpu.vector_store %arg13[%c0_44, %c0_45], %86 {strides = array<i32>} : memref<1x512xf32, #tpu.memory_space<vmem>>, vector<1x512xf32>,
    } else {
    }
    %c2_i32 = arith.constant 2 : i32
    %3 = arith.muli %arg0, %c2_i32 : i32
    %4 = arith.addi %3, %arg1 : i32
    %c16_i32 = arith.constant 16 : i32
    %5 = arith.muli %4, %c16_i32 : i32
    %6 = tpu.iota {dimensions = array<i32: 0>} : vector<16x1xi32>
    %7 = vector.broadcast %5 : i32 to vector<16x1xi32>
    %8 = arith.addi %7, %6 : vector<16x1xi32>
    %c40_i32 = arith.constant 40 : i32
    %9 = vector.broadcast %c40_i32 : i32 to vector<16x1xi32>
    %10 = arith.cmpi slt, %8, %9 : vector<16x1xi32>
    %c0 = arith.constant 0 : index
    %c0_1 = arith.constant 0 : index
    %11 = vector.load %arg2[%c0, %c0_1] : memref<16x1024xbf16, #tpu.memory_space<vmem>>, vector<16x1024xbf16>
    %c0_2 = arith.constant 0 : index
    %c0_3 = arith.constant 0 : index
    %12 = vector.load %arg3[%c0_2, %c0_3] : memref<1024x512xbf16, #tpu.memory_space<vmem>>, vector<1024x512xbf16>
    %cst = arith.constant dense<0.000000e+00> : vector<16x512xf32>
    %13 = tpu.matmul %11, %12, %cst {dimension_numbers = #tpu.dot_dimension_numbers<[1], [0], [0], [1], [0, 0, 1, 1], [], []>} : vector<16x1024xbf16>, vector<1024x512xbf16>, vector<16x512xf32> -> vector<16x512xf32>
    %c0_4 = arith.constant 0 : index
    %c0_5 = arith.constant 0 : index
    %14 = vector.load %arg4[%c0_4, %c0_5] : memref<1x512xf32, #tpu.memory_space<vmem>>, vector<1x512xf32>
    %15 = vector.broadcast %14 : vector<1x512xf32> to vector<16x512xf32>
    %16 = arith.addf %13, %15 : vector<16x512xf32>
    %cst_6 = arith.constant 0.000000e+00 : f32
    %17 = vector.broadcast %cst_6 : f32 to vector<16x512xf32>
    %18 = arith.maximumf %16, %17 : vector<16x512xf32>
    %cst_7 = arith.constant 0.000000e+00 : f32
    %19 = vector.shape_cast %10 : vector<16x1xi1> to vector<16x1xi1>
    %20 = vector.broadcast %19 : vector<16x1xi1> to vector<16x512xi1>
    %21 = vector.broadcast %cst_7 : f32 to vector<16x512xf32>
    %22 = arith.select %20, %18, %21 : vector<16x512xi1>, vector<16x512xf32>
    %23 = arith.truncf %22 : vector<16x512xf32> to vector<16x512xbf16>
    %c0_8 = arith.constant 0 : index
    %c0_9 = arith.constant 0 : index
    %24 = vector.load %arg5[%c0_8, %c0_9] : memref<512x768xbf16, #tpu.memory_space<vmem>>, vector<512x768xbf16>
    %cst_10 = arith.constant dense<0.000000e+00> : vector<16x768xf32>
    %25 = tpu.matmul %23, %24, %cst_10 {dimension_numbers = #tpu.dot_dimension_numbers<[1], [0], [0], [1], [0, 0, 1, 1], [], []>} : vector<16x512xbf16>, vector<512x768xbf16>, vector<16x768xf32> -> vector<16x768xf32>
    %c0_11 = arith.constant 0 : index
    %c0_12 = arith.constant 0 : index
    %26 = vector.load %arg6[%c0_11, %c0_12] : memref<1x768xf32, #tpu.memory_space<vmem>>, vector<1x768xf32>
    %27 = vector.broadcast %26 : vector<1x768xf32> to vector<16x768xf32>
    %28 = arith.addf %25, %27 : vector<16x768xf32>
    %29 = vector.extract_strided_slice %28 {offsets = [0, 0], sizes = [16, 384], strides = [1, 1]} : vector<16x768xf32> to vector<16x384xf32>
    %30 = math.tanh %29 : vector<16x384xf32>
    %31 = vector.extract_strided_slice %28 {offsets = [0, 384], sizes = [16, 384], strides = [1, 1]} : vector<16x768xf32> to vector<16x384xf32>
    %32 = arith.negf %31 : vector<16x384xf32>
    %33 = math.exp %32 : vector<16x384xf32>
    %cst_13 = arith.constant 1.000000e+00 : f32
    %34 = vector.broadcast %cst_13 : f32 to vector<16x384xf32>
    %35 = arith.addf %34, %33 : vector<16x384xf32>
    %36 = arith.divf %34, %35 : vector<16x384xf32>
    %37 = arith.mulf %30, %36 : vector<16x384xf32>
    %c0_14 = arith.constant 0 : index
    %c0_15 = arith.constant 0 : index
    %38 = vector.load %arg7[%c0_14, %c0_15] : memref<1x384xf32, #tpu.memory_space<vmem>>, vector<1x384xf32>
    %39 = vector.broadcast %38 : vector<1x384xf32> to vector<16x384xf32>
    %40 = arith.mulf %37, %39 : vector<16x384xf32>
    %cst_16 = arith.constant dense<0.000000e+00> : vector<16xf32>
    %41 = vector.multi_reduction <add>, %40, %cst_16 [1] : vector<16x384xf32> to vector<16xf32>
    %42 = vector.shape_cast %41 : vector<16xf32> to vector<16x1xf32>
    %c0_17 = arith.constant 0 : index
    %c0_18 = arith.constant 0 : index
    %43 = vector.load %arg11[%c0_17, %c0_18] : memref<1x1xf32, #tpu.memory_space<vmem>>, vector<1x1xf32>
    %cst_19 = arith.constant 0xFF800000 : f32
    %44 = vector.broadcast %cst_19 : f32 to vector<16x1xf32>
    %45 = arith.select %10, %42, %44 : vector<16x1xi1>, vector<16x1xf32>
    %46 = vector.shape_cast %45 : vector<16x1xf32> to vector<1x16x1xf32>
    %cst_20 = arith.constant dense<0xFF800000> : vector<1xf32>
    %47 = vector.multi_reduction <maximumf>, %46, %cst_20 [1, 2] : vector<1x16x1xf32> to vector<1xf32>
    %48 = vector.shape_cast %47 : vector<1xf32> to vector<1x1x1xf32>
    %49 = vector.extract %48[0, 0, 0] : f32 from vector<1x1x1xf32>
    %50 = vector.broadcast %49 : f32 to vector<1x1xf32>
    %51 = arith.maximumf %43, %50 : vector<1x1xf32>
    %cst_21 = arith.constant 0xFF800000 : f32
    %52 = vector.broadcast %cst_21 : f32 to vector<1x1xf32>
    %53 = arith.cmpf ogt, %51, %52 : vector<1x1xf32>
    %54 = arith.subf %43, %51 : vector<1x1xf32>
    %55 = math.exp %54 : vector<1x1xf32>
    %cst_22 = arith.constant 0.000000e+00 : f32
    %56 = vector.broadcast %cst_22 : f32 to vector<1x1xf32>
    %57 = arith.select %53, %55, %56 : vector<1x1xi1>, vector<1x1xf32>
    %58 = vector.broadcast %51 : vector<1x1xf32> to vector<16x1xf32>
    %59 = arith.subf %42, %58 : vector<16x1xf32>
    %60 = math.exp %59 : vector<16x1xf32>
    %cst_23 = arith.constant 0.000000e+00 : f32
    %61 = vector.broadcast %cst_23 : f32 to vector<16x1xf32>
    %62 = arith.select %10, %60, %61 : vector<16x1xi1>, vector<16x1xf32>
    %c0_24 = arith.constant 0 : index
    %c0_25 = arith.constant 0 : index
    %63 = vector.load %arg12[%c0_24, %c0_25] : memref<1x1xf32, #tpu.memory_space<vmem>>, vector<1x1xf32>
    %64 = arith.mulf %57, %63 : vector<1x1xf32>
    %65 = vector.shape_cast %62 : vector<16x1xf32> to vector<1x16x1xf32>
    %cst_26 = arith.constant dense<0.000000e+00> : vector<1xf32>
    %66 = vector.multi_reduction <add>, %65, %cst_26 [1, 2] : vector<1x16x1xf32> to vector<1xf32>
    %67 = vector.shape_cast %66 : vector<1xf32> to vector<1x1x1xf32>
    %68 = vector.extract %67[0, 0, 0] : f32 from vector<1x1x1xf32>
    %69 = vector.broadcast %68 : f32 to vector<1x1xf32>
    %70 = arith.addf %64, %69 : vector<1x1xf32>
    %c0_27 = arith.constant 0 : index
    %c0_28 = arith.constant 0 : index
    %71 = vector.load %arg12[%c0_27, %c0_28] : memref<1x1xf32, #tpu.memory_space<vmem>>, vector<1x1xf32>
    tpu.vector_store %arg12[%c0_27, %c0_28], %70 {strides = array<i32>} : memref<1x1xf32, #tpu.memory_space<vmem>>, vector<1x1xf32>,
    %c0_29 = arith.constant 0 : index
    %c0_30 = arith.constant 0 : index
    %72 = vector.load %arg13[%c0_29, %c0_30] : memref<1x512xf32, #tpu.memory_space<vmem>>, vector<1x512xf32>
    %73 = vector.broadcast %57 : vector<1x1xf32> to vector<1x512xf32>
    %74 = arith.mulf %73, %72 : vector<1x512xf32>
    %cst_31 = arith.constant dense<0.000000e+00> : vector<1x512xf32>
    %75 = tpu.matmul %62, %22, %cst_31 {dimension_numbers = #tpu.dot_dimension_numbers<[0], [0], [1], [1], [0, 1, 1, 1], [], []>} : vector<16x1xf32>, vector<16x512xf32>, vector<1x512xf32> -> vector<1x512xf32>
    %76 = arith.addf %74, %75 : vector<1x512xf32>
    %c0_32 = arith.constant 0 : index
    %c0_33 = arith.constant 0 : index
    %77 = vector.load %arg13[%c0_32, %c0_33] : memref<1x512xf32, #tpu.memory_space<vmem>>, vector<1x512xf32>
    tpu.vector_store %arg13[%c0_32, %c0_33], %76 {strides = array<i32>} : memref<1x512xf32, #tpu.memory_space<vmem>>, vector<1x512xf32>,
    %c0_34 = arith.constant 0 : index
    %c0_35 = arith.constant 0 : index
    %78 = vector.load %arg11[%c0_34, %c0_35] : memref<1x1xf32, #tpu.memory_space<vmem>>, vector<1x1xf32>
    tpu.vector_store %arg11[%c0_34, %c0_35], %51 {strides = array<i32>} : memref<1x1xf32, #tpu.memory_space<vmem>>, vector<1x1xf32>,
    %c1_i32 = arith.constant 1 : i32
    %79 = arith.cmpi eq, %arg1, %c1_i32 : i32
    %80 = arith.extui %79 : i1 to i32
    %c0_i32_36 = arith.constant 0 : i32
    %81 = arith.cmpi ne, %80, %c0_i32_36 : i32
    scf.if %81 {
      %c0_37 = arith.constant 0 : index
      %c0_38 = arith.constant 0 : index
      %82 = vector.load %arg13[%c0_37, %c0_38] : memref<1x512xf32, #tpu.memory_space<vmem>>, vector<1x512xf32>
      %83 = vector.shape_cast %82 : vector<1x512xf32> to vector<1x512xf32>
      %84 = vector.broadcast %83 : vector<1x512xf32> to vector<8x512xf32>
      %c0_39 = arith.constant 0 : index
      %c0_40 = arith.constant 0 : index
      %85 = vector.load %arg8[%c0_39, %c0_40] : memref<8x512xf32, #tpu.memory_space<vmem>>, vector<8x512xf32>
      tpu.vector_store %arg8[%c0_39, %c0_40], %84 {strides = array<i32>} : memref<8x512xf32, #tpu.memory_space<vmem>>, vector<8x512xf32>,
      %c0_41 = arith.constant 0 : index
      %c0_42 = arith.constant 0 : index
      %86 = vector.load %arg11[%c0_41, %c0_42] : memref<1x1xf32, #tpu.memory_space<vmem>>, vector<1x1xf32>
      %87 = vector.shape_cast %86 : vector<1x1xf32> to vector<1x1xf32>
      %88 = vector.broadcast %87 : vector<1x1xf32> to vector<8x128xf32>
      %c0_43 = arith.constant 0 : index
      %c0_44 = arith.constant 0 : index
      %89 = vector.load %arg9[%c0_43, %c0_44] : memref<8x128xf32, #tpu.memory_space<vmem>>, vector<8x128xf32>
      tpu.vector_store %arg9[%c0_43, %c0_44], %88 {strides = array<i32>} : memref<8x128xf32, #tpu.memory_space<vmem>>, vector<8x128xf32>,
      %c0_45 = arith.constant 0 : index
      %c0_46 = arith.constant 0 : index
      %90 = vector.load %arg12[%c0_45, %c0_46] : memref<1x1xf32, #tpu.memory_space<vmem>>, vector<1x1xf32>
      %91 = vector.shape_cast %90 : vector<1x1xf32> to vector<1x1xf32>
      %92 = vector.broadcast %91 : vector<1x1xf32> to vector<8x128xf32>
      %c0_47 = arith.constant 0 : index
      %c0_48 = arith.constant 0 : index
      %93 = vector.load %arg10[%c0_47, %c0_48] : memref<8x128xf32, #tpu.memory_space<vmem>>, vector<8x128xf32>
      tpu.vector_store %arg10[%c0_47, %c0_48], %92 {strides = array<i32>} : memref<8x128xf32, #tpu.memory_space<vmem>>, vector<8x128xf32>,
    } else {
    }
    return
  }
  func.func @transform_0(%arg0: i32, %arg1: i32) -> (i32, i32) {
    %c2_i32 = arith.constant 2 : i32
    %0 = arith.muli %arg0, %c2_i32 : i32
    %1 = arith.addi %0, %arg1 : i32
    %c2_i32_0 = arith.constant 2 : i32
    %2 = arith.minsi %1, %c2_i32_0 : i32
    %c0_i32 = arith.constant 0 : i32
    %c0_i32_1 = arith.constant 0 : i32
    return %2, %c0_i32 : i32, i32
  }
  func.func @transform_1(%arg0: i32, %arg1: i32) -> (i32, i32) {
    %c0_i32 = arith.constant 0 : i32
    %c0_i32_0 = arith.constant 0 : i32
    %c0_i32_1 = arith.constant 0 : i32
    return %c0_i32, %c0_i32_0 : i32, i32
  }
  func.func @transform_2(%arg0: i32, %arg1: i32) -> (i32, i32) {
    %c0_i32 = arith.constant 0 : i32
    %c0_i32_0 = arith.constant 0 : i32
    %c0_i32_1 = arith.constant 0 : i32
    return %c0_i32, %c0_i32_0 : i32, i32
  }
  func.func @transform_3(%arg0: i32, %arg1: i32) -> (i32, i32) {
    %c0_i32 = arith.constant 0 : i32
    %c0_i32_0 = arith.constant 0 : i32
    %c0_i32_1 = arith.constant 0 : i32
    return %c0_i32, %c0_i32_0 : i32, i32
  }
  func.func @transform_4(%arg0: i32, %arg1: i32) -> (i32, i32) {
    %c0_i32 = arith.constant 0 : i32
    %c0_i32_0 = arith.constant 0 : i32
    %c0_i32_1 = arith.constant 0 : i32
    return %c0_i32, %c0_i32_0 : i32, i32
  }
  func.func @transform_5(%arg0: i32, %arg1: i32) -> (i32, i32) {
    %c0_i32 = arith.constant 0 : i32
    %c0_i32_0 = arith.constant 0 : i32
    %c0_i32_1 = arith.constant 0 : i32
    return %c0_i32, %c0_i32_0 : i32, i32
  }
  func.func @transform_6(%arg0: i32, %arg1: i32) -> (i32, i32) {
    %c0_i32 = arith.constant 0 : i32
    %c0_i32_0 = arith.constant 0 : i32
    return %arg0, %c0_i32 : i32, i32
  }
  func.func @transform_7(%arg0: i32, %arg1: i32) -> (i32, i32) {
    %c0_i32 = arith.constant 0 : i32
    %c0_i32_0 = arith.constant 0 : i32
    return %arg0, %c0_i32 : i32, i32
  }
  func.func @transform_8(%arg0: i32, %arg1: i32) -> (i32, i32) {
    %c0_i32 = arith.constant 0 : i32
    %c0_i32_0 = arith.constant 0 : i32
    return %arg0, %c0_i32 : i32, i32
  }
}

</mosaic_0001>

<bundles_post_ra>
// kernel: tpu_custom_call.1
= control target key start
LH: loop header
LB: loop body
LE: loop exit
PB: predicated region body
PF: predicated region fallthrough
CT: control target
= control target key end

     0   :  { %s6876_s0 = inlined_call_operand.hbm [shape: bf16[40,1024], index: 0, kind: input, shape index: {}]   ;;  %s6877_s1 = inlined_call_operand.hbm [shape: bf16[1024,512], index: 1, kind: input, shape index: {}]   ;;  %s6878_s2 = inlined_call_operand.vmem [shape: f32[1,512], index: 2, kind: input, shape index: {}]   ;;  %s6879_s3 = inlined_call_operand.hbm [shape: bf16[512,768], index: 3, kind: input, shape index: {}]   ;;  %s6880_s4 = inlined_call_operand.vmem [shape: f32[1,768], index: 4, kind: input, shape index: {}]   ;;  %s6881_s5 = inlined_call_operand.vmem [shape: f32[1,384], index: 5, kind: input, shape index: {}]   ;;  %s6882_s6 = inlined_call_operand.hbm [shape: f32[16,512], index: 6, kind: output, shape index: {0}]   ;;  %s6883_s7 = inlined_call_operand.hbm [shape: f32[16,128], index: 7, kind: output, shape index: {1}]   ;;  %s6884_s8 = inlined_call_operand.hbm [shape: f32[16,128], index: 8, kind: output, shape index: {2}]  }
   0x1   :  { %6901 = sst [smem:[#allocation29_spill]] %s6882_s6 }
   0x2   :  { %6902 = sst [smem:[#allocation30_spill]] %s6883_s7 }
   0x3   :  { %6903 = sst [smem:[#allocation31_spill]] %s6884_s8 }
   0x4   :  { %14 = vsyncpa [#allocation6], 0 }
   0x5   :  { %16 = vsyncpa [#allocation6 + $0x1], 0 }
   0x6   :  { %17 = vsyncpa [#allocation9], 0 }
   0x7   :  { %18 = vsyncpa [#allocation7], 0 }
   0x8   :  { %20 = vsyncpa [#allocation7 + $0x1], 0 }
   0x9   :  { %21 = vsyncpa [#allocation13], 0 }
   0xa   :  { %23 = vsyncpa [#allocation13 + $0x1], 0  ;;  %s6286_s27 = smov 0   ;;  %s6288_s28 = smov 0  }
   0xb   :  { %s6290_s29 = smov 0   ;;  %s6292_s30 = smov 0  }
   0xc   :  { %s6294_s9 = smov 0   ;;  %s6296_s10 = smov 0  }
   0xd   :  { %s6298_s11 = smov 0   ;;  %s6300_s12 = smov 0  }
   0xe   :  { %s6302_s13 = smov 0   ;;  %s6304_s14 = smov 0  }
   0xf   :  { %s6306_s15 = smov 0  }
  0x10 LB: > { %6904 = sst [smem:[#allocation19_spill]] %s6181_s27  ;;  %s6342_s16 = sadd.s32 4294967295, %s6221_s15   ;;  %s6221_s15 = sphi %s6306_s15, %s29_s15   ;;  %s6217_s14 = sphi %s6304_s14, %s6944_s14   ;;  %s6213_s13 = sphi %s6302_s13, %s6943_s13   ;;  %s6209_s12 = sphi %s6300_s12, %s6942_s12   ;;  %s6205_s11 = sphi %s6298_s11, %s6950_s11   ;;  %s6201_s10 = sphi %s6296_s10, %s6949_s10   ;;  %s6197_s9 = sphi %s6294_s9, %s6948_s9   ;;  %s6193_s30 = sphi %s6292_s30, %s6947_s30   ;;  %s6189_s29 = sphi %s6290_s29, %s6939_s29   ;;  %s6185_s28 = sphi %s6288_s28, %s6946_s28   ;;  %s6181_s27 = sphi %s6286_s27, %s6945_s27  }
  0x11   : > { %6905 = sst [smem:[#allocation20_spill]] %s6189_s29  ;;  %s38_s18 = sadd.s32 1, %s6213_s13 }
  0x12   : > { %6906 = sst [smem:[#allocation21_spill]] %s6213_s13  ;;  %s41_s19 = sadd.s32 1, %s6217_s14 }
  0x13   : > { %6907 = sst [smem:[#allocation22_spill]] %s6217_s14  ;;  %p39_p0 = scmp.ge.s32.totalorder %s38_s18, 2 }
  0x14   : > { %s4473_s20 = sshll.u32 %s6217_s14, 1  ;;  %s56_s22 = sadd.s32 1, %s6201_s10 }
  0x15   : > { %s46_s21 = sadd.s32 %s6213_s13, %s4473_s20  ;;  %s6952_s18 = smov (%p39_p0, %s38_s18), 0 }
  0x16   : > { %6908 = sst [smem:[#allocation23_spill]] %s6952_s18  ;;  %s6954_s19 = smov (!%p39_p0, %s41_s19), %s6217_s14 }
  0x17   : > { %p47_p1 = scmp.lt.s32.totalorder %s46_s21, 2  ;;  %p63_p2 = scmp.ne.s32.totalorder %s6201_s10, %s6197_s9 }
  0x18   : > { %p43_p3 = scmp.ge.s32.totalorder %s6954_s19, 2  ;;  %p64_p4 = scmp.eq.s32.totalorder %s6221_s15, 0 }
  0x19   : > { %s6956_s21 = smov (!%p47_p1, %s46_s21), 2  ;;  %p69_p6 = scmp.ne.s32.totalorder %s6197_s9, %s6193_s30 }
  0x1a   : > { %s6958_s19 = smov (%p43_p3, %s6954_s19), 0  ;;  %p6360_p5 = por %p64_p4, %p63_p2 }
  0x1b   : > { %6909 = sst [smem:[#allocation24_spill]] %s6958_s19  ;;  %s4474_s24 = sshll.u32 %s6958_s19, 1 }
  0x1c   : > { %s6910_s23 = scalar_select %p6360_p5, 1, 0 }
  0x1d   : > { %p6893_p7 = scmp.eq.s32.totalorder %s6342_s16, 0  ;;  %s50_s25 = sadd.s32 %s4474_s24, %s6952_s18 }
  0x1e   : > { %s184_s26 = ssub.s32 %s6217_s14, %s6958_s19  ;;  %p51_p8 = scmp.lt.s32.totalorder %s50_s25, 2 }
  0x1f   : > { %p6373_p9 = por %p6893_p7, %p69_p6  ;;  %p185_p10 = scmp.eq.s32.totalorder %s184_s26, 0 }
  0x20   : > { %s187_s17 = sadd.s32 1, %s6189_s29  ;;  %s6960_s25 = smov (!%p51_p8, %s50_s25), 2 }
  0x21   : > { %s6911_s20 = scalar_select %p6373_p9, 1, 0 }
  0x22   : > { %s6379_s13 = scalar_select %p185_p10, %s6189_s29, %s187_s17  }
  0x23   : > { %s53_s30 = ssub.s32 %s6956_s21, %s6960_s25  ;;  %p197_p11 = scmp.ne.s32.totalorder %s6189_s29, %s6185_s28 }
  0x24   : > { %6912 = sst [smem:[#allocation25_spill]] %s6379_s13  ;;  %p54_p12 = scmp.eq.s32.totalorder %s53_s30, 0 }
  0x25   : > { %p198_p13 = scmp.eq.s32.totalorder %s6342_s16, 3  ;;  %p203_p0 = scmp.ne.s32.totalorder %s6185_s28, %s6181_s27 }
  0x26   : > { %s6913_s24 = sadd.s32 4294967294, %s6221_s15   ;;  %p4475_p4 = scmp.ge.s32.totalorder %s6221_s15, 1 }
  0x27   : > { %p204_p1 = scmp.eq.s32.totalorder %s6913_s24, 3  ;;  %p6392_p2 = por %p198_p13, %p197_p11 }
  0x28   : > { %s6390_s19 = scalar_select %p54_p12, %s6201_s10, %s56_s22  }
  0x29   : > { %s6915_s18 = scalar_select %p6392_p2, 1, 0 }
  0x2a   : > { %6914 = sst [smem:[#allocation26_spill]] %s6390_s19  ;;  %p6396_p3 = por %p204_p1, %p203_p0 }
  0x2b   : > { %6916 = sst [smem:[#allocation27_spill]] %s6915_s18  ;;  %p263_p6 = scmp.lt.s32.totalorder %s6221_s15, 5 }
  0x2c   : > { %s6917_s26 = scalar_select %p6396_p3, 1, 0 }
  0x2d   : > { %p6402_p8 = pnand %p4475_p4, %p263_p6  ;;  %s6223_s25 = smov [#allocation8]  }
  0x2e   : > { %6918 = sst [smem:[#allocation28_spill]] %s6917_s26  ;;  %s275_s30 = sshll.u32 %s6223_s25, 4  ;;  %s276_s30 = int_to_ptr.vmem [resolvable:$true] %s275_s30 }
  0x2f   : > { %s6919_s17 = scalar_select %p6402_p8, 1, 0 }
  0x30   : > { %p5110_p10 = pneg %p6402_p8  ;;  %s6224_s24 = smov [#allocation10]  }
  0x31   : > { %s291_s14 = sshll.u32 %s6224_s24, 4  ;;  %s5951_s29 = scalar_lea.hbm %s6877_s1, 32768  ;;  %s6414_s14 = int_to_ptr.vmem [resolvable:$true] %s291_s14 }
  0x32   : > { %p6410_p11 = pnand %p5110_p10, %p6893_p7  ;;  %p5952_p12 = scmp.ne.s32.totalorder %s6877_s1, %s5951_s29 }
  0x33   : > { %p5958_p4 = scmp.lt.u32.totalorder %s5951_s29, %s6877_s1 }
  0x34   : > { %p5953_p13 = pneg %p6410_p11 }
  0x36   : > { %p5954_p0 = pnand %p5953_p13, %p5952_p12 }
  0x38   : > { %p5955_p1 = pneg %p5954_p0 }
  0x3a   : > { %p5960_p6 = pnand %p5958_p4, %p5955_p1 }
  0x3c   : > { %5963 = shalt.err (!%p5960_p6)
}
  0x3d   : > { %s5964_s24 = scalar_lea.vmem %s276_s30, 32768  ;;  %p5972_p2 = scmp.lt.s32.totalorder %s276_s30, %s276_s30 }
  0x3e   : > { %p5965_p10 = scmp.ne.s32.totalorder %s276_s30, %s5964_s24  ;;  %p5973_p9 = scmp.lt.s32.totalorder %s5964_s24, %s5964_s24 }
  0x40   : > { %p5967_p7 = pnand %p5965_p10, %p5953_p13  ;;  %p5974_p8 = por %p5973_p9, %p5972_p2 }
  0x42   : > { %p5968_p3 = pneg %p5967_p7 }
  0x44   : > { %p5975_p5 = pnand %p5974_p8, %p5968_p3 }
  0x46   : > { %5978 = shalt.err (!%p5975_p5)
}
  0x47   : > { %s6225_s13 = smov 256   ;;  %s6226_s19 = smov 16  }
  0x48   : > { %5113 = dma.hbm_to_vmem [thread:$0]  (!%p6410_p11), %s6877_s1, 32768, %s276_s30, [#allocation9], %s6225_s13, %s6225_s13, %s6226_s19  }
  0x49   : > { %s5979_s25 = scalar_lea.hbm %s6879_s3, 24576 }
  0x4a   : > { %p5980_p7 = scmp.ne.s32.totalorder %s6879_s3, %s5979_s25  ;;  %p5986_p2 = scmp.lt.u32.totalorder %s5979_s25, %s6879_s3 }
  0x4c   : > { %p5982_p5 = pnand %p5980_p7, %p5953_p13 }
  0x4e   : > { %p5983_p9 = pneg %p5982_p5 }
  0x50   : > { %p5988_p3 = pnand %p5986_p2, %p5983_p9 }
  0x52   : > { %5991 = shalt.err (!%p5988_p3)
}
  0x53   : > { %s5992_s30 = scalar_lea.vmem %s6414_s14, 24576  ;;  %p6000_p1 = scmp.lt.s32.totalorder %s6414_s14, %s6414_s14 }
  0x54   : > { %p5993_p8 = scmp.ne.s32.totalorder %s6414_s14, %s5992_s30  ;;  %p6001_p4 = scmp.lt.s32.totalorder %s5992_s30, %s5992_s30 }
  0x56   : > { %p5995_p12 = pnand %p5993_p8, %p5953_p13  ;;  %p6002_p6 = por %p6001_p4, %p6000_p1 }
  0x58   : > { %p5996_p0 = pneg %p5995_p12 }
  0x5a   : > { %p6003_p10 = pnand %p6002_p6, %p5996_p0 }
  0x5c   : > { %6006 = shalt.err (!%p6003_p10)
}
  0x5d   : > { %s6227_s6 = smov 384   ;;  %s6228_s7 = smov 24  }
  0x5e   : > { %5116 = dma.hbm_to_vmem [thread:$0]  (!%p6410_p11), %s6879_s3, 24576, %s6414_s14, [#allocation9], %s6227_s6, %s6227_s6, %s6228_s7  }
  0x5f   : > { %p4478_p7 = scmp.ge.s32.totalorder %s6221_s15, 4 }
  0x60   : > { %p6921_p13 = scmp.ne.s32.totalorder (!%p4478_p7), %s6910_s23, 0 }
  0x61   : > { %307 = sbr.rel (%p4478_p7) target bundleno = 139 (0x8b), region = 36 }
  0x68   : > { %310 = sbr.rel (!%p6921_p13) target bundleno = 139 (0x8b), region = 40  ;;  %s311_s19 = sand.u32 (%p6921_p13), 1, %s6201_s10  }
  0x69   : > { %s4481_s8 = sshll.u32 (%p6921_p13), %s6956_s21, 1  ;;  %s4479_s27 = sshll.u32 (%p6921_p13), %s311_s19, 6 }
  0x6a   : > { %s321_s29 = ssub.s32 (%p6921_p13), 5, %s4481_s8  ;;  %s6471_s25 = scalar_lea.sflag (%p6921_p13), [#allocation6], %s311_s19 }
  0x6b   : > { %p322_p5 = scmp.lt.s32.totalorder (%p6921_p13), %s321_s29, 2  ;;  %s315_s14 = scalar_lea.vmem (%p6921_p13), [#allocation5], %s4479_s27 }
  0x6f   : > { %s6962_s29 = smov (!%p322_p5, %s321_s29), 2 }
  0x70   : > { %s6468_s26 = sshll.u32 %s6962_s29, 9 }
  0x71   : > { %s327_s22 = ssub.s32 1024, %s6468_s26 }
  0x72   : > { %328 = vsyncadd %s6471_s25, %s327_s22  ;;  %p4484_p11 = scmp.ne.s32.totalorder %s6468_s26, 0  ;;  %s5021_s23 = sshll.u32 %s6956_s21, 10 }
  0x73   : > { %s6479_s6 = scalar_lea.hbm %s6876_s0, %s5021_s23  ;;  %s334_s7 = sshll.u32 %s315_s14, 4  ;;  %s6481_s7 = int_to_ptr.vmem [resolvable:$true] %s334_s7 }
  0x74   : > { %s6007_s18 = scalar_lea.hbm %s6479_s6, %s6468_s26  ;;  %s6011_s21 = scalar_lea.hbm %s6876_s0, 2560 }
  0x75   : > { %p6008_p9 = scmp.ne.s32.totalorder %s6479_s6, %s6007_s18  ;;  %p6012_p8 = scmp.lt.u32.totalorder %s6479_s6, %s6876_s0 }
  0x76   : > { %p6013_p12 = scmp.lt.u32.totalorder %s6011_s21, %s6007_s18  ;;  %p6015_p1 = scmp.lt.u32.totalorder %s6007_s18, %s6479_s6 }
  0x77   : > { %p6009_p2 = pnand %p6008_p9, %p4484_p11 }
  0x78   : > { %p6014_p0 = por %p6013_p12, %p6012_p8 }
  0x79   : > { %p6010_p3 = pneg %p6009_p2 }
  0x7a   : > { %p6016_p4 = por %p6015_p1, %p6014_p0 }
  0x7c   : > { %p6017_p6 = pnand %p6016_p4, %p6010_p3 }
  0x7e   : > { %6020 = shalt.err (!%p6017_p6)
}
  0x7f   : > { %s6021_s29 = scalar_lea.vmem %s6481_s7, %s6468_s26  ;;  %s6229_s22 = smov [#allocation5]  }
  0x80   : > { %p6022_p10 = scmp.ne.s32.totalorder %s6481_s7, %s6021_s29  ;;  %s6025_s14 = sshll.u32 %s6229_s22, 4  ;;  %s6026_s14 = int_to_ptr.vmem [resolvable:$false] %s6025_s14 }
  0x81   : > { %s6027_s23 = scalar_lea.vmem %s6026_s14, 2048  ;;  %p6028_p5 = scmp.lt.s32.totalorder %s6481_s7, %s6026_s14 }
  0x82   : > { %p6023_p7 = pnand %p6022_p10, %p4484_p11  ;;  %p6029_p9 = scmp.lt.s32.totalorder %s6027_s23, %s6021_s29 }
  0x84   : > { %p6024_p13 = pneg %p6023_p7  ;;  %p6030_p2 = por %p6029_p9, %p6028_p5 }
  0x86   : > { %p6031_p8 = pnand %p6030_p2, %p6024_p13 }
  0x88   : > { %6034 = shalt.err (!%p6031_p8)
}
  0x89   : > { %s6230_s24 = smov 512   ;;  %s6231_s30 = smov 32  }
  0x8a   : > { %340 = dma.hbm_to_vmem [thread:$0]  (%p4484_p11), %s6479_s6, %s6468_s26, %s6481_s7, %s6471_s25, %s6230_s24, %s6230_s24, %s6231_s30  }
  0x8b PF: > { %p6922_p3 = scmp.ne.s32.totalorder %s6919_s17, 0 }
  0x8c   : > { %s348_s18 = sand.u32 (!%p6922_p3), 1, %s6197_s9   ;;  %p6923_p12 = scmp.ne.s32.totalorder (!%p6922_p3), %s6911_s20, 0 }
  0x8d   : > { %346 = sbr.rel (%p6922_p3) target bundleno = 1757 (0x6dd), region = 44  ;;  %s4490_s13 = sshll.u32 (!%p6922_p3), %s348_s18, 6 }
  0x8e   : > { %s349_s19 = scalar_lea.sflag (!%p6922_p3), [#allocation6], %s348_s18  ;;  %s6511_s21 = scalar_lea.vmem (!%p6922_p3), [#allocation5], %s4490_s13 }
  0x94   : > { %6164 = dma.done.wait (%p6923_p12), %s349_s19, 1024  }
  0x95   : > { %6166 = vsyncadd (%p6923_p12), %s349_s19, 4294966272  ;;  %p6924_p0 = scmp.eq.s32.totalorder %s6342_s16, 0 }
  0x97   : > { %6168 = dma.done.wait (%p6924_p0), [#allocation9], 57344   ;;  %p6925_p11 = pmov %p6924_p0 }
  0x98   : > { %s6522_s17 = sand.u32 1, %s6185_s28   ;;  %p4496_p1 = scmp.ne.s32.totalorder %s6205_s11, 0 }
  0x99   : > { %6170 = vsyncadd (%p6925_p11), [#allocation9], 4294909952  ;;  %s4493_s26 = sshll.u32 %s6522_s17, 5  ;;  %s4494_s25 = sshll.u32 %s6522_s17, 3  ;;  %vm417_vm0 = vcmask (!%p4496_p1), 0   ;;  %v420_v0 = vlaneseq (!%p4496_p1)  ;;  %v6232_v1 = vmov (!%p4496_p1), -inf  }
  0x9a   : > { %s6526_s6 = scalar_lea.vmem [#allocation11], %s4493_s26  ;;  %s6528_s7 = scalar_lea.vmem [#allocation12], %s4494_s25  ;;  %418 = vst.msk [vmem:[#allocation2] sm:$0x1] (!%p4496_p1), %vm417_vm0, %v6232_v1  ;;  %v6233_v2 = vmov (!%p4496_p1), 0.0  }
  0x9b   : > { %s6530_s8 = scalar_lea.vmem [#allocation14], %s4494_s25  ;;  %416 = sbr.rel (%p4496_p1) target bundleno = 162 (0xa2), region = 60  ;;  %419 = vst.msk [vmem:[#allocation3] sm:$0x1] (!%p4496_p1), %vm417_vm0, %v6233_v2  ;;  %vm422_vm1 = vcmp.lt.s32.totalorder (!%p4496_p1), %v420_v0, 512 }
  0x9c   : > { %424 = vst.msk [vmem:[#allocation4] sm:$0xf] (!%p4496_p1), %vm422_vm1, %v6233_v2 }
  0xa2 PF: > { %v5236_v3 = vld [vmem:[#allocation8 + $0x4] ss:$16 sps:$4 sm:$0xff]   ;;  %v5240_v5 = vld [vmem:[#allocation8] ss:$16 sps:$4 sm:$0xff]   ;;  %v437_v53 = vld [vmem:[%s6511_s21 + $0x8] sm:$0xff]  ;;  %s4497_s20 = sshll.u32 %s6209_s12, 1 }
  0xa3   : > { %v5238_v4 = vld [vmem:[#allocation8 + $0x204] ss:$16 sps:$4 sm:$0xff]   ;;  %2042 = vmatprep.subr.bf16.mxu1 %v5236_v3  ;;  %v5241_v6 = vld [vmem:[#allocation8 + $0x200] ss:$16 sps:$4 sm:$0xff]   ;;  %v441_v54 = vld [vmem:[%s6511_s21 + $0x28] sm:$0xff]  ;;  %s426_s27 = sadd.s32 %s6205_s11, %s4497_s20  ;;  %vm3980_vm5 = vcmask 0  }
  0xa4   : > { %2085 = vmatprep.subr.bf16.mxu0 %v5238_v4  ;;  %v5242_v7 = vld [vmem:[#allocation8 + $0x24] ss:$16 sps:$4 sm:$0xff]   ;;  %2043 = vmatpush1.bf16.msra.mxu1 %v5240_v5  ;;  %v5246_v9 = vld [vmem:[#allocation8 + $0x20] ss:$16 sps:$4 sm:$0xff]   ;;  %v6537_v58 = vcombine.high %v437_v53, %v441_v54  ;;  %s4498_s14 = sshll.u32 %s426_s27, 4  ;;  %vm3965_vm6 = vcmask 7168  }
  0xa5   : > { %2086 = vmatpush1.bf16.msra.mxu0 %v5241_v6  ;;  %v5244_v8 = vld [vmem:[#allocation8 + $0x224] ss:$16 sps:$4 sm:$0xff]   ;;  %2044 = vmatprep.subr.bf16.mxu1 %v5242_v7  ;;  %v5247_v10 = vld [vmem:[#allocation8 + $0x220] ss:$16 sps:$4 sm:$0xff]   ;;  %vm4025_vm8 = vcmask 130048   ;;  %p5007_p4 = scmp.ne.s32.totalorder %s6205_s11, 1 }
  0xa6   : > { %2087 = vmatprep.subr.bf16.mxu0 %v5244_v8  ;;  %v5248_v11 = vld [vmem:[#allocation8 + $0x44] ss:$16 sps:$4 sm:$0xff]   ;;  %v5252_v13 = vld [vmem:[#allocation8 + $0x40] ss:$16 sps:$4 sm:$0xff]   ;;  %2117 = vmatprep.mubr.bf16.mxu0 %v6537_v58 }
  0xa7   : > { %v5250_v12 = vld [vmem:[#allocation8 + $0x244] ss:$16 sps:$4 sm:$0xff]   ;;  %v5253_v14 = vld [vmem:[#allocation8 + $0x240] ss:$16 sps:$4 sm:$0xff]  }
  0xa8   : > { %2045 = vmatpush1.bf16.msra.mxu1 %v5246_v9  ;;  %v5254_v15 = vld [vmem:[#allocation8 + $0x64] ss:$16 sps:$4 sm:$0xff]   ;;  %v5258_v17 = vld [vmem:[#allocation8 + $0x60] ss:$16 sps:$4 sm:$0xff]  }
  0xa9   : > { %2088 = vmatpush1.bf16.msra.mxu0 %v5247_v10  ;;  %2046 = vmatprep.subr.bf16.mxu1 %v5248_v11  ;;  %v5256_v16 = vld [vmem:[#allocation8 + $0x264] ss:$16 sps:$4 sm:$0xff]   ;;  %v5259_v18 = vld [vmem:[#allocation8 + $0x260] ss:$16 sps:$4 sm:$0xff]   ;;  %v5337_v10 = vld [vmem:[#allocation8 + $0xc] ss:$16 sps:$4 sm:$0xff]  }
  0xaa   : > { %2089 = vmatprep.subr.bf16.mxu0 %v5250_v12  ;;  %v5260_v19 = vld [vmem:[#allocation8 + $0x84] ss:$16 sps:$4 sm:$0xff]   ;;  %v5264_v21 = vld [vmem:[#allocation8 + $0x80] ss:$16 sps:$4 sm:$0xff]   ;;  %v6542_v12 = vcombine.low %v437_v53, %v441_v54  ;;  %v5389_v53 = vld [vmem:[#allocation8 + $0x128] ss:$16 sps:$4 sm:$0xff]  }
  0xab   : > { %v5262_v20 = vld [vmem:[#allocation8 + $0x284] ss:$16 sps:$4 sm:$0xff]   ;;  %v5265_v22 = vld [vmem:[#allocation8 + $0x280] ss:$16 sps:$4 sm:$0xff]  }
  0xac   : > { %2047 = vmatpush1.bf16.msra.mxu1 %v5252_v13  ;;  %v5266_v23 = vld [vmem:[#allocation8 + $0xa4] ss:$16 sps:$4 sm:$0xff]   ;;  %v5270_v25 = vld [vmem:[#allocation8 + $0xa0] ss:$16 sps:$4 sm:$0xff]  }
  0xad   : > { %2090 = vmatpush1.bf16.msra.mxu0 %v5253_v14  ;;  %2048 = vmatprep.subr.bf16.mxu1 %v5254_v15  ;;  %v5268_v24 = vld [vmem:[#allocation8 + $0x2a4] ss:$16 sps:$4 sm:$0xff]   ;;  %v5271_v26 = vld [vmem:[#allocation8 + $0x2a0] ss:$16 sps:$4 sm:$0xff]   ;;  %v5335_v14 = vld [vmem:[#allocation8 + $0x8] ss:$16 sps:$4 sm:$0xff]  }
  0xae   : > { %2091 = vmatprep.subr.bf16.mxu0 %v5256_v16  ;;  %v5272_v27 = vld [vmem:[#allocation8 + $0xc4] ss:$16 sps:$4 sm:$0xff]   ;;  %v5276_v29 = vld [vmem:[#allocation8 + $0xc0] ss:$16 sps:$4 sm:$0xff]   ;;  %v5343_v16 = vld [vmem:[#allocation8 + $0x2c] ss:$16 sps:$4 sm:$0xff]  }
  0xaf   : > { %v5274_v28 = vld [vmem:[#allocation8 + $0x2c4] ss:$16 sps:$4 sm:$0xff]   ;;  %v5277_v30 = vld [vmem:[#allocation8 + $0x2c0] ss:$16 sps:$4 sm:$0xff]  }
  0xb0   : > { %2049 = vmatpush1.bf16.msra.mxu1 %v5258_v17  ;;  %v5278_v31 = vld [vmem:[#allocation8 + $0xe4] ss:$16 sps:$4 sm:$0xff]   ;;  %v5282_v33 = vld [vmem:[#allocation8 + $0xe0] ss:$16 sps:$4 sm:$0xff]  }
  0xb1   : > { %2092 = vmatpush1.bf16.msra.mxu0 %v5259_v18  ;;  %2050 = vmatprep.subr.bf16.mxu1 %v5260_v19  ;;  %v5280_v32 = vld [vmem:[#allocation8 + $0x2e4] ss:$16 sps:$4 sm:$0xff]   ;;  %v5283_v34 = vld [vmem:[#allocation8 + $0x2e0] ss:$16 sps:$4 sm:$0xff]   ;;  %v5341_v18 = vld [vmem:[#allocation8 + $0x28] ss:$16 sps:$4 sm:$0xff]  }
  0xb2   : > { %2093 = vmatprep.subr.bf16.mxu0 %v5262_v20  ;;  %v5284_v35 = vld [vmem:[#allocation8 + $0x104] ss:$16 sps:$4 sm:$0xff]   ;;  %v5288_v37 = vld [vmem:[#allocation8 + $0x100] ss:$16 sps:$4 sm:$0xff]   ;;  %v5349_v20 = vld [vmem:[#allocation8 + $0x4c] ss:$16 sps:$4 sm:$0xff]  }
  0xb3   : > { %v5286_v36 = vld [vmem:[#allocation8 + $0x304] ss:$16 sps:$4 sm:$0xff]   ;;  %v5289_v38 = vld [vmem:[#allocation8 + $0x300] ss:$16 sps:$4 sm:$0xff]  }
  0xb4   : > { %2051 = vmatpush1.bf16.msra.mxu1 %v5264_v21  ;;  %v5290_v39 = vld [vmem:[#allocation8 + $0x124] ss:$16 sps:$4 sm:$0xff]   ;;  %v5294_v41 = vld [vmem:[#allocation8 + $0x120] ss:$16 sps:$4 sm:$0xff]  }
  0xb5   : > { %2094 = vmatpush1.bf16.msra.mxu0 %v5265_v22  ;;  %2052 = vmatprep.subr.bf16.mxu1 %v5266_v23  ;;  %v5292_v40 = vld [vmem:[#allocation8 + $0x324] ss:$16 sps:$4 sm:$0xff]   ;;  %v5295_v42 = vld [vmem:[#allocation8 + $0x320] ss:$16 sps:$4 sm:$0xff]   ;;  %v5347_v22 = vld [vmem:[#allocation8 + $0x48] ss:$16 sps:$4 sm:$0xff]  }
  0xb6   : > { %2095 = vmatprep.subr.bf16.mxu0 %v5268_v24  ;;  %v5296_v43 = vld [vmem:[#allocation8 + $0x144] ss:$16 sps:$4 sm:$0xff]   ;;  %v5300_v45 = vld [vmem:[#allocation8 + $0x140] ss:$16 sps:$4 sm:$0xff]   ;;  %v5355_v24 = vld [vmem:[#allocation8 + $0x6c] ss:$16 sps:$4 sm:$0xff]  }
  0xb7   : > { %v5298_v44 = vld [vmem:[#allocation8 + $0x344] ss:$16 sps:$4 sm:$0xff]   ;;  %v5301_v46 = vld [vmem:[#allocation8 + $0x340] ss:$16 sps:$4 sm:$0xff]  }
  0xb8   : > { %2053 = vmatpush1.bf16.msra.mxu1 %v5270_v25  ;;  %v5302_v47 = vld [vmem:[#allocation8 + $0x164] ss:$16 sps:$4 sm:$0xff]   ;;  %v5306_v49 = vld [vmem:[#allocation8 + $0x160] ss:$16 sps:$4 sm:$0xff]  }
  0xb9   : > { %2096 = vmatpush1.bf16.msra.mxu0 %v5271_v26  ;;  %2054 = vmatprep.subr.bf16.mxu1 %v5272_v27  ;;  %v5304_v48 = vld [vmem:[#allocation8 + $0x364] ss:$16 sps:$4 sm:$0xff]   ;;  %v5307_v50 = vld [vmem:[#allocation8 + $0x360] ss:$16 sps:$4 sm:$0xff]   ;;  %v5353_v26 = vld [vmem:[#allocation8 + $0x68] ss:$16 sps:$4 sm:$0xff]  }
  0xba   : > { %2097 = vmatprep.subr.bf16.mxu0 %v5274_v28  ;;  %v436_v51 = vld [vmem:[%s6511_s21] sm:$0xff]  ;;  %v5361_v28 = vld [vmem:[#allocation8 + $0x8c] ss:$16 sps:$4 sm:$0xff]  }
  0xbb   : > { %v440_v52 = vld [vmem:[%s6511_s21 + $0x20] sm:$0xff] }
  0xbc   : > { %2055 = vmatpush1.bf16.msra.mxu1 %v5276_v29  ;;  %v5308_v55 = vld [vmem:[#allocation8 + $0x184] ss:$16 sps:$4 sm:$0xff]   ;;  %v4500_v56 = vcombine.high %v436_v51, %v440_v52  ;;  %v5312_v59 = vld [vmem:[#allocation8 + $0x180] ss:$16 sps:$4 sm:$0xff]   ;;  %v6540_v11 = vcombine.low %v436_v51, %v440_v52  ;;  %v5391_v51 = vld [vmem:[#allocation8 + $0x12c] ss:$16 sps:$4 sm:$0xff]  }
  0xbd   : > { %2098 = vmatpush1.bf16.msra.mxu0 %v5277_v30  ;;  %2056 = vmatprep.subr.bf16.mxu1 %v5278_v31  ;;  %v5310_v57 = vld [vmem:[#allocation8 + $0x384] ss:$16 sps:$4 sm:$0xff]   ;;  %v5313_v60 = vld [vmem:[#allocation8 + $0x380] ss:$16 sps:$4 sm:$0xff]   ;;  %v5359_v30 = vld [vmem:[#allocation8 + $0x88] ss:$16 sps:$4 sm:$0xff]  }
  0xbe   : > { %2099 = vmatprep.subr.bf16.mxu0 %v5280_v32  ;;  %2074 = vmatprep.mubr.bf16.mxu1 %v4500_v56  ;;  %v5314_v61 = vld [vmem:[#allocation8 + $0x1a4] ss:$16 sps:$4 sm:$0xff]   ;;  %v5318_v63 = vld [vmem:[#allocation8 + $0x1a0] ss:$16 sps:$4 sm:$0xff]   ;;  %v5367_v32 = vld [vmem:[#allocation8 + $0xac] ss:$16 sps:$4 sm:$0xff]  }
  0xbf   : > { %v5316_v62 = vld [vmem:[#allocation8 + $0x3a4] ss:$16 sps:$4 sm:$0xff]   ;;  %v5319_v0 = vld [vmem:[#allocation8 + $0x3a0] ss:$16 sps:$4 sm:$0xff]  }
  0xc0   : > { %2057 = vmatpush1.bf16.msra.mxu1 %v5282_v33  ;;  %v5320_v1 = vld [vmem:[#allocation8 + $0x1c4] ss:$16 sps:$4 sm:$0xff]   ;;  %v5324_v3 = vld [vmem:[#allocation8 + $0x1c0] ss:$16 sps:$4 sm:$0xff]  }
  0xc1   : > { %2100 = vmatpush1.bf16.msra.mxu0 %v5283_v34  ;;  %2058 = vmatprep.subr.bf16.mxu1 %v5284_v35  ;;  %v5322_v2 = vld [vmem:[#allocation8 + $0x3c4] ss:$16 sps:$4 sm:$0xff]   ;;  %v5325_v4 = vld [vmem:[#allocation8 + $0x3c0] ss:$16 sps:$4 sm:$0xff]   ;;  %v5365_v34 = vld [vmem:[#allocation8 + $0xa8] ss:$16 sps:$4 sm:$0xff]  }
  0xc2   : > { %2101 = vmatprep.subr.bf16.mxu0 %v5286_v36  ;;  %v5326_v5 = vld [vmem:[#allocation8 + $0x1e4] ss:$16 sps:$4 sm:$0xff]   ;;  %v5330_v7 = vld [vmem:[#allocation8 + $0x1e0] ss:$16 sps:$4 sm:$0xff]   ;;  %v5373_v36 = vld [vmem:[#allocation8 + $0xcc] ss:$16 sps:$4 sm:$0xff]  }
  0xc3   : > { %v5328_v6 = vld [vmem:[#allocation8 + $0x3e4] ss:$16 sps:$4 sm:$0xff]   ;;  %v5331_v8 = vld [vmem:[#allocation8 + $0x3e0] ss:$16 sps:$4 sm:$0xff]  }
  0xc4   : > { %2059 = vmatpush1.bf16.msra.mxu1 %v5288_v37  ;;  %v5334_v9 = vld [vmem:[#allocation8 + $0x404] ss:$16 sps:$4 sm:$0xff]   ;;  %v5332_v13 = vld [vmem:[#allocation8 + $0x400] ss:$16 sps:$4 sm:$0xff]  }
  0xc5   : > { %2102 = vmatpush1.bf16.msra.mxu0 %v5289_v38  ;;  %2060 = vmatprep.subr.bf16.mxu1 %v5290_v39  ;;  %v5340_v15 = vld [vmem:[#allocation8 + $0x424] ss:$16 sps:$4 sm:$0xff]   ;;  %v5338_v17 = vld [vmem:[#allocation8 + $0x420] ss:$16 sps:$4 sm:$0xff]  }
  0xc6   : > { %2103 = vmatprep.subr.bf16.mxu0 %v5292_v40  ;;  %v5346_v19 = vld [vmem:[#allocation8 + $0x444] ss:$16 sps:$4 sm:$0xff]   ;;  %v5344_v21 = vld [vmem:[#allocation8 + $0x440] ss:$16 sps:$4 sm:$0xff]   ;;  %v5371_v40 = vld [vmem:[#allocation8 + $0xc8] ss:$16 sps:$4 sm:$0xff]  }
  0xc7   : > { %v5352_v23 = vld [vmem:[#allocation8 + $0x464] ss:$16 sps:$4 sm:$0xff]   ;;  %v5350_v25 = vld [vmem:[#allocation8 + $0x460] ss:$16 sps:$4 sm:$0xff]  }
  0xc8   : > { %2061 = vmatpush1.bf16.msra.mxu1 %v5294_v41  ;;  %v5358_v27 = vld [vmem:[#allocation8 + $0x484] ss:$16 sps:$4 sm:$0xff]   ;;  %v5356_v29 = vld [vmem:[#allocation8 + $0x480] ss:$16 sps:$4 sm:$0xff]  }
  0xc9   : > { %2104 = vmatpush1.bf16.msra.mxu0 %v5295_v42  ;;  %2062 = vmatprep.subr.bf16.mxu1 %v5296_v43  ;;  %v5364_v31 = vld [vmem:[#allocation8 + $0x4a4] ss:$16 sps:$4 sm:$0xff]   ;;  %v5362_v33 = vld [vmem:[#allocation8 + $0x4a0] ss:$16 sps:$4 sm:$0xff]   ;;  %v5379_v43 = vld [vmem:[#allocation8 + $0xec] ss:$16 sps:$4 sm:$0xff]  }
  0xca   : > { %2105 = vmatprep.subr.bf16.mxu0 %v5298_v44  ;;  %v5370_v35 = vld [vmem:[#allocation8 + $0x4c4] ss:$16 sps:$4 sm:$0xff]   ;;  %v5368_v39 = vld [vmem:[#allocation8 + $0x4c0] ss:$16 sps:$4 sm:$0xff]  }
  0xcb   : > { %v6547_v37 = vld [vmem:[%s6511_s21 + $0x10] sm:$0xff] }
  0xcc   : > { %2063 = vmatpush1.bf16.msra.mxu1 %v5300_v45  ;;  %v6550_v38 = vld [vmem:[%s6511_s21 + $0x30] sm:$0xff]  ;;  %v5377_v45 = vld [vmem:[#allocation8 + $0xe8] ss:$16 sps:$4 sm:$0xff]  }
  0xcd   : > { %2106 = vmatpush1.bf16.msra.mxu0 %v5301_v46  ;;  %2064 = vmatprep.subr.bf16.mxu1 %v5302_v47  ;;  %v6554_v41 = vcombine.high %v6547_v37, %v6550_v38  ;;  %v5376_v42 = vld [vmem:[#allocation8 + $0x4e4] ss:$16 sps:$4 sm:$0xff]   ;;  %v5374_v44 = vld [vmem:[#allocation8 + $0x4e0] ss:$16 sps:$4 sm:$0xff]   ;;  %v5385_v47 = vld [vmem:[#allocation8 + $0x10c] ss:$16 sps:$4 sm:$0xff]  }
  0xce   : > { %2107 = vmatprep.subr.bf16.mxu0 %v5304_v48  ;;  %v5382_v46 = vld [vmem:[#allocation8 + $0x504] ss:$16 sps:$4 sm:$0xff]   ;;  %v5380_v48 = vld [vmem:[#allocation8 + $0x500] ss:$16 sps:$4 sm:$0xff]  }
  0xcf   : > { %v5386_v52 = vld [vmem:[#allocation8 + $0x520] ss:$16 sps:$4 sm:$0xff]   ;;  %v5394_v54 = vld [vmem:[#allocation8 + $0x544] ss:$16 sps:$4 sm:$0xff]  }
  0xd0   : > { %2065 = vmatpush1.bf16.msra.mxu1 %v5306_v49  ;;  %v5383_v49 = vld [vmem:[#allocation8 + $0x108] ss:$16 sps:$4 sm:$0xff]  }
  0xd1   : > { %2108 = vmatpush1.bf16.msra.mxu0 %v5307_v50  ;;  %2066 = vmatprep.subr.bf16.mxu1 %v5308_v55  ;;  %v5388_v50 = vld [vmem:[#allocation8 + $0x524] ss:$16 sps:$4 sm:$0xff]   ;;  %v5397_v55 = vld [vmem:[#allocation8 + $0x14c] ss:$16 sps:$4 sm:$0xff]  }
  0xd2   : > { %2109 = vmatprep.subr.bf16.mxu0 %v5310_v57  ;;  %v5395_v57 = vld [vmem:[#allocation8 + $0x148] ss:$16 sps:$4 sm:$0xff]  }
  0xd4   : > { %2067 = vmatpush1.bf16.msra.mxu1 %v5312_v59  ;;  %v5400_v59 = vld [vmem:[#allocation8 + $0x564] ss:$16 sps:$4 sm:$0xff]  }
  0xd5   : > { %2110 = vmatpush1.bf16.msra.mxu0 %v5313_v60  ;;  %2068 = vmatprep.subr.bf16.mxu1 %v5314_v61  ;;  %v5403_v60 = vld [vmem:[#allocation8 + $0x16c] ss:$16 sps:$4 sm:$0xff]   ;;  %v5398_v61 = vld [vmem:[#allocation8 + $0x560] ss:$16 sps:$4 sm:$0xff]  }
  0xd6   : > { %2111 = vmatprep.subr.bf16.mxu0 %v5316_v62  ;;  %v5401_v62 = vld [vmem:[#allocation8 + $0x168] ss:$16 sps:$4 sm:$0xff]  }
  0xd8   : > { %2069 = vmatpush1.bf16.msra.mxu1 %v5318_v63  ;;  %v5406_v63 = vld [vmem:[#allocation8 + $0x584] ss:$16 sps:$4 sm:$0xff]  }
  0xd9   : > { %2112 = vmatpush1.bf16.msra.mxu0 %v5319_v0  ;;  %2070 = vmatprep.subr.bf16.mxu1 %v5320_v1  ;;  %v5409_v0 = vld [vmem:[#allocation8 + $0x18c] ss:$16 sps:$4 sm:$0xff]   ;;  %v5404_v1 = vld [vmem:[#allocation8 + $0x580] ss:$16 sps:$4 sm:$0xff]  }
  0xda   : > { %2113 = vmatprep.subr.bf16.mxu0 %v5322_v2  ;;  %v5407_v2 = vld [vmem:[#allocation8 + $0x188] ss:$16 sps:$4 sm:$0xff]  }
  0xdc   : > { %2071 = vmatpush1.bf16.msra.mxu1 %v5324_v3  ;;  %v5412_v3 = vld [vmem:[#allocation8 + $0x5a4] ss:$16 sps:$4 sm:$0xff]  }
  0xdd   : > { %2114 = vmatpush1.bf16.msra.mxu0 %v5325_v4  ;;  %2072 = vmatprep.subr.bf16.mxu1 %v5326_v5  ;;  %v5415_v4 = vld [vmem:[#allocation8 + $0x1ac] ss:$16 sps:$4 sm:$0xff]   ;;  %v5410_v5 = vld [vmem:[#allocation8 + $0x5a0] ss:$16 sps:$4 sm:$0xff]  }
  0xde   : > { %2115 = vmatprep.subr.bf16.mxu0 %v5328_v6  ;;  %v5413_v6 = vld [vmem:[#allocation8 + $0x1a8] ss:$16 sps:$4 sm:$0xff]  }
  0xe0   : > { %2073 = vmatpush1.bf16.msra.mxu1 %v5330_v7  ;;  %v5418_v7 = vld [vmem:[#allocation8 + $0x5c4] ss:$16 sps:$4 sm:$0xff]  }
  0xe1   : > { %2116 = vmatpush1.bf16.msra.mxu0 %v5331_v8  ;;  %2214 = vmatprep.subr.bf16.mxu1 %v5337_v10  ;;  %v5421_v8 = vld [vmem:[#allocation8 + $0x1cc] ss:$16 sps:$4 sm:$0xff]   ;;  %v5419_v10 = vld [vmem:[#allocation8 + $0x1c8] ss:$16 sps:$4 sm:$0xff]  }
  0xe2   : > { %2128 = vmatprep.subr.bf16.mxu0 %v5334_v9  ;;  %v5416_v9 = vld [vmem:[#allocation8 + $0x5c0] ss:$16 sps:$4 sm:$0xff]  }
  0xe3   : > { %2075 = vmatmul.mubr.bf16.vlgmr.msra.gmra.mrb[0].mxu1 %v6540_v11 }
  0xe4   : > { %2118 = vmatmul.mubr.bf16.vlgmr.msra.gmra.mrb[0].mxu0 %v6542_v12  ;;  %2215 = vmatpush1.bf16.msra.mxu1 %v5335_v14  ;;  %v5427_v14 = vld [vmem:[#allocation8 + $0x1ec] ss:$16 sps:$4 sm:$0xff]  }
  0xe5   : > { %2129 = vmatpush1.bf16.msra.mxu0 %v5332_v13  ;;  %2216 = vmatprep.subr.bf16.mxu1 %v5343_v16  ;;  %v5424_v13 = vld [vmem:[#allocation8 + $0x5e4] ss:$16 sps:$4 sm:$0xff]   ;;  %v5425_v16 = vld [vmem:[#allocation8 + $0x1e8] ss:$16 sps:$4 sm:$0xff]  }
  0xe6   : > { %2130 = vmatprep.subr.bf16.mxu0 %v5340_v15  ;;  %2246 = vmatprep.mubr.bf16.mxu1 %v4500_v56  ;;  %v5392_v56 = vld [vmem:[#allocation8 + $0x540] ss:$16 sps:$4 sm:$0xff]  }
  0xe7   : > { %2160 = vmatprep.mubr.bf16.mxu0 %v6554_v41  ;;  %v5422_v15 = vld [vmem:[#allocation8 + $0x5e0] ss:$16 sps:$4 sm:$0xff]  }
  0xe8   : > { %2217 = vmatpush1.bf16.msra.mxu1 %v5341_v18  ;;  %v5433_v18 = vld [vmem:[#allocation8 + $0x20c] ss:$16 sps:$4 sm:$0xff]  }
  0xe9   : > { %2131 = vmatpush1.bf16.msra.mxu0 %v5338_v17  ;;  %2218 = vmatprep.subr.bf16.mxu1 %v5349_v20  ;;  %v5430_v17 = vld [vmem:[#allocation8 + $0x604] ss:$16 sps:$4 sm:$0xff]   ;;  %v5428_v20 = vld [vmem:[#allocation8 + $0x600] ss:$16 sps:$4 sm:$0xff]  }
  0xea   : > { %2132 = vmatprep.subr.bf16.mxu0 %v5346_v19  ;;  %v6559_v19 = vcombine.low %v6547_v37, %v6550_v38  ;;  %v5457_v37 = vld [vmem:[#allocation8 + $0x28c] ss:$16 sps:$4 sm:$0xff]   ;;  %v5452_v38 = vld [vmem:[#allocation8 + $0x680] ss:$16 sps:$4 sm:$0xff]  }
  0xec   : > { %2219 = vmatpush1.bf16.msra.mxu1 %v5347_v22  ;;  %v5436_v22 = vld [vmem:[#allocation8 + $0x624] ss:$16 sps:$4 sm:$0xff]  }
  0xed   : > { %2133 = vmatpush1.bf16.msra.mxu0 %v5344_v21  ;;  %2220 = vmatprep.subr.bf16.mxu1 %v5355_v24  ;;  %v5431_v21 = vld [vmem:[#allocation8 + $0x208] ss:$16 sps:$4 sm:$0xff]  }
  0xee   : > { %2134 = vmatprep.subr.bf16.mxu0 %v5352_v23  ;;  %v5439_v23 = vld [vmem:[#allocation8 + $0x22c] ss:$16 sps:$4 sm:$0xff]  }
  0xef   : > { %v6562_v24 = vld [vmem:[%s6511_s21 + $0x18] sm:$0xff] }
  0xf0   : > { %2221 = vmatpush1.bf16.msra.mxu1 %v5353_v26  ;;  %v5434_v26 = vld [vmem:[#allocation8 + $0x620] ss:$16 sps:$4 sm:$0xff]  }
  0xf1   : > { %2135 = vmatpush1.bf16.msra.mxu0 %v5350_v25  ;;  %2222 = vmatprep.subr.bf16.mxu1 %v5361_v28  ;;  %v6565_v25 = vld [vmem:[%s6511_s21 + $0x38] sm:$0xff] }
  0xf2   : > { %2136 = vmatprep.subr.bf16.mxu0 %v5358_v27  ;;  %v5437_v27 = vld [vmem:[#allocation8 + $0x228] ss:$16 sps:$4 sm:$0xff]   ;;  %v6571_v28 = vcombine.high %v6562_v24, %v6565_v25 }
  0xf4   : > { %2223 = vmatpush1.bf16.msra.mxu1 %v5359_v30  ;;  %v5445_v30 = vld [vmem:[#allocation8 + $0x24c] ss:$16 sps:$4 sm:$0xff]  }
  0xf5   : > { %2137 = vmatpush1.bf16.msra.mxu0 %v5356_v29  ;;  %2224 = vmatprep.subr.bf16.mxu1 %v5367_v32  ;;  %v5442_v29 = vld [vmem:[#allocation8 + $0x644] ss:$16 sps:$4 sm:$0xff]   ;;  %v5443_v32 = vld [vmem:[#allocation8 + $0x248] ss:$16 sps:$4 sm:$0xff]  }
  0xf6   : > { %2138 = vmatprep.subr.bf16.mxu0 %v5364_v31  ;;  %v5440_v31 = vld [vmem:[#allocation8 + $0x640] ss:$16 sps:$4 sm:$0xff]  }
  0xf8   : > { %2225 = vmatpush1.bf16.msra.mxu1 %v5365_v34  ;;  %v5446_v34 = vld [vmem:[#allocation8 + $0x660] ss:$16 sps:$4 sm:$0xff]  }
  0xf9   : > { %2139 = vmatpush1.bf16.msra.mxu0 %v5362_v33  ;;  %2226 = vmatprep.subr.bf16.mxu1 %v5373_v36  ;;  %v5451_v33 = vld [vmem:[#allocation8 + $0x26c] ss:$16 sps:$4 sm:$0xff]   ;;  %v5454_v36 = vld [vmem:[#allocation8 + $0x684] ss:$16 sps:$4 sm:$0xff]  }
  0xfa   : > { %2140 = vmatprep.subr.bf16.mxu0 %v5370_v35  ;;  %v5449_v35 = vld [vmem:[#allocation8 + $0x268] ss:$16 sps:$4 sm:$0xff]  }
  0xfc   : > { %2227 = vmatpush1.bf16.msra.mxu1 %v5371_v40  ;;  %v5463_v40 = vld [vmem:[#allocation8 + $0x2ac] ss:$16 sps:$4 sm:$0xff]  }
  0xfd   : > { %2141 = vmatpush1.bf16.msra.mxu0 %v5368_v39  ;;  %2228 = vmatprep.subr.bf16.mxu1 %v5379_v43  ;;  %v5455_v39 = vld [vmem:[#allocation8 + $0x288] ss:$16 sps:$4 sm:$0xff]  }
  0xfe   : > { %2142 = vmatprep.subr.bf16.mxu0 %v5376_v42  ;;  %v5458_v42 = vld [vmem:[#allocation8 + $0x6a0] ss:$16 sps:$4 sm:$0xff]   ;;  %v5461_v43 = vld [vmem:[#allocation8 + $0x2a8] ss:$16 sps:$4 sm:$0xff]  }
 0x100   : > { %2229 = vmatpush1.bf16.msra.mxu1 %v5377_v45  ;;  %v5469_v45 = vld [vmem:[#allocation8 + $0x2cc] ss:$16 sps:$4 sm:$0xff]  }
 0x101   : > { %2143 = vmatpush1.bf16.msra.mxu0 %v5374_v44  ;;  %2230 = vmatprep.subr.bf16.mxu1 %v5385_v47  ;;  %v5466_v44 = vld [vmem:[#allocation8 + $0x6c4] ss:$16 sps:$4 sm:$0xff]   ;;  %v5467_v47 = vld [vmem:[#allocation8 + $0x2c8] ss:$16 sps:$4 sm:$0xff]  }
 0x102   : > { %2144 = vmatprep.subr.bf16.mxu0 %v5382_v46  ;;  %v5464_v46 = vld [vmem:[#allocation8 + $0x6c0] ss:$16 sps:$4 sm:$0xff]  }
 0x104   : > { %2231 = vmatpush1.bf16.msra.mxu1 %v5383_v49  ;;  %v5475_v49 = vld [vmem:[#allocation8 + $0x2ec] ss:$16 sps:$4 sm:$0xff]  }
 0x105   : > { %2145 = vmatpush1.bf16.msra.mxu0 %v5380_v48  ;;  %2232 = vmatprep.subr.bf16.mxu1 %v5391_v51  ;;  %v5472_v48 = vld [vmem:[#allocation8 + $0x6e4] ss:$16 sps:$4 sm:$0xff]   ;;  %v5473_v51 = vld [vmem:[#allocation8 + $0x2e8] ss:$16 sps:$4 sm:$0xff]  }
 0x106   : > { %2146 = vmatprep.subr.bf16.mxu0 %v5388_v50  ;;  %v5470_v50 = vld [vmem:[#allocation8 + $0x6e0] ss:$16 sps:$4 sm:$0xff]  }
 0x108   : > { %2233 = vmatpush1.bf16.msra.mxu1 %v5389_v53  ;;  %v5481_v53 = vld [vmem:[#allocation8 + $0x30c] ss:$16 sps:$4 sm:$0xff]  }
 0x109   : > { %2147 = vmatpush1.bf16.msra.mxu0 %v5386_v52  ;;  %2234 = vmatprep.subr.bf16.mxu1 %v5397_v55  ;;  %v5478_v52 = vld [vmem:[#allocation8 + $0x704] ss:$16 sps:$4 sm:$0xff]   ;;  %v5479_v55 = vld [vmem:[#allocation8 + $0x308] ss:$16 sps:$4 sm:$0xff]  }
 0x10a   : > { %2148 = vmatprep.subr.bf16.mxu0 %v5394_v54  ;;  %v5476_v54 = vld [vmem:[#allocation8 + $0x700] ss:$16 sps:$4 sm:$0xff]  }
 0x10c   : > { %2235 = vmatpush1.bf16.msra.mxu1 %v5395_v57  ;;  %v5487_v57 = vld [vmem:[#allocation8 + $0x32c] ss:$16 sps:$4 sm:$0xff]  }
 0x10d   : > { %2149 = vmatpush1.bf16.msra.mxu0 %v5392_v56  ;;  %2236 = vmatprep.subr.bf16.mxu1 %v5403_v60  ;;  %v5484_v56 = vld [vmem:[#allocation8 + $0x724] ss:$16 sps:$4 sm:$0xff]   ;;  %v5485_v60 = vld [vmem:[#allocation8 + $0x328] ss:$16 sps:$4 sm:$0xff]  }
 0x10e   : > { %2150 = vmatprep.subr.bf16.mxu0 %v5400_v59  ;;  %v5482_v59 = vld [vmem:[#allocation8 + $0x720] ss:$16 sps:$4 sm:$0xff]  }
 0x110   : > { %2237 = vmatpush1.bf16.msra.mxu1 %v5401_v62  ;;  %v5493_v62 = vld [vmem:[#allocation8 + $0x34c] ss:$16 sps:$4 sm:$0xff]  }
 0x111   : > { %2151 = vmatpush1.bf16.msra.mxu0 %v5398_v61  ;;  %2238 = vmatprep.subr.bf16.mxu1 %v5409_v0  ;;  %v5490_v61 = vld [vmem:[#allocation8 + $0x744] ss:$16 sps:$4 sm:$0xff]   ;;  %v5491_v0 = vld [vmem:[#allocation8 + $0x348] ss:$16 sps:$4 sm:$0xff]  }
 0x112   : > { %2152 = vmatprep.subr.bf16.mxu0 %v5406_v63  ;;  %v5488_v63 = vld [vmem:[#allocation8 + $0x740] ss:$16 sps:$4 sm:$0xff]  }
 0x114   : > { %2239 = vmatpush1.bf16.msra.mxu1 %v5407_v2  ;;  %v5499_v2 = vld [vmem:[#allocation8 + $0x36c] ss:$16 sps:$4 sm:$0xff]  }
 0x115   : > { %2153 = vmatpush1.bf16.msra.mxu0 %v5404_v1  ;;  %2240 = vmatprep.subr.bf16.mxu1 %v5415_v4  ;;  %v5496_v1 = vld [vmem:[#allocation8 + $0x764] ss:$16 sps:$4 sm:$0xff]   ;;  %v5497_v4 = vld [vmem:[#allocation8 + $0x368] ss:$16 sps:$4 sm:$0xff]  }
 0x116   : > { %2154 = vmatprep.subr.bf16.mxu0 %v5412_v3  ;;  %v5494_v3 = vld [vmem:[#allocation8 + $0x760] ss:$16 sps:$4 sm:$0xff]  }
 0x118   : > { %2241 = vmatpush1.bf16.msra.mxu1 %v5413_v6  ;;  %v5505_v6 = vld [vmem:[#allocation8 + $0x38c] ss:$16 sps:$4 sm:$0xff]  }
 0x119   : > { %2155 = vmatpush1.bf16.msra.mxu0 %v5410_v5  ;;  %2242 = vmatprep.subr.bf16.mxu1 %v5421_v8  ;;  %v5502_v5 = vld [vmem:[#allocation8 + $0x784] ss:$16 sps:$4 sm:$0xff]   ;;  %v5503_v8 = vld [vmem:[#allocation8 + $0x388] ss:$16 sps:$4 sm:$0xff]  }
 0x11a   : > { %2156 = vmatprep.subr.bf16.mxu0 %v5418_v7  ;;  %v5500_v7 = vld [vmem:[#allocation8 + $0x780] ss:$16 sps:$4 sm:$0xff]  }
 0x11c   : > { %2243 = vmatpush1.bf16.msra.mxu1 %v5419_v10  ;;  %v5511_v10 = vld [vmem:[#allocation8 + $0x3ac] ss:$16 sps:$4 sm:$0xff]  }
 0x11d   : > { %2157 = vmatpush1.bf16.msra.mxu0 %v5416_v9  ;;  %2244 = vmatprep.subr.bf16.mxu1 %v5427_v14  ;;  %v5508_v9 = vld [vmem:[#allocation8 + $0x7a4] ss:$16 sps:$4 sm:$0xff]   ;;  %v5509_v14 = vld [vmem:[#allocation8 + $0x3a8] ss:$16 sps:$4 sm:$0xff]  }
 0x11e   : > { %2158 = vmatprep.subr.bf16.mxu0 %v5424_v13  ;;  %v5506_v13 = vld [vmem:[#allocation8 + $0x7a0] ss:$16 sps:$4 sm:$0xff]  }
 0x120   : > { %2245 = vmatpush1.bf16.msra.mxu1 %v5425_v16  ;;  %v5517_v16 = vld [vmem:[#allocation8 + $0x3cc] ss:$16 sps:$4 sm:$0xff]  }
 0x121   : > { %2159 = vmatpush1.bf16.msra.mxu0 %v5422_v15  ;;  %2257 = vmatprep.subr.bf16.mxu1 %v5433_v18  ;;  %v5514_v15 = vld [vmem:[#allocation8 + $0x7c4] ss:$16 sps:$4 sm:$0xff]   ;;  %v5515_v18 = vld [vmem:[#allocation8 + $0x3c8] ss:$16 sps:$4 sm:$0xff]  }
 0x122   : > { %2171 = vmatprep.subr.bf16.mxu0 %v5430_v17  ;;  %v5512_v17 = vld [vmem:[#allocation8 + $0x7c0] ss:$16 sps:$4 sm:$0xff]  }
 0x123   : > { %2247 = vmatmul.mubr.bf16.vlgmr.msra.gmra.mrb[4].mxu1 %v6540_v11  ;;  %v5448_v11 = vld [vmem:[#allocation8 + $0x664] ss:$16 sps:$4 sm:$0xff]  }
 0x124   : > { %2161 = vmatmul.mubr.bf16.vlgmr.msra.gmra.mrb[0].mxu0 %v6559_v19  ;;  %2258 = vmatpush1.bf16.msra.mxu1 %v5431_v21  ;;  %v5523_v21 = vld [vmem:[#allocation8 + $0x3ec] ss:$16 sps:$4 sm:$0xff]  }
 0x125   : > { %2172 = vmatpush1.bf16.msra.mxu0 %v5428_v20  ;;  %2259 = vmatprep.subr.bf16.mxu1 %v5439_v23  ;;  %v5520_v20 = vld [vmem:[#allocation8 + $0x7e4] ss:$16 sps:$4 sm:$0xff]   ;;  %v5521_v23 = vld [vmem:[#allocation8 + $0x3e8] ss:$16 sps:$4 sm:$0xff]  }
 0x126   : > { %2173 = vmatprep.subr.bf16.mxu0 %v5436_v22  ;;  %2203 = vmatprep.mubr.bf16.mxu0 %v6571_v28  ;;  %v5518_v22 = vld [vmem:[#allocation8 + $0x7e0] ss:$16 sps:$4 sm:$0xff]  }
 0x127   : > { %2289 = vmatprep.mubr.bf16.mxu1 %v6537_v58  ;;  %v5460_v58 = vld [vmem:[#allocation8 + $0x6a4] ss:$16 sps:$4 sm:$0xff]  }
 0x128   : > { %2260 = vmatpush1.bf16.msra.mxu1 %v5437_v27  ;;  %v5524_v27 = vld [vmem:[#allocation8 + $0x408] ss:$16 sps:$4 sm:$0xff]  }
 0x129   : > { %2174 = vmatpush1.bf16.msra.mxu0 %v5434_v26  ;;  %2261 = vmatprep.subr.bf16.mxu1 %v5445_v30  ;;  %v5526_v26 = vld [vmem:[#allocation8 + $0x40c] ss:$16 sps:$4 sm:$0xff]  }
 0x12a   : > { %2175 = vmatprep.subr.bf16.mxu0 %v5442_v29  ;;  %v6577_v29 = vcombine.low %v6562_v24, %v6565_v25  ;;  %v5529_v30 = vld [vmem:[#allocation8 + $0x42c] ss:$16 sps:$4 sm:$0xff]   ;;  %v5626_v24 = vld [vmem:[#allocation10 + $0x30] ss:$24 sps:$4 sm:$0xff]  }
 0x12b   : > { %v5530_v25 = vld [vmem:[#allocation8 + $0x448] ss:$16 sps:$4 sm:$0xff]  }
 0x12c   : > { %2262 = vmatpush1.bf16.msra.mxu1 %v5443_v32  ;;  %v5622_v32 = vld [vmem:[#allocation10 + $0x4] ss:$24 sps:$4 sm:$0xff]  }
 0x12d   : > { %2176 = vmatpush1.bf16.msra.mxu0 %v5440_v31  ;;  %2263 = vmatprep.subr.bf16.mxu1 %v5451_v33  ;;  %v5620_v31 = vld [vmem:[#allocation10] ss:$24 sps:$4 sm:$0xff]   ;;  %v5628_v33 = vld [vmem:[#allocation10 + $0x34] ss:$24 sps:$4 sm:$0xff]  }
 0x12e   : > { %2177 = vmatprep.subr.bf16.mxu0 %v5448_v11  ;;  %v5527_v11 = vld [vmem:[#allocation8 + $0x428] ss:$16 sps:$4 sm:$0xff]  }
 0x130   : > { %2264 = vmatpush1.bf16.msra.mxu1 %v5449_v35  ;;  %v5535_v35 = vld [vmem:[#allocation8 + $0x46c] ss:$16 sps:$4 sm:$0xff]  }
 0x131   : > { %2178 = vmatpush1.bf16.msra.mxu0 %v5446_v34  ;;  %2265 = vmatprep.subr.bf16.mxu1 %v5457_v37  ;;  %v5532_v34 = vld [vmem:[#allocation8 + $0x44c] ss:$16 sps:$4 sm:$0xff]   ;;  %v5632_v37 = vld [vmem:[#allocation10 + $0x60] ss:$24 sps:$4 sm:$0xff]  }
 0x132   : > { %2179 = vmatprep.subr.bf16.mxu0 %v5454_v36  ;;  %v5634_v36 = vld [vmem:[#allocation10 + $0x64] ss:$24 sps:$4 sm:$0xff]  }
 0x134   : > { %2266 = vmatpush1.bf16.msra.mxu1 %v5455_v39  ;;  %v5640_v39 = vld [vmem:[#allocation10 + $0x94] ss:$24 sps:$4 sm:$0xff]  }
 0x135   : > { %2180 = vmatpush1.bf16.msra.mxu0 %v5452_v38  ;;  %2267 = vmatprep.subr.bf16.mxu1 %v5463_v40  ;;  %v5538_v38 = vld [vmem:[#allocation8 + $0x48c] ss:$16 sps:$4 sm:$0xff]  }
 0x136   : > { %2181 = vmatprep.subr.bf16.mxu0 %v5460_v58  ;;  %v5536_v58 = vld [vmem:[#allocation8 + $0x488] ss:$16 sps:$4 sm:$0xff]   ;;  %v5541_v40 = vld [vmem:[#allocation8 + $0x4ac] ss:$16 sps:$4 sm:$0xff]  }
 0x138   : > { %2268 = vmatpush1.bf16.msra.mxu1 %v5461_v43  ;;  %v5644_v43 = vld [vmem:[#allocation10 + $0xc0] ss:$24 sps:$4 sm:$0xff]  }
 0x139   : > { %2182 = vmatpush1.bf16.msra.mxu0 %v5458_v42  ;;  %2269 = vmatprep.subr.bf16.mxu1 %v5469_v45  ;;  %v5646_v42 = vld [vmem:[#allocation10 + $0xc4] ss:$24 sps:$4 sm:$0xff]  }
 0x13a   : > { %2183 = vmatprep.subr.bf16.mxu0 %v5466_v44  ;;  %v5539_v44 = vld [vmem:[#allocation8 + $0x4a8] ss:$16 sps:$4 sm:$0xff]   ;;  %v5544_v45 = vld [vmem:[#allocation8 + $0x4cc] ss:$16 sps:$4 sm:$0xff]  }
 0x13c   : > { %2270 = vmatpush1.bf16.msra.mxu1 %v5467_v47  ;;  %v5650_v47 = vld [vmem:[#allocation10 + $0xf0] ss:$24 sps:$4 sm:$0xff]  }
 0x13d   : > { %2184 = vmatpush1.bf16.msra.mxu0 %v5464_v46  ;;  %2271 = vmatprep.subr.bf16.mxu1 %v5475_v49  ;;  %v5652_v46 = vld [vmem:[#allocation10 + $0xf4] ss:$24 sps:$4 sm:$0xff]  }
 0x13e   : > { %2185 = vmatprep.subr.bf16.mxu0 %v5472_v48  ;;  %v5542_v48 = vld [vmem:[#allocation8 + $0x4c8] ss:$16 sps:$4 sm:$0xff]   ;;  %v5547_v49 = vld [vmem:[#allocation8 + $0x4ec] ss:$16 sps:$4 sm:$0xff]  }
 0x140   : > { %2272 = vmatpush1.bf16.msra.mxu1 %v5473_v51  ;;  %v5656_v51 = vld [vmem:[#allocation10 + $0x120] ss:$24 sps:$4 sm:$0xff]  }
 0x141   : > { %2186 = vmatpush1.bf16.msra.mxu0 %v5470_v50  ;;  %2273 = vmatprep.subr.bf16.mxu1 %v5481_v53  ;;  %v5658_v50 = vld [vmem:[#allocation10 + $0x124] ss:$24 sps:$4 sm:$0xff]  }
 0x142   : > { %2187 = vmatprep.subr.bf16.mxu0 %v5478_v52  ;;  %v5545_v52 = vld [vmem:[#allocation8 + $0x4e8] ss:$16 sps:$4 sm:$0xff]   ;;  %v5550_v53 = vld [vmem:[#allocation8 + $0x50c] ss:$16 sps:$4 sm:$0xff]  }
 0x144   : > { %2274 = vmatpush1.bf16.msra.mxu1 %v5479_v55  ;;  %v5662_v55 = vld [vmem:[#allocation10 + $0x150] ss:$24 sps:$4 sm:$0xff]  }
 0x145   : > { %2188 = vmatpush1.bf16.msra.mxu0 %v5476_v54  ;;  %2275 = vmatprep.subr.bf16.mxu1 %v5487_v57  ;;  %v5664_v54 = vld [vmem:[#allocation10 + $0x154] ss:$24 sps:$4 sm:$0xff]  }
 0x146   : > { %2189 = vmatprep.subr.bf16.mxu0 %v5484_v56  ;;  %v5548_v56 = vld [vmem:[#allocation8 + $0x508] ss:$16 sps:$4 sm:$0xff]   ;;  %v5553_v57 = vld [vmem:[#allocation8 + $0x52c] ss:$16 sps:$4 sm:$0xff]  }
 0x148   : > { %2276 = vmatpush1.bf16.msra.mxu1 %v5485_v60  ;;  %v5668_v60 = vld [vmem:[#allocation10 + $0x180] ss:$24 sps:$4 sm:$0xff]  }
 0x149   : > { %2190 = vmatpush1.bf16.msra.mxu0 %v5482_v59  ;;  %2277 = vmatprep.subr.bf16.mxu1 %v5493_v62  ;;  %v5670_v59 = vld [vmem:[#allocation10 + $0x184] ss:$24 sps:$4 sm:$0xff]  }
 0x14a   : > { %2191 = vmatprep.subr.bf16.mxu0 %v5490_v61  ;;  %v5551_v61 = vld [vmem:[#allocation8 + $0x528] ss:$16 sps:$4 sm:$0xff]   ;;  %v5556_v62 = vld [vmem:[#allocation8 + $0x54c] ss:$16 sps:$4 sm:$0xff]  }
 0x14c   : > { %2278 = vmatpush1.bf16.msra.mxu1 %v5491_v0  ;;  %v5674_v0 = vld [vmem:[#allocation10 + $0x1b0] ss:$24 sps:$4 sm:$0xff]  }
 0x14d   : > { %2192 = vmatpush1.bf16.msra.mxu0 %v5488_v63  ;;  %2279 = vmatprep.subr.bf16.mxu1 %v5499_v2  ;;  %v5676_v63 = vld [vmem:[#allocation10 + $0x1b4] ss:$24 sps:$4 sm:$0xff]  }
 0x14e   : > { %2193 = vmatprep.subr.bf16.mxu0 %v5496_v1  ;;  %v5554_v1 = vld [vmem:[#allocation8 + $0x548] ss:$16 sps:$4 sm:$0xff]   ;;  %v5559_v2 = vld [vmem:[#allocation8 + $0x56c] ss:$16 sps:$4 sm:$0xff]  }
 0x150   : > { %2280 = vmatpush1.bf16.msra.mxu1 %v5497_v4  ;;  %v5680_v4 = vld [vmem:[#allocation10 + $0x1e0] ss:$24 sps:$4 sm:$0xff]  }
 0x151   : > { %2194 = vmatpush1.bf16.msra.mxu0 %v5494_v3  ;;  %2281 = vmatprep.subr.bf16.mxu1 %v5505_v6  ;;  %v5682_v3 = vld [vmem:[#allocation10 + $0x1e4] ss:$24 sps:$4 sm:$0xff]  }
 0x152   : > { %2195 = vmatprep.subr.bf16.mxu0 %v5502_v5  ;;  %v5557_v5 = vld [vmem:[#allocation8 + $0x568] ss:$16 sps:$4 sm:$0xff]   ;;  %v5562_v6 = vld [vmem:[#allocation8 + $0x58c] ss:$16 sps:$4 sm:$0xff]  }
 0x154   : > { %2282 = vmatpush1.bf16.msra.mxu1 %v5503_v8  ;;  %v5686_v8 = vld [vmem:[#allocation10 + $0x210] ss:$24 sps:$4 sm:$0xff]  }
 0x155   : > { %2196 = vmatpush1.bf16.msra.mxu0 %v5500_v7  ;;  %2283 = vmatprep.subr.bf16.mxu1 %v5511_v10  ;;  %v5688_v7 = vld [vmem:[#allocation10 + $0x214] ss:$24 sps:$4 sm:$0xff]  }
 0x156   : > { %2197 = vmatprep.subr.bf16.mxu0 %v5508_v9  ;;  %v5560_v9 = vld [vmem:[#allocation8 + $0x588] ss:$16 sps:$4 sm:$0xff]   ;;  %v5565_v10 = vld [vmem:[#allocation8 + $0x5ac] ss:$16 sps:$4 sm:$0xff]  }
 0x158   : > { %2284 = vmatpush1.bf16.msra.mxu1 %v5509_v14  ;;  %v5692_v14 = vld [vmem:[#allocation10 + $0x240] ss:$24 sps:$4 sm:$0xff]  }
 0x159   : > { %2198 = vmatpush1.bf16.msra.mxu0 %v5506_v13  ;;  %2285 = vmatprep.subr.bf16.mxu1 %v5517_v16  ;;  %v5694_v13 = vld [vmem:[#allocation10 + $0x244] ss:$24 sps:$4 sm:$0xff]  }
 0x15a   : > { %2199 = vmatprep.subr.bf16.mxu0 %v5514_v15  ;;  %v5563_v15 = vld [vmem:[#allocation8 + $0x5a8] ss:$16 sps:$4 sm:$0xff]   ;;  %v5568_v16 = vld [vmem:[#allocation8 + $0x5cc] ss:$16 sps:$4 sm:$0xff]  }
 0x15c   : > { %2286 = vmatpush1.bf16.msra.mxu1 %v5515_v18  ;;  %v5698_v18 = vld [vmem:[#allocation10 + $0x270] ss:$24 sps:$4 sm:$0xff]  }
 0x15d   : > { %2200 = vmatpush1.bf16.msra.mxu0 %v5512_v17  ;;  %2287 = vmatprep.subr.bf16.mxu1 %v5523_v21  ;;  %v5700_v17 = vld [vmem:[#allocation10 + $0x274] ss:$24 sps:$4 sm:$0xff]  }
 0x15e   : > { %2201 = vmatprep.subr.bf16.mxu0 %v5520_v20  ;;  %v5566_v20 = vld [vmem:[#allocation8 + $0x5c8] ss:$16 sps:$4 sm:$0xff]   ;;  %v5571_v21 = vld [vmem:[#allocation8 + $0x5ec] ss:$16 sps:$4 sm:$0xff]  }
 0x160   : > { %2288 = vmatpush1.bf16.msra.mxu1 %v5521_v23  ;;  %v5574_v23 = vld [vmem:[#allocation8 + $0x60c] ss:$16 sps:$4 sm:$0xff]  }
 0x161   : > { %2202 = vmatpush1.bf16.msra.mxu0 %v5518_v22  ;;  %2300 = vmatprep.subr.bf16.mxu1 %v5526_v26  ;;  %v5569_v22 = vld [vmem:[#allocation8 + $0x5e8] ss:$16 sps:$4 sm:$0xff]  }
 0x162   : > { %3594 = vmatprep.subr.bf16.mxu0 %v5622_v32  ;;  %v5572_v26 = vld [vmem:[#allocation8 + $0x608] ss:$16 sps:$4 sm:$0xff]  }
 0x163   : > { %2290 = vmatmul.mubr.bf16.vlgmr.msra.gmra.mrb[4].mxu1 %v6542_v12  ;;  %v5533_v12 = vld [vmem:[#allocation8 + $0x468] ss:$16 sps:$4 sm:$0xff]  }
 0x164   : > { %2204 = vmatmul.mubr.bf16.vlgmr.msra.gmra.mrb[0].mxu0 %v6577_v29  ;;  %2301 = vmatpush1.bf16.msra.mxu1 %v5524_v27  ;;  %v5577_v27 = vld [vmem:[#allocation8 + $0x62c] ss:$16 sps:$4 sm:$0xff]   ;;  %v5578_v32 = vld [vmem:[#allocation8 + $0x648] ss:$16 sps:$4 sm:$0xff]  }
 0x165   : > { %2332 = vmatprep.mubr.bf16.mxu1 %v6554_v41  ;;  %2302 = vmatprep.subr.bf16.mxu1 %v5529_v30  ;;  %v5638_v41 = vld [vmem:[#allocation10 + $0x90] ss:$24 sps:$4 sm:$0xff]  }
 0x166   : > { %3595 = vmatpush1.bf16.msra.mxu0 %v5620_v31  ;;  %v5575_v30 = vld [vmem:[#allocation8 + $0x628] ss:$16 sps:$4 sm:$0xff]   ;;  %v5580_v31 = vld [vmem:[#allocation8 + $0x64c] ss:$16 sps:$4 sm:$0xff]  }
 0x167   : > { %3596 = vmatprep.subr.bf16.mxu0 %v5628_v33  ;;  %v5581_v33 = vld [vmem:[#allocation8 + $0x668] ss:$16 sps:$4 sm:$0xff]  }
 0x168   : > { %2303 = vmatpush1.bf16.msra.mxu1 %v5527_v11  ;;  %v5583_v11 = vld [vmem:[#allocation8 + $0x66c] ss:$16 sps:$4 sm:$0xff]  }
 0x169   : > { %2304 = vmatprep.subr.bf16.mxu1 %v5532_v34  ;;  %v5586_v34 = vld [vmem:[#allocation8 + $0x68c] ss:$16 sps:$4 sm:$0xff]  }
 0x16a   : > { %3597 = vmatpush1.bf16.msra.mxu0 %v5626_v24  ;;  %v5584_v24 = vld [vmem:[#allocation8 + $0x688] ss:$16 sps:$4 sm:$0xff]  }
 0x16b   : > { %3598 = vmatprep.subr.bf16.mxu0 %v5634_v36 }
 0x16c   : > { %2305 = vmatpush1.bf16.msra.mxu1 %v5530_v25  ;;  %v5589_v25 = vld [vmem:[#allocation8 + $0x6ac] ss:$16 sps:$4 sm:$0xff]  }
 0x16d   : > { %2306 = vmatprep.subr.bf16.mxu1 %v5535_v35  ;;  %v5592_v35 = vld [vmem:[#allocation8 + $0x6cc] ss:$16 sps:$4 sm:$0xff]  }
 0x16e   : > { %3599 = vmatpush1.bf16.msra.mxu0 %v5632_v37  ;;  %v5706_v37 = vld [vmem:[#allocation10 + $0x2a4] ss:$24 sps:$4 sm:$0xff]  }
 0x16f   : > { %3600 = vmatprep.subr.bf16.mxu0 %v5640_v39  ;;  %v5704_v39 = vld [vmem:[#allocation10 + $0x2a0] ss:$24 sps:$4 sm:$0xff]  }
 0x170   : > { %2307 = vmatpush1.bf16.msra.mxu1 %v5533_v12 }
 0x171   : > { %2308 = vmatprep.subr.bf16.mxu1 %v5538_v38  ;;  %v5590_v38 = vld [vmem:[#allocation8 + $0x6c8] ss:$16 sps:$4 sm:$0xff]  }
 0x172   : > { %3601 = vmatpush1.bf16.msra.mxu0 %v5638_v41 }
 0x173   : > { %3602 = vmatprep.subr.bf16.mxu0 %v5646_v42  ;;  %v5593_v42 = vld [vmem:[#allocation8 + $0x6e8] ss:$16 sps:$4 sm:$0xff]  }
 0x174   : > { %2309 = vmatpush1.bf16.msra.mxu1 %v5536_v58  ;;  %v5595_v58 = vld [vmem:[#allocation8 + $0x6ec] ss:$16 sps:$4 sm:$0xff]  }
 0x175   : > { %2310 = vmatprep.subr.bf16.mxu1 %v5541_v40  ;;  %v5712_v40 = vld [vmem:[#allocation10 + $0x2d4] ss:$24 sps:$4 sm:$0xff]  }
 0x176   : > { %3603 = vmatpush1.bf16.msra.mxu0 %v5644_v43  ;;  %v5710_v43 = vld [vmem:[#allocation10 + $0x2d0] ss:$24 sps:$4 sm:$0xff]  }
 0x177   : > { %3604 = vmatprep.subr.bf16.mxu0 %v5652_v46  ;;  %v5601_v46 = vld [vmem:[#allocation8 + $0x72c] ss:$16 sps:$4 sm:$0xff]  }
 0x178   : > { %2311 = vmatpush1.bf16.msra.mxu1 %v5539_v44  ;;  %v5598_v44 = vld [vmem:[#allocation8 + $0x70c] ss:$16 sps:$4 sm:$0xff]  }
 0x179   : > { %2312 = vmatprep.subr.bf16.mxu1 %v5544_v45  ;;  %v5596_v45 = vld [vmem:[#allocation8 + $0x708] ss:$16 sps:$4 sm:$0xff]  }
 0x17a   : > { %3605 = vmatpush1.bf16.msra.mxu0 %v5650_v47  ;;  %v5718_v47 = vld [vmem:[#allocation10 + $0x304] ss:$24 sps:$4 sm:$0xff]  }
 0x17b   : > { %3606 = vmatprep.subr.bf16.mxu0 %v5658_v50  ;;  %v5602_v50 = vld [vmem:[#allocation8 + $0x748] ss:$16 sps:$4 sm:$0xff]  }
 0x17c   : > { %2313 = vmatpush1.bf16.msra.mxu1 %v5542_v48  ;;  %v5599_v48 = vld [vmem:[#allocation8 + $0x728] ss:$16 sps:$4 sm:$0xff]  }
 0x17d   : > { %2314 = vmatprep.subr.bf16.mxu1 %v5547_v49  ;;  %v5604_v49 = vld [vmem:[#allocation8 + $0x74c] ss:$16 sps:$4 sm:$0xff]  }
 0x17e   : > { %3607 = vmatpush1.bf16.msra.mxu0 %v5656_v51  ;;  %v5607_v51 = vld [vmem:[#allocation8 + $0x76c] ss:$16 sps:$4 sm:$0xff]  }
 0x17f   : > { %3608 = vmatprep.subr.bf16.mxu0 %v5664_v54  ;;  %v5608_v54 = vld [vmem:[#allocation8 + $0x788] ss:$16 sps:$4 sm:$0xff]  }
 0x180   : > { %2315 = vmatpush1.bf16.msra.mxu1 %v5545_v52  ;;  %v5605_v52 = vld [vmem:[#allocation8 + $0x768] ss:$16 sps:$4 sm:$0xff]  }
 0x181   : > { %2316 = vmatprep.subr.bf16.mxu1 %v5550_v53  ;;  %v5610_v53 = vld [vmem:[#allocation8 + $0x78c] ss:$16 sps:$4 sm:$0xff]  }
 0x182   : > { %3609 = vmatpush1.bf16.msra.mxu0 %v5662_v55  ;;  %v5613_v55 = vld [vmem:[#allocation8 + $0x7ac] ss:$16 sps:$4 sm:$0xff]  }
 0x183   : > { %3610 = vmatprep.subr.bf16.mxu0 %v5670_v59  ;;  %v5614_v59 = vld [vmem:[#allocation8 + $0x7c8] ss:$16 sps:$4 sm:$0xff]  }
 0x184   : > { %2317 = vmatpush1.bf16.msra.mxu1 %v5548_v56  ;;  %v5611_v56 = vld [vmem:[#allocation8 + $0x7a8] ss:$16 sps:$4 sm:$0xff]  }
 0x185   : > { %2318 = vmatprep.subr.bf16.mxu1 %v5553_v57  ;;  %v5616_v57 = vld [vmem:[#allocation8 + $0x7cc] ss:$16 sps:$4 sm:$0xff]  }
 0x186   : > { %3611 = vmatpush1.bf16.msra.mxu0 %v5668_v60  ;;  %v5619_v60 = vld [vmem:[#allocation8 + $0x7ec] ss:$16 sps:$4 sm:$0xff]  }
 0x187   : > { %3612 = vmatprep.subr.bf16.mxu0 %v5676_v63  ;;  %v5623_v63 = vld [vmem:[#allocation10 + $0x8] ss:$24 sps:$4 sm:$0xff]  }
 0x188   : > { %2319 = vmatpush1.bf16.msra.mxu1 %v5551_v61  ;;  %v5617_v61 = vld [vmem:[#allocation8 + $0x7e8] ss:$16 sps:$4 sm:$0xff]  }
 0x189   : > { %2320 = vmatprep.subr.bf16.mxu1 %v5556_v62  ;;  %v5625_v62 = vld [vmem:[#allocation10 + $0xc] ss:$24 sps:$4 sm:$0xff]  }
 0x18a   : > { %3613 = vmatpush1.bf16.msra.mxu0 %v5674_v0  ;;  %v5631_v0 = vld [vmem:[#allocation10 + $0x3c] ss:$24 sps:$4 sm:$0xff]  }
 0x18b   : > { %3614 = vmatprep.subr.bf16.mxu0 %v5682_v3  ;;  %v5635_v3 = vld [vmem:[#allocation10 + $0x68] ss:$24 sps:$4 sm:$0xff]  }
 0x18c   : > { %2321 = vmatpush1.bf16.msra.mxu1 %v5554_v1  ;;  %v5629_v1 = vld [vmem:[#allocation10 + $0x38] ss:$24 sps:$4 sm:$0xff]  }
 0x18d   : > { %2322 = vmatprep.subr.bf16.mxu1 %v5559_v2  ;;  %v5637_v2 = vld [vmem:[#allocation10 + $0x6c] ss:$24 sps:$4 sm:$0xff]  }
 0x18e   : > { %3615 = vmatpush1.bf16.msra.mxu0 %v5680_v4  ;;  %v5643_v4 = vld [vmem:[#allocation10 + $0x9c] ss:$24 sps:$4 sm:$0xff]  }
 0x18f   : > { %3616 = vmatprep.subr.bf16.mxu0 %v5688_v7  ;;  %v5647_v7 = vld [vmem:[#allocation10 + $0xc8] ss:$24 sps:$4 sm:$0xff]  }
 0x190   : > { %2323 = vmatpush1.bf16.msra.mxu1 %v5557_v5  ;;  %v5641_v5 = vld [vmem:[#allocation10 + $0x98] ss:$24 sps:$4 sm:$0xff]  }
 0x191   : > { %2324 = vmatprep.subr.bf16.mxu1 %v5562_v6  ;;  %v5649_v6 = vld [vmem:[#allocation10 + $0xcc] ss:$24 sps:$4 sm:$0xff]  }
 0x192   : > { %3617 = vmatpush1.bf16.msra.mxu0 %v5686_v8  ;;  %v5655_v8 = vld [vmem:[#allocation10 + $0xfc] ss:$24 sps:$4 sm:$0xff]  }
 0x193   : > { %3618 = vmatprep.subr.bf16.mxu0 %v5694_v13  ;;  %v5667_v13 = vld [vmem:[#allocation10 + $0x15c] ss:$24 sps:$4 sm:$0xff]  }
 0x194   : > { %2325 = vmatpush1.bf16.msra.mxu1 %v5560_v9  ;;  %v5653_v9 = vld [vmem:[#allocation10 + $0xf8] ss:$24 sps:$4 sm:$0xff]  }
 0x195   : > { %2326 = vmatprep.subr.bf16.mxu1 %v5565_v10  ;;  %v5659_v10 = vld [vmem:[#allocation10 + $0x128] ss:$24 sps:$4 sm:$0xff]  }
 0x196   : > { %3619 = vmatpush1.bf16.msra.mxu0 %v5692_v14  ;;  %v5665_v14 = vld [vmem:[#allocation10 + $0x158] ss:$24 sps:$4 sm:$0xff]  }
 0x197   : > { %3620 = vmatprep.subr.bf16.mxu0 %v5700_v17  ;;  %v5679_v17 = vld [vmem:[#allocation10 + $0x1bc] ss:$24 sps:$4 sm:$0xff]  }
 0x198   : > { %2327 = vmatpush1.bf16.msra.mxu1 %v5563_v15  ;;  %v5673_v15 = vld [vmem:[#allocation10 + $0x18c] ss:$24 sps:$4 sm:$0xff]  }
 0x199   : > { %2328 = vmatprep.subr.bf16.mxu1 %v5568_v16  ;;  %v5671_v16 = vld [vmem:[#allocation10 + $0x188] ss:$24 sps:$4 sm:$0xff]  }
 0x19a   : > { %3621 = vmatpush1.bf16.msra.mxu0 %v5698_v18  ;;  %v5677_v18 = vld [vmem:[#allocation10 + $0x1b8] ss:$24 sps:$4 sm:$0xff]  }
 0x19b   : > { %3622 = vmatprep.subr.bf16.mxu0 %v5706_v37  ;;  %v6604_v37 = vld [vmem:[%s6878_s2] sm:$0xf] }
 0x19c   : > { %2329 = vmatpush1.bf16.msra.mxu1 %v5566_v20  ;;  %v5685_v20 = vld [vmem:[#allocation10 + $0x1ec] ss:$24 sps:$4 sm:$0xff]  }
 0x19d   : > { %2330 = vmatprep.subr.bf16.mxu1 %v5571_v21  ;;  %v5683_v21 = vld [vmem:[#allocation10 + $0x1e8] ss:$24 sps:$4 sm:$0xff]  }
 0x19e   : > { %3623 = vmatpush1.bf16.msra.mxu0 %v5704_v39 }
 0x19f   : > { %3624 = vmatprep.subr.bf16.mxu0 %v5712_v40 }
 0x1a0   : > { %2331 = vmatpush1.bf16.msra.mxu1 %v5569_v22  ;;  %v5691_v22 = vld [vmem:[#allocation10 + $0x21c] ss:$24 sps:$4 sm:$0xff]  }
 0x1a1   : > { %2343 = vmatprep.subr.bf16.mxu1 %v5574_v23  ;;  %v5689_v23 = vld [vmem:[#allocation10 + $0x218] ss:$24 sps:$4 sm:$0xff]  }
 0x1a2   : > { %3625 = vmatpush1.bf16.msra.mxu0 %v5710_v43 }
 0x1a3   : > { %2333 = vmatmul.mubr.bf16.vlgmr.msra.gmra.mrb[4].mxu1 %v6559_v19  ;;  %v5587_v19 = vld [vmem:[#allocation8 + $0x6a8] ss:$16 sps:$4 sm:$0xff]   ;;  %3637 = vmatprep.subr.bf16.mxu0 %v5718_v47 }
 0x1a4   : > { %2344 = vmatpush1.bf16.msra.mxu1 %v5572_v26  ;;  %2375 = vmatprep.mubr.bf16.mxu1 %v6571_v28  ;;  %v5697_v26 = vld [vmem:[#allocation10 + $0x24c] ss:$24 sps:$4 sm:$0xff]  }
 0x1a5   : > { %2345 = vmatprep.subr.bf16.mxu1 %v5577_v27  ;;  %v5695_v27 = vld [vmem:[#allocation10 + $0x248] ss:$24 sps:$4 sm:$0xff]  }
 0x1a8   : > { %2346 = vmatpush1.bf16.msra.mxu1 %v5575_v30  ;;  %v5703_v30 = vld [vmem:[#allocation10 + $0x27c] ss:$24 sps:$4 sm:$0xff]  }
 0x1a9   : > { %2347 = vmatprep.subr.bf16.mxu1 %v5580_v31  ;;  %v5701_v31 = vld [vmem:[#allocation10 + $0x278] ss:$24 sps:$4 sm:$0xff]  }
 0x1ac   : > { %2348 = vmatpush1.bf16.msra.mxu1 %v5578_v32  ;;  %v5709_v32 = vld [vmem:[#allocation10 + $0x2ac] ss:$24 sps:$4 sm:$0xff]  }
 0x1ad   : > { %2349 = vmatprep.subr.bf16.mxu1 %v5583_v11  ;;  %v5707_v11 = vld [vmem:[#allocation10 + $0x2a8] ss:$24 sps:$4 sm:$0xff]  }
 0x1b0   : > { %2350 = vmatpush1.bf16.msra.mxu1 %v5581_v33  ;;  %v5715_v33 = vld [vmem:[#allocation10 + $0x2dc] ss:$24 sps:$4 sm:$0xff]  }
 0x1b1   : > { %2351 = vmatprep.subr.bf16.mxu1 %v5586_v34  ;;  %v5713_v34 = vld [vmem:[#allocation10 + $0x2d8] ss:$24 sps:$4 sm:$0xff]  }
 0x1b4   : > { %2352 = vmatpush1.bf16.msra.mxu1 %v5584_v24  ;;  %v5721_v24 = vld [vmem:[#allocation10 + $0x30c] ss:$24 sps:$4 sm:$0xff]  }
 0x1b5   : > { %2353 = vmatprep.subr.bf16.mxu1 %v5589_v25  ;;  %v428_v25 = vlaneseq }
 0x1b6   : > { %v6584_v36 = vpop.f32.mrb[0].mxu1 }
 0x1b7   : > { %v6586_v28 = vpop.f32.mrb[1].mxu1  ;;  %vm4203_vm9 = vcmp.lt.s32.totalorder %v428_v25, 512 }
 0x1b8   : > { %v6588_v12 = vpop.f32.mrb[2].mxu1  ;;  %2354 = vmatpush1.bf16.msra.mxu1 %v5587_v19  ;;  %v6594_v19 = vshrl.u32 %v428_v25, 7 }
 0x1b9   : > { %v6590_v41 = vpop.f32.mrb[3].mxu1  ;;  %2355 = vmatprep.subr.bf16.mxu1 %v5592_v35 }
 0x1ba   : > { %v6598_v35 = vsub.s32 0, %v6594_v19  ;;  %v430_v40 = vadd.s32 8, %v6594_v19 }
 0x1bc   : > { %2356 = vmatpush1.bf16.msra.mxu1 %v5590_v38  ;;  %v6607_v38 = vsub.s32 1, %v6594_v19  ;;  %v705_v39 = vrot.slane %v6604_v37, %v6598_v35 }
 0x1bd   : > { %2357 = vmatprep.subr.bf16.mxu1 %v5595_v58 }
 0x1be   : > { %v709_v58 = vrot.slane %v6604_v37, %v6607_v38  ;;  %v2077_v43 = vadd.f32 %v6584_v36, %v705_v39 }
 0x1c0   : > { %2358 = vmatpush1.bf16.msra.mxu1 %v5593_v42  ;;  %v431_v42 = vstv %s4498_s14 }
 0x1c1   : > { %2359 = vmatprep.subr.bf16.mxu1 %v5598_v44  ;;  %v2079_v44 = vadd.f32 %v6586_v28, %v709_v58  ;;  %v6619_v47 = vadd.s32 %v431_v42, %v430_v40  ;;  %v5770_v40 = vld [vmem:[#allocation10 + $0x4b0] ss:$24 sps:$4 sm:$0xff]  }
 0x1c3   : > { %vm435_vm3 = vcmp.lt.s32.totalorder %v6619_v47, 40 }
 0x1c4   : > { %2360 = vmatpush1.bf16.msra.mxu1 %v5596_v45 }
 0x1c5   : > { %2361 = vmatprep.subr.bf16.mxu1 %v5601_v46  ;;  %v6617_v46 = vadd.s32 %v431_v42, %v6594_v19  ;;  %v5773_v42 = vld [vmem:[#allocation10 + $0x4b8] ss:$24 sps:$4 sm:$0xff]  }
 0x1c7   : > { %vm434_vm2 = vcmp.lt.s32.totalorder %v6617_v46, 40 }
 0x1c8   : > { %2362 = vmatpush1.bf16.msra.mxu1 %v5599_v48  ;;  %v2081_v48 = vadd.f32 %v6588_v12, %v705_v39  ;;  %vm6631_vm4 = vmpackc.low %vm435_vm3, %vm434_vm2  ;;  %v5772_v39 = vld [vmem:[#allocation10 + $0x4b4] ss:$24 sps:$4 sm:$0xff]  }
 0x1c9   : > { %2363 = vmatprep.subr.bf16.mxu1 %v5604_v49 }
 0x1cc   : > { %2364 = vmatpush1.bf16.msra.mxu1 %v5602_v50 }
 0x1cd   : > { %2365 = vmatprep.subr.bf16.mxu1 %v5607_v51  ;;  %v2083_v51 = vadd.f32 %v6590_v41, %v709_v58  ;;  %v5775_v58 = vld [vmem:[#allocation10 + $0x4bc] ss:$24 sps:$4 sm:$0xff]  }
 0x1d0   : > { %2366 = vmatpush1.bf16.msra.mxu1 %v5605_v52 }
 0x1d1   : > { %2367 = vmatprep.subr.bf16.mxu1 %v5610_v53 }
 0x1d4   : > { %2368 = vmatpush1.bf16.msra.mxu1 %v5608_v54 }
 0x1d5   : > { %2369 = vmatprep.subr.bf16.mxu1 %v5613_v55 }
 0x1d8   : > { %2370 = vmatpush1.bf16.msra.mxu1 %v5611_v56 }
 0x1d9   : > { %2371 = vmatprep.subr.bf16.mxu1 %v5616_v57 }
 0x1dc   : > { %2372 = vmatpush1.bf16.msra.mxu1 %v5614_v59 }
 0x1dd   : > { %2373 = vmatprep.subr.bf16.mxu1 %v5619_v60 }
 0x1e0   : > { %2374 = vmatpush1.bf16.msra.mxu1 %v5617_v61  ;;  %v5716_v61 = vld [vmem:[#allocation10 + $0x300] ss:$24 sps:$4 sm:$0xff]  }
 0x1e1   : > { %3680 = vmatprep.subr.bf16.mxu1 %v5625_v62  ;;  %v5719_v62 = vld [vmem:[#allocation10 + $0x308] ss:$24 sps:$4 sm:$0xff]  }
 0x1e3   : > { %2376 = vmatmul.mubr.bf16.vlgmr.msra.gmra.mrb[4].mxu1 %v6577_v29  ;;  %v5661_v29 = vld [vmem:[#allocation10 + $0x12c] ss:$24 sps:$4 sm:$0xff]  }
 0x1e4   : > { %3681 = vmatpush1.bf16.msra.mxu1 %v5623_v63  ;;  %v5724_v63 = vld [vmem:[#allocation10 + $0x334] ss:$24 sps:$4 sm:$0xff]  }
 0x1e5   : > { %3682 = vmatprep.subr.bf16.mxu1 %v5631_v0  ;;  %v5727_v0 = vld [vmem:[#allocation10 + $0x33c] ss:$24 sps:$4 sm:$0xff]  }
 0x1e8   : > { %3683 = vmatpush1.bf16.msra.mxu1 %v5629_v1  ;;  %v5722_v1 = vld [vmem:[#allocation10 + $0x330] ss:$24 sps:$4 sm:$0xff]  }
 0x1e9   : > { %3684 = vmatprep.subr.bf16.mxu1 %v5637_v2  ;;  %v5725_v2 = vld [vmem:[#allocation10 + $0x338] ss:$24 sps:$4 sm:$0xff]  }
 0x1ec   : > { %3685 = vmatpush1.bf16.msra.mxu1 %v5635_v3  ;;  %v5730_v3 = vld [vmem:[#allocation10 + $0x364] ss:$24 sps:$4 sm:$0xff]  }
 0x1ed   : > { %3686 = vmatprep.subr.bf16.mxu1 %v5643_v4  ;;  %v5733_v4 = vld [vmem:[#allocation10 + $0x36c] ss:$24 sps:$4 sm:$0xff]  }
 0x1f0   : > { %3687 = vmatpush1.bf16.msra.mxu1 %v5641_v5  ;;  %v5728_v5 = vld [vmem:[#allocation10 + $0x360] ss:$24 sps:$4 sm:$0xff]  }
 0x1f1   : > { %3688 = vmatprep.subr.bf16.mxu1 %v5649_v6  ;;  %v5731_v6 = vld [vmem:[#allocation10 + $0x368] ss:$24 sps:$4 sm:$0xff]  }
 0x1f4   : > { %3689 = vmatpush1.bf16.msra.mxu1 %v5647_v7  ;;  %v5736_v7 = vld [vmem:[#allocation10 + $0x394] ss:$24 sps:$4 sm:$0xff]  }
 0x1f5   : > { %3690 = vmatprep.subr.bf16.mxu1 %v5655_v8  ;;  %v5739_v8 = vld [vmem:[#allocation10 + $0x39c] ss:$24 sps:$4 sm:$0xff]  }
 0x1f8   : > { %3691 = vmatpush1.bf16.msra.mxu1 %v5653_v9  ;;  %v5734_v9 = vld [vmem:[#allocation10 + $0x390] ss:$24 sps:$4 sm:$0xff]  }
 0x1f9   : > { %3692 = vmatprep.subr.bf16.mxu1 %v5661_v29  ;;  %v5737_v29 = vld [vmem:[#allocation10 + $0x398] ss:$24 sps:$4 sm:$0xff]  }
 0x1fc   : > { %3693 = vmatpush1.bf16.msra.mxu1 %v5659_v10  ;;  %v5742_v10 = vld [vmem:[#allocation10 + $0x3c4] ss:$24 sps:$4 sm:$0xff]  }
 0x1fd   : > { %3694 = vmatprep.subr.bf16.mxu1 %v5667_v13  ;;  %v5745_v13 = vld [vmem:[#allocation10 + $0x3cc] ss:$24 sps:$4 sm:$0xff]  }
 0x200   : > { %3695 = vmatpush1.bf16.msra.mxu1 %v5665_v14  ;;  %v5740_v14 = vld [vmem:[#allocation10 + $0x3c0] ss:$24 sps:$4 sm:$0xff]  }
 0x201   : > { %3696 = vmatprep.subr.bf16.mxu1 %v5673_v15  ;;  %v5743_v15 = vld [vmem:[#allocation10 + $0x3c8] ss:$24 sps:$4 sm:$0xff]  }
 0x204   : > { %3697 = vmatpush1.bf16.msra.mxu1 %v5671_v16  ;;  %v5748_v16 = vld [vmem:[#allocation10 + $0x3f4] ss:$24 sps:$4 sm:$0xff]  }
 0x205   : > { %3698 = vmatprep.subr.bf16.mxu1 %v5679_v17  ;;  %v5751_v17 = vld [vmem:[#allocation10 + $0x3fc] ss:$24 sps:$4 sm:$0xff]  }
 0x208   : > { %3699 = vmatpush1.bf16.msra.mxu1 %v5677_v18  ;;  %v5746_v18 = vld [vmem:[#allocation10 + $0x3f0] ss:$24 sps:$4 sm:$0xff]  }
 0x209   : > { %3700 = vmatprep.subr.bf16.mxu1 %v5685_v20  ;;  %v5749_v20 = vld [vmem:[#allocation10 + $0x3f8] ss:$24 sps:$4 sm:$0xff]  }
 0x20c   : > { %3701 = vmatpush1.bf16.msra.mxu1 %v5683_v21  ;;  %v5754_v21 = vld [vmem:[#allocation10 + $0x424] ss:$24 sps:$4 sm:$0xff]  }
 0x20d   : > { %3702 = vmatprep.subr.bf16.mxu1 %v5691_v22  ;;  %v5757_v22 = vld [vmem:[#allocation10 + $0x42c] ss:$24 sps:$4 sm:$0xff]  }
 0x210   : > { %3703 = vmatpush1.bf16.msra.mxu1 %v5689_v23  ;;  %v5752_v23 = vld [vmem:[#allocation10 + $0x420] ss:$24 sps:$4 sm:$0xff]  }
 0x211   : > { %3704 = vmatprep.subr.bf16.mxu1 %v5697_v26  ;;  %v5755_v26 = vld [vmem:[#allocation10 + $0x428] ss:$24 sps:$4 sm:$0xff]  }
 0x214   : > { %3705 = vmatpush1.bf16.msra.mxu1 %v5695_v27  ;;  %v5760_v27 = vld [vmem:[#allocation10 + $0x454] ss:$24 sps:$4 sm:$0xff]  }
 0x215   : > { %3706 = vmatprep.subr.bf16.mxu1 %v5703_v30  ;;  %v5763_v30 = vld [vmem:[#allocation10 + $0x45c] ss:$24 sps:$4 sm:$0xff]  }
 0x218   : > { %3707 = vmatpush1.bf16.msra.mxu1 %v5701_v31  ;;  %v5758_v31 = vld [vmem:[#allocation10 + $0x450] ss:$24 sps:$4 sm:$0xff]  }
 0x219   : > { %3708 = vmatprep.subr.bf16.mxu1 %v5709_v32  ;;  %v5761_v32 = vld [vmem:[#allocation10 + $0x458] ss:$24 sps:$4 sm:$0xff]  }
 0x21c   : > { %3709 = vmatpush1.bf16.msra.mxu1 %v5707_v11  ;;  %v5766_v11 = vld [vmem:[#allocation10 + $0x484] ss:$24 sps:$4 sm:$0xff]  }
 0x21d   : > { %3710 = vmatprep.subr.bf16.mxu1 %v5715_v33  ;;  %v5769_v33 = vld [vmem:[#allocation10 + $0x48c] ss:$24 sps:$4 sm:$0xff]  }
 0x220   : > { %3711 = vmatpush1.bf16.msra.mxu1 %v5713_v34  ;;  %v5764_v34 = vld [vmem:[#allocation10 + $0x480] ss:$24 sps:$4 sm:$0xff]  }
 0x221   : > { %3723 = vmatprep.subr.bf16.mxu1 %v5721_v24  ;;  %v5767_v24 = vld [vmem:[#allocation10 + $0x488] ss:$24 sps:$4 sm:$0xff]  }
 0x237   : > { %v2205_v45 = vpop.f32.mrb[0].mxu0 }
 0x238   : > { %v5036_v49 = vadd.f32 %v2205_v45, %v2077_v43  ;;  %v2207_v50 = vpop.f32.mrb[1].mxu0  ;;  %v5778_v43 = vld [vmem:[#allocation10 + $0x4e4] ss:$24 sps:$4 sm:$0xff]   ;;  %v5776_v45 = vld [vmem:[#allocation10 + $0x4e0] ss:$24 sps:$4 sm:$0xff]  }
 0x239   : > { %v5038_v52 = vadd.f32 %v2207_v50, %v2079_v44  ;;  %v2209_v53 = vpop.f32.mrb[2].mxu0  ;;  %v5781_v44 = vld [vmem:[#allocation10 + $0x4ec] ss:$24 sps:$4 sm:$0xff]   ;;  %v5787_v50 = vld [vmem:[#allocation10 + $0x51c] ss:$24 sps:$4 sm:$0xff]  }
 0x23a   : > { %v5040_v54 = vadd.f32 %v2209_v53, %v2081_v48  ;;  %v2211_v55 = vpop.f32.mrb[3].mxu0  ;;  %v2386_v36 = vmax.f32 %v5036_v49, 0.0  ;;  %v5779_v48 = vld [vmem:[#allocation10 + $0x4e8] ss:$24 sps:$4 sm:$0xff]   ;;  %v5784_v49 = vld [vmem:[#allocation10 + $0x514] ss:$24 sps:$4 sm:$0xff]  }
 0x23b   : > { %v5042_v56 = vadd.f32 %v2211_v55, %v2083_v51  ;;  %v2387_v57 = vmax.f32 %v5038_v52, 0.0  ;;  %v5782_v51 = vld [vmem:[#allocation10 + $0x510] ss:$24 sps:$4 sm:$0xff]   ;;  %v5790_v53 = vld [vmem:[#allocation10 + $0x544] ss:$24 sps:$4 sm:$0xff]  }
 0x23c   : > { %v2390_v28 = vmax.f32 %v5040_v54, 0.0  ;;  %v5785_v52 = vld [vmem:[#allocation10 + $0x518] ss:$24 sps:$4 sm:$0xff]   ;;  %v5793_v54 = vld [vmem:[#allocation10 + $0x54c] ss:$24 sps:$4 sm:$0xff]  }
 0x23d   : > { %v2391_v59 = vmax.f32 %v5042_v56, 0.0  ;;  %v5788_v55 = vld [vmem:[#allocation10 + $0x540] ss:$24 sps:$4 sm:$0xff]  }
 0x23e   : > { %v6625_v60 = vpack.c.bf16 %v2390_v28, %v2386_v36  ;;  %v5791_v56 = vld [vmem:[#allocation10 + $0x548] ss:$24 sps:$4 sm:$0xff]   ;;  %v5796_v36 = vld [vmem:[#allocation10 + $0x574] ss:$24 sps:$4 sm:$0xff]  }
 0x23f   : > { %v6635_v41 = vpack.c.bf16 %v2391_v59, %v2387_v57  ;;  %v5799_v28 = vld [vmem:[#allocation10 + $0x57c] ss:$24 sps:$4 sm:$0xff]   ;;  %v5794_v57 = vld [vmem:[#allocation10 + $0x570] ss:$24 sps:$4 sm:$0xff]  }
 0x240   : > { %v5797_v59 = vld [vmem:[#allocation10 + $0x578] ss:$24 sps:$4 sm:$0xff]  }
 0x241   : > { %4957 = vmatprep.mubr.msk.bf16.mxu0 %vm6631_vm4, %v6635_v41  ;;  %4969 = vmatprep.mubr.msk.bf16.mxu1 %vm6631_vm4, %v6635_v41 }
 0x242   : > { %4960 = vmatmul.mubr.msk.bf16.vlgmr.msra.gmra.mrb[4].mxu0 %vm6631_vm4, %v6625_v60  ;;  %4972 = vmatmul.mubr.msk.bf16.vlgmr.msra.gmra.mrb[8].mxu1 %vm6631_vm4, %v6625_v60 }
 0x243   : > { %3638 = vmatpush1.bf16.msra.mxu0 %v5716_v61  ;;  %3724 = vmatpush1.bf16.msra.mxu1 %v5719_v62  ;;  %v5802_v61 = vld [vmem:[#allocation10 + $0x5a4] ss:$24 sps:$4 sm:$0xff]  }
 0x244   : > { %3639 = vmatprep.subr.bf16.mxu0 %v5724_v63  ;;  %3725 = vmatprep.subr.bf16.mxu1 %v5727_v0  ;;  %v5805_v62 = vld [vmem:[#allocation10 + $0x5ac] ss:$24 sps:$4 sm:$0xff]   ;;  %v5800_v63 = vld [vmem:[#allocation10 + $0x5a0] ss:$24 sps:$4 sm:$0xff]  }
 0x245   : > { %v5803_v0 = vld [vmem:[#allocation10 + $0x5a8] ss:$24 sps:$4 sm:$0xff]  }
 0x247   : > { %3640 = vmatpush1.bf16.msra.mxu0 %v5722_v1  ;;  %3726 = vmatpush1.bf16.msra.mxu1 %v5725_v2  ;;  %v5808_v1 = vld [vmem:[#allocation10 + $0x5d4] ss:$24 sps:$4 sm:$0xff]  }
 0x248   : > { %3641 = vmatprep.subr.bf16.mxu0 %v5730_v3  ;;  %3727 = vmatprep.subr.bf16.mxu1 %v5733_v4  ;;  %v5811_v2 = vld [vmem:[#allocation10 + $0x5dc] ss:$24 sps:$4 sm:$0xff]   ;;  %v5806_v3 = vld [vmem:[#allocation10 + $0x5d0] ss:$24 sps:$4 sm:$0xff]  }
 0x249   : > { %v5809_v4 = vld [vmem:[#allocation10 + $0x5d8] ss:$24 sps:$4 sm:$0xff]  }
 0x24b   : > { %3642 = vmatpush1.bf16.msra.mxu0 %v5728_v5  ;;  %3728 = vmatpush1.bf16.msra.mxu1 %v5731_v6  ;;  %v5814_v5 = vld [vmem:[#allocation10 + $0x14] ss:$24 sps:$4 sm:$0xff]   ;;  %v6650_v6 = vsub.s32 2, %v6594_v19 }
 0x24c   : > { %3643 = vmatprep.subr.bf16.mxu0 %v5736_v7  ;;  %3729 = vmatprep.subr.bf16.mxu1 %v5739_v8  ;;  %v6653_v7 = vsub.s32 3, %v6594_v19 }
 0x24d   : > { %v713_v8 = vrot.slane %v6604_v37, %v6650_v6 }
 0x24f   : > { %3644 = vmatpush1.bf16.msra.mxu0 %v5734_v9  ;;  %3730 = vmatpush1.bf16.msra.mxu1 %v5737_v29  ;;  %v717_v9 = vrot.slane %v6604_v37, %v6653_v7  ;;  %v5817_v37 = vld [vmem:[#allocation10 + $0x44] ss:$24 sps:$4 sm:$0xff]  }
 0x250   : > { %3645 = vmatprep.subr.bf16.mxu0 %v5742_v10  ;;  %3731 = vmatprep.subr.bf16.mxu1 %v5745_v13 }
 0x253   : > { %3646 = vmatpush1.bf16.msra.mxu0 %v5740_v14  ;;  %3732 = vmatpush1.bf16.msra.mxu1 %v5743_v15 }
 0x254   : > { %3647 = vmatprep.subr.bf16.mxu0 %v5748_v16  ;;  %3733 = vmatprep.subr.bf16.mxu1 %v5751_v17 }
 0x257   : > { %3648 = vmatpush1.bf16.msra.mxu0 %v5746_v18  ;;  %3734 = vmatpush1.bf16.msra.mxu1 %v5749_v20 }
 0x258   : > { %3649 = vmatprep.subr.bf16.mxu0 %v5754_v21  ;;  %3735 = vmatprep.subr.bf16.mxu1 %v5757_v22 }
 0x25b   : > { %3650 = vmatpush1.bf16.msra.mxu0 %v5752_v23  ;;  %3736 = vmatpush1.bf16.msra.mxu1 %v5755_v26 }
 0x25c   : > { %3651 = vmatprep.subr.bf16.mxu0 %v5760_v27  ;;  %3737 = vmatprep.subr.bf16.mxu1 %v5763_v30  ;;  %v5812_v30 = vld [vmem:[#allocation10 + $0x10] ss:$24 sps:$4 sm:$0xff]  }
 0x25f   : > { %3652 = vmatpush1.bf16.msra.mxu0 %v5758_v31  ;;  %3738 = vmatpush1.bf16.msra.mxu1 %v5761_v32  ;;  %v5815_v31 = vld [vmem:[#allocation10 + $0x40] ss:$24 sps:$4 sm:$0xff]   ;;  %v5820_v32 = vld [vmem:[#allocation10 + $0x74] ss:$24 sps:$4 sm:$0xff]  }
 0x260   : > { %3653 = vmatprep.subr.bf16.mxu0 %v5766_v11  ;;  %3739 = vmatprep.subr.bf16.mxu1 %v5769_v33  ;;  %v5818_v11 = vld [vmem:[#allocation10 + $0x70] ss:$24 sps:$4 sm:$0xff]   ;;  %v5823_v33 = vld [vmem:[#allocation10 + $0xa4] ss:$24 sps:$4 sm:$0xff]  }
 0x263   : > { %3654 = vmatpush1.bf16.msra.mxu0 %v5764_v34  ;;  %3740 = vmatpush1.bf16.msra.mxu1 %v5767_v24  ;;  %v5821_v34 = vld [vmem:[#allocation10 + $0xa0] ss:$24 sps:$4 sm:$0xff]   ;;  %v5826_v24 = vld [vmem:[#allocation10 + $0xd4] ss:$24 sps:$4 sm:$0xff]  }
 0x264   : > { %3655 = vmatprep.subr.bf16.mxu0 %v5772_v39  ;;  %3741 = vmatprep.subr.bf16.mxu1 %v5775_v58  ;;  %v5824_v39 = vld [vmem:[#allocation10 + $0xd0] ss:$24 sps:$4 sm:$0xff]   ;;  %v5829_v58 = vld [vmem:[#allocation10 + $0x104] ss:$24 sps:$4 sm:$0xff]  }
 0x267   : > { %3656 = vmatpush1.bf16.msra.mxu0 %v5770_v40  ;;  %3742 = vmatpush1.bf16.msra.mxu1 %v5773_v42  ;;  %v5827_v40 = vld [vmem:[#allocation10 + $0x100] ss:$24 sps:$4 sm:$0xff]   ;;  %v5832_v42 = vld [vmem:[#allocation10 + $0x134] ss:$24 sps:$4 sm:$0xff]  }
 0x268   : > { %3657 = vmatprep.subr.bf16.mxu0 %v5778_v43  ;;  %3743 = vmatprep.subr.bf16.mxu1 %v5781_v44  ;;  %v5830_v43 = vld [vmem:[#allocation10 + $0x130] ss:$24 sps:$4 sm:$0xff]   ;;  %v5835_v44 = vld [vmem:[#allocation10 + $0x164] ss:$24 sps:$4 sm:$0xff]  }
 0x26b   : > { %3658 = vmatpush1.bf16.msra.mxu0 %v5776_v45  ;;  %3744 = vmatpush1.bf16.msra.mxu1 %v5779_v48  ;;  %v5833_v45 = vld [vmem:[#allocation10 + $0x160] ss:$24 sps:$4 sm:$0xff]   ;;  %v5838_v48 = vld [vmem:[#allocation10 + $0x194] ss:$24 sps:$4 sm:$0xff]  }
 0x26c   : > { %3659 = vmatprep.subr.bf16.mxu0 %v5784_v49  ;;  %3745 = vmatprep.subr.bf16.mxu1 %v5787_v50  ;;  %v5836_v49 = vld [vmem:[#allocation10 + $0x190] ss:$24 sps:$4 sm:$0xff]   ;;  %v5841_v50 = vld [vmem:[#allocation10 + $0x1c4] ss:$24 sps:$4 sm:$0xff]  }
 0x26f   : > { %3660 = vmatpush1.bf16.msra.mxu0 %v5782_v51  ;;  %3746 = vmatpush1.bf16.msra.mxu1 %v5785_v52  ;;  %v5839_v51 = vld [vmem:[#allocation10 + $0x1c0] ss:$24 sps:$4 sm:$0xff]   ;;  %v5844_v52 = vld [vmem:[#allocation10 + $0x1f4] ss:$24 sps:$4 sm:$0xff]  }
 0x270   : > { %3661 = vmatprep.subr.bf16.mxu0 %v5790_v53  ;;  %3747 = vmatprep.subr.bf16.mxu1 %v5793_v54  ;;  %v5842_v53 = vld [vmem:[#allocation10 + $0x1f0] ss:$24 sps:$4 sm:$0xff]   ;;  %v5847_v54 = vld [vmem:[#allocation10 + $0x224] ss:$24 sps:$4 sm:$0xff]  }
 0x273   : > { %3662 = vmatpush1.bf16.msra.mxu0 %v5788_v55  ;;  %3748 = vmatpush1.bf16.msra.mxu1 %v5791_v56  ;;  %v5845_v55 = vld [vmem:[#allocation10 + $0x220] ss:$24 sps:$4 sm:$0xff]   ;;  %v5850_v56 = vld [vmem:[#allocation10 + $0x254] ss:$24 sps:$4 sm:$0xff]  }
 0x274   : > { %3663 = vmatprep.subr.bf16.mxu0 %v5796_v36  ;;  %3749 = vmatprep.subr.bf16.mxu1 %v5799_v28  ;;  %v5848_v36 = vld [vmem:[#allocation10 + $0x250] ss:$24 sps:$4 sm:$0xff]   ;;  %v5853_v28 = vld [vmem:[#allocation10 + $0x284] ss:$24 sps:$4 sm:$0xff]  }
 0x277   : > { %3664 = vmatpush1.bf16.msra.mxu0 %v5794_v57  ;;  %3750 = vmatpush1.bf16.msra.mxu1 %v5797_v59  ;;  %v5851_v57 = vld [vmem:[#allocation10 + $0x280] ss:$24 sps:$4 sm:$0xff]   ;;  %v5856_v59 = vld [vmem:[#allocation10 + $0x2b4] ss:$24 sps:$4 sm:$0xff]  }
 0x278   : > { %3665 = vmatprep.subr.bf16.mxu0 %v5802_v61  ;;  %3751 = vmatprep.subr.bf16.mxu1 %v5805_v62  ;;  %v5854_v61 = vld [vmem:[#allocation10 + $0x2b0] ss:$24 sps:$4 sm:$0xff]   ;;  %v5859_v62 = vld [vmem:[#allocation10 + $0x2e4] ss:$24 sps:$4 sm:$0xff]  }
 0x27b   : > { %3666 = vmatpush1.bf16.msra.mxu0 %v5800_v63  ;;  %3752 = vmatpush1.bf16.msra.mxu1 %v5803_v0  ;;  %v5857_v63 = vld [vmem:[#allocation10 + $0x2e0] ss:$24 sps:$4 sm:$0xff]   ;;  %v5862_v0 = vld [vmem:[#allocation10 + $0x314] ss:$24 sps:$4 sm:$0xff]  }
 0x27c   : > { %3667 = vmatprep.subr.bf16.mxu0 %v5808_v1  ;;  %3753 = vmatprep.subr.bf16.mxu1 %v5811_v2  ;;  %v5860_v1 = vld [vmem:[#allocation10 + $0x310] ss:$24 sps:$4 sm:$0xff]   ;;  %v5865_v2 = vld [vmem:[#allocation10 + $0x344] ss:$24 sps:$4 sm:$0xff]  }
 0x27f   : > { %3668 = vmatpush1.bf16.msra.mxu0 %v5806_v3  ;;  %3754 = vmatpush1.bf16.msra.mxu1 %v5809_v4  ;;  %v5863_v3 = vld [vmem:[#allocation10 + $0x340] ss:$24 sps:$4 sm:$0xff]   ;;  %v5868_v4 = vld [vmem:[#allocation10 + $0x374] ss:$24 sps:$4 sm:$0xff]  }
 0x280   : > { %3766 = vmatprep.subr.bf16.mxu0 %v5814_v5  ;;  %v5866_v5 = vld [vmem:[#allocation10 + $0x370] ss:$24 sps:$4 sm:$0xff]  }
 0x2b6   : > { %v2377_v29 = vpop.f32.mrb[4].mxu1 }
 0x2b7   : > { %v5043_v10 = vadd.f32 %v2377_v29, %v713_v8  ;;  %v2379_v13 = vpop.f32.mrb[5].mxu1  ;;  %v5874_v29 = vld [vmem:[#allocation10 + $0x3d4] ss:$24 sps:$4 sm:$0xff]  }
 0x2b8   : > { %v5044_v14 = vadd.f32 %v2379_v13, %v717_v9  ;;  %v2381_v15 = vpop.f32.mrb[6].mxu1  ;;  %v5877_v13 = vld [vmem:[#allocation10 + $0x404] ss:$24 sps:$4 sm:$0xff]  }
 0x2b9   : > { %v5045_v16 = vadd.f32 %v2381_v15, %v713_v8  ;;  %v2383_v17 = vpop.f32.mrb[7].mxu1  ;;  %v2388_v20 = vmax.f32 %v5043_v10, 0.0  ;;  %v5871_v8 = vld [vmem:[#allocation10 + $0x3a4] ss:$24 sps:$4 sm:$0xff]   ;;  %v5872_v10 = vld [vmem:[#allocation10 + $0x3d0] ss:$24 sps:$4 sm:$0xff]  }
 0x2ba   : > { %v5046_v18 = vadd.f32 %v2383_v17, %v717_v9  ;;  %v2389_v22 = vmax.f32 %v5044_v14, 0.0  ;;  %v5869_v9 = vld [vmem:[#allocation10 + $0x3a0] ss:$24 sps:$4 sm:$0xff]   ;;  %v5880_v15 = vld [vmem:[#allocation10 + $0x434] ss:$24 sps:$4 sm:$0xff]  }
 0x2bb   : > { %v2392_v21 = vmax.f32 %v5045_v16, 0.0  ;;  %v5875_v14 = vld [vmem:[#allocation10 + $0x400] ss:$24 sps:$4 sm:$0xff]   ;;  %v5878_v16 = vld [vmem:[#allocation10 + $0x430] ss:$24 sps:$4 sm:$0xff]  }
 0x2bc   : > { %v2393_v23 = vmax.f32 %v5046_v18, 0.0  ;;  %v5883_v17 = vld [vmem:[#allocation10 + $0x464] ss:$24 sps:$4 sm:$0xff]   ;;  %v5881_v18 = vld [vmem:[#allocation10 + $0x460] ss:$24 sps:$4 sm:$0xff]  }
 0x2bd   : > { %v6659_v26 = vpack.c.bf16 %v2392_v21, %v2388_v20  ;;  %v5886_v20 = vld [vmem:[#allocation10 + $0x494] ss:$24 sps:$4 sm:$0xff]   ;;  %v5884_v21 = vld [vmem:[#allocation10 + $0x490] ss:$24 sps:$4 sm:$0xff]  }
 0x2be   : > { %v6661_v27 = vpack.c.bf16 %v2393_v23, %v2389_v22  ;;  %v5889_v22 = vld [vmem:[#allocation10 + $0x4c4] ss:$24 sps:$4 sm:$0xff]   ;;  %v5887_v23 = vld [vmem:[#allocation10 + $0x4c0] ss:$24 sps:$4 sm:$0xff]  }
 0x2c0   : > { %4963 = vmatprep.mubr.msk.bf16.mxu0 %vm6631_vm4, %v6661_v27  ;;  %4975 = vmatprep.mubr.msk.bf16.mxu1 %vm6631_vm4, %v6661_v27 }
 0x2c1   : > { %5031 = vmatprep.subr.msk.bf16.mxu1 %vm6631_vm4, %v6661_v27  ;;  %4966 = vmatmul.mubr.msk.bf16.vlgmr.msra.gmra.mrb[4].mxu0 %vm6631_vm4, %v6659_v26 }
 0x2c2   : > { %4978 = vmatmul.mubr.msk.bf16.vlgmr.msra.gmra.mrb[8].mxu1 %vm6631_vm4, %v6659_v26  ;;  %3767 = vmatpush1.bf16.msra.mxu0 %v5812_v30  ;;  %v5890_v30 = vld [vmem:[#allocation10 + $0x4f0] ss:$24 sps:$4 sm:$0xff]  }
 0x2c3   : > { %5034 = vmatpush1.bf16.msk.msra.mxu1 %vm6631_vm4, %v6659_v26  ;;  %4981 = vmatprep.mubr.msk.bf16.mxu0 %vm6631_vm4, %v6635_v41 }
 0x2c4   : > { %3768 = vmatprep.subr.bf16.mxu0 %v5817_v37  ;;  %v5895_v37 = vld [vmem:[#allocation10 + $0x524] ss:$24 sps:$4 sm:$0xff]  }
 0x2c6   : > { %3769 = vmatpush1.bf16.msra.mxu0 %v5815_v31  ;;  %v5893_v31 = vld [vmem:[#allocation10 + $0x520] ss:$24 sps:$4 sm:$0xff]  }
 0x2c7   : > { %3770 = vmatprep.subr.bf16.mxu0 %v5820_v32  ;;  %v5898_v32 = vld [vmem:[#allocation10 + $0x554] ss:$24 sps:$4 sm:$0xff]  }
 0x2ca   : > { %3771 = vmatpush1.bf16.msra.mxu0 %v5818_v11  ;;  %v5896_v11 = vld [vmem:[#allocation10 + $0x550] ss:$24 sps:$4 sm:$0xff]  }
 0x2cb   : > { %3772 = vmatprep.subr.bf16.mxu0 %v5823_v33  ;;  %v5901_v33 = vld [vmem:[#allocation10 + $0x584] ss:$24 sps:$4 sm:$0xff]  }
 0x2ce   : > { %3773 = vmatpush1.bf16.msra.mxu0 %v5821_v34  ;;  %v5899_v34 = vld [vmem:[#allocation10 + $0x580] ss:$24 sps:$4 sm:$0xff]  }
 0x2cf   : > { %3774 = vmatprep.subr.bf16.mxu0 %v5826_v24  ;;  %v5904_v24 = vld [vmem:[#allocation10 + $0x5b4] ss:$24 sps:$4 sm:$0xff]  }
 0x2d2   : > { %3775 = vmatpush1.bf16.msra.mxu0 %v5824_v39  ;;  %v5902_v39 = vld [vmem:[#allocation10 + $0x5b0] ss:$24 sps:$4 sm:$0xff]  }
 0x2d3   : > { %3776 = vmatprep.subr.bf16.mxu0 %v5829_v58  ;;  %v5907_v58 = vld [vmem:[#allocation10 + $0x5e4] ss:$24 sps:$4 sm:$0xff]  }
 0x2d6   : > { %3777 = vmatpush1.bf16.msra.mxu0 %v5827_v40  ;;  %v5905_v40 = vld [vmem:[#allocation10 + $0x5e0] ss:$24 sps:$4 sm:$0xff]  }
 0x2d7   : > { %3778 = vmatprep.subr.bf16.mxu0 %v5832_v42  ;;  %v2602_v42 = vld [vmem:[%s6880_s4] sm:$0x3f] }
 0x2da   : > { %3779 = vmatpush1.bf16.msra.mxu0 %v5830_v43  ;;  %v2619_v43 = vrot.slane %v2602_v42, %v6653_v7 }
 0x2db   : > { %3780 = vmatprep.subr.bf16.mxu0 %v5835_v44 }
 0x2de   : > { %3781 = vmatpush1.bf16.msra.mxu0 %v5833_v45 }
 0x2df   : > { %3782 = vmatprep.subr.bf16.mxu0 %v5838_v48 }
 0x2e2   : > { %3783 = vmatpush1.bf16.msra.mxu0 %v5836_v49 }
 0x2e3   : > { %3784 = vmatprep.subr.bf16.mxu0 %v5841_v50 }
 0x2e6   : > { %3785 = vmatpush1.bf16.msra.mxu0 %v5839_v51 }
 0x2e7   : > { %3786 = vmatprep.subr.bf16.mxu0 %v5844_v52 }
 0x2ea   : > { %3787 = vmatpush1.bf16.msra.mxu0 %v5842_v53 }
 0x2eb   : > { %3788 = vmatprep.subr.bf16.mxu0 %v5847_v54 }
 0x2ee   : > { %3789 = vmatpush1.bf16.msra.mxu0 %v5845_v55 }
 0x2ef   : > { %3790 = vmatprep.subr.bf16.mxu0 %v5850_v56 }
 0x2f2   : > { %3791 = vmatpush1.bf16.msra.mxu0 %v5848_v36 }
 0x2f3   : > { %3792 = vmatprep.subr.bf16.mxu0 %v5853_v28 }
 0x2f6   : > { %3793 = vmatpush1.bf16.msra.mxu0 %v5851_v57 }
 0x2f7   : > { %3794 = vmatprep.subr.bf16.mxu0 %v5856_v59 }
 0x2fa   : > { %3795 = vmatpush1.bf16.msra.mxu0 %v5854_v61 }
 0x2fb   : > { %3796 = vmatprep.subr.bf16.mxu0 %v5859_v62 }
 0x2fe   : > { %3797 = vmatpush1.bf16.msra.mxu0 %v5857_v63 }
 0x2ff   : > { %3809 = vmatprep.subr.bf16.mxu0 %v5862_v0 }
 0x301   : > { %4984 = vmatmul.mubr.msk.bf16.vlgmr.msra.gmra.mrb[8].mxu0 %vm6631_vm4, %v6625_v60 }
 0x302   : > { %3810 = vmatpush1.bf16.msra.mxu0 %v5860_v1  ;;  %4987 = vmatprep.mubr.msk.bf16.mxu0 %vm6631_vm4, %v6661_v27  ;;  %v5892_v27 = vld [vmem:[#allocation10 + $0x4f4] ss:$24 sps:$4 sm:$0xff]  }
 0x303   : > { %3811 = vmatprep.subr.bf16.mxu0 %v5865_v2 }
 0x306   : > { %3812 = vmatpush1.bf16.msra.mxu0 %v5863_v3  ;;  %v2622_v3 = vsub.s32 4, %v6594_v19 }
 0x307   : > { %3813 = vmatprep.subr.bf16.mxu0 %v5868_v4  ;;  %v2626_v4 = vsub.s32 5, %v6594_v19 }
 0x30a   : > { %3814 = vmatpush1.bf16.msra.mxu0 %v5866_v5  ;;  %v2623_v5 = vrot.slane %v2602_v42, %v2622_v3 }
 0x30b   : > { %3815 = vmatprep.subr.bf16.mxu0 %v5871_v8  ;;  %v2627_v8 = vrot.slane %v2602_v42, %v2626_v4 }
 0x30e   : > { %3816 = vmatpush1.bf16.msra.mxu0 %v5869_v9 }
 0x30f   : > { %3817 = vmatprep.subr.bf16.mxu0 %v5874_v29 }
 0x312   : > { %3818 = vmatpush1.bf16.msra.mxu0 %v5872_v10 }
 0x313   : > { %3819 = vmatprep.subr.bf16.mxu0 %v5877_v13 }
 0x316   : > { %3820 = vmatpush1.bf16.msra.mxu0 %v5875_v14 }
 0x317   : > { %3821 = vmatprep.subr.bf16.mxu0 %v5880_v15 }
 0x31a   : > { %3822 = vmatpush1.bf16.msra.mxu0 %v5878_v16 }
 0x31b   : > { %3823 = vmatprep.subr.bf16.mxu0 %v5883_v17 }
 0x31e   : > { %3824 = vmatpush1.bf16.msra.mxu0 %v5881_v18 }
 0x31f   : > { %3825 = vmatprep.subr.bf16.mxu0 %v5886_v20 }
 0x322   : > { %3826 = vmatpush1.bf16.msra.mxu0 %v5884_v21 }
 0x323   : > { %3827 = vmatprep.subr.bf16.mxu0 %v5889_v22  ;;  %v2615_v22 = vrot.slane %v2602_v42, %v6650_v6 }
 0x326   : > { %3828 = vmatpush1.bf16.msra.mxu0 %v5887_v23 }
 0x327   : > { %3829 = vmatprep.subr.bf16.mxu0 %v5892_v27  ;;  %v2611_v27 = vrot.slane %v2602_v42, %v6607_v38 }
 0x32a   : > { %3830 = vmatpush1.bf16.msra.mxu0 %v5890_v30 }
 0x32b   : > { %3831 = vmatprep.subr.bf16.mxu0 %v5895_v37 }
 0x32e   : > { %3832 = vmatpush1.bf16.msra.mxu0 %v5893_v31 }
 0x32f   : > { %3833 = vmatprep.subr.bf16.mxu0 %v5898_v32 }
 0x332   : > { %3834 = vmatpush1.bf16.msra.mxu0 %v5896_v11 }
 0x333   : > { %3835 = vmatprep.subr.bf16.mxu0 %v5901_v33 }
 0x336   : > { %3836 = vmatpush1.bf16.msra.mxu0 %v5899_v34 }
 0x337   : > { %3837 = vmatprep.subr.bf16.mxu0 %v5904_v24 }
 0x33a   : > { %3838 = vmatpush1.bf16.msra.mxu0 %v5902_v39 }
 0x33b   : > { %3839 = vmatprep.subr.bf16.mxu0 %v5907_v58 }
 0x33e   : > { %3840 = vmatpush1.bf16.msra.mxu0 %v5905_v40 }
 0x33f   : > { %5025 = vmatprep.subr.msk.bf16.mxu0 %vm6631_vm4, %v6635_v41 }
 0x341   : > { %4990 = vmatmul.mubr.msk.bf16.vlgmr.msra.gmra.mrb[8].mxu0 %vm6631_vm4, %v6659_v26 }
 0x342   : > { %5028 = vmatpush1.bf16.msk.msra.mxu0 %vm6631_vm4, %v6625_v60  ;;  %v2607_v60 = vrot.slane %v2602_v42, %v6598_v35 }
 0x394   : > { %v3671_v44 = vpop.f32.mrb[4].mxu0 }
 0x395   : > { %v3757_v45 = vpop.f32.mrb[8].mxu1  ;;  %v3673_v48 = vpop.f32.mrb[5].mxu0  ;;  %v5047_v55 = vadd.f32 %v3671_v44, %v2607_v60  ;;  %v3900_v44 = vld [vmem:[%s6881_s5] sm:$0x7] }
 0x396   : > { %v3759_v49 = vpop.f32.mrb[9].mxu1  ;;  %v3675_v50 = vpop.f32.mrb[6].mxu0  ;;  %v5051_v30 = vadd.f32 %v3757_v45, %v2615_v22  ;;  %v5048_v37 = vadd.f32 %v3673_v48, %v2611_v27 }
 0x397   : > { %v5052_v41 = vadd.f32 %v3759_v49, %v2619_v43  ;;  %v3761_v51 = vpop.f32.mrb[10].mxu1  ;;  %v3677_v52 = vpop.f32.mrb[7].mxu0  ;;  %v5049_v28 = vadd.f32 %v3675_v50, %v2607_v60  ;;  %v3905_v50 = vrot.slane %v3900_v44, %v6598_v35 }
 0x398   : > { %v3763_v53 = vpop.f32.mrb[11].mxu1  ;;  %v5053_v31 = vadd.f32 %v3761_v51, %v2615_v22  ;;  %v5050_v32 = vadd.f32 %v3677_v52, %v2611_v27  ;;  %v3913_v52 = vrot.slane %v3900_v44, %v6650_v6 }
 0x399   : > { %v4991_v26 = vmul.f32 -1.442695, %v5052_v41  ;;  %v5054_v54 = vadd.f32 %v3763_v53, %v2619_v43  ;;  %v3909_v41 = vrot.slane %v3900_v44, %v6607_v38 }
 0x39b   : > { %5908 = vpow2.f32 %v4991_v26  ;;  %v4994_v12 = vmul.f32 -1.442695, %v5054_v54 }
 0x39d   : > { %5910 = vpow2.f32 %v4994_v12 }
 0x39e   : > { %5912 = vtanh.f32 %v5047_v55 }
 0x3a5   : > { %v5909_v56 = vpop.eup %5908 }
 0x3a6   : > { %v3876_v36 = vadd.f32 1.0, %v5909_v56 }
 0x3a7   : > { %v5911_v57 = vpop.eup %5910 }
 0x3a8   : > { %5914 = vrcp.f32 %v3876_v36  ;;  %v3879_v59 = vadd.f32 1.0, %v5911_v57  ;;  %v5913_v61 = vpop.eup %5912 }
 0x3a9   : > { %5916 = vtanh.f32 %v5049_v28 }
 0x3aa   : > { %5918 = vrcp.f32 %v3879_v59 }
 0x3b2   : > { %v5915_v62 = vpop.eup %5914 }
 0x3b3   : > { %v3894_v63 = vmul.f32 %v5915_v62, %v5913_v61  ;;  %v5917_v0 = vpop.eup %5916 }
 0x3b4   : > { %v5919_v1 = vpop.eup %5918 }
 0x3b5   : > { %v6704_v2 = vmul.f32 %v5919_v1, %v5917_v0  ;;  %v3917_v55 = vmul.f32 %v3905_v50, %v3894_v63 }
 0x3b7   : > { %v3920_v61 = vmul.f32 %v3905_v50, %v6704_v2 }
 0x414   : > { %v3843_v9 = vpop.f32.mrb[8].mxu0 }
 0x415   : > { %v5055_v29 = vadd.f32 %v3843_v9, %v2623_v5  ;;  %v3845_v10 = vpop.f32.mrb[9].mxu0  ;;  %v6235_v9 = vmov 0.0  }
 0x416   : > { %v5056_v13 = vadd.f32 %v3845_v10, %v2627_v8  ;;  %v3847_v14 = vpop.f32.mrb[10].mxu0  ;;  %4093 = vmatprep.mubr.f32.mxu0 %v6235_v9  ;;  %4164 = vmatprep.mubr.f32.mxu1 %v6235_v9 }
 0x417   : > { %v4992_v15 = vmul.f32 -1.442695, %v5055_v29  ;;  %v5057_v16 = vadd.f32 %v3847_v14, %v2623_v5  ;;  %v3849_v17 = vpop.f32.mrb[11].mxu0  ;;  %v6234_v5 = vmov 0  }
 0x418   : > { %v4993_v18 = vmul.f32 -1.442695, %v5056_v13  ;;  %v5058_v20 = vadd.f32 %v3849_v17, %v2627_v8  ;;  %5235 = vset.pattern.permute.xlu0 %v6234_v5 }
 0x419   : > { %5920 = vpow2.f32 %v4992_v15  ;;  %v4995_v21 = vmul.f32 -1.442695, %v5057_v16 }
 0x41a   : > { %5922 = vpow2.f32 %v4993_v18  ;;  %v4996_v23 = vmul.f32 -1.442695, %v5058_v20  ;;  %v3931_v20 = vld [vmem:[#allocation2] sm:$0x1] }
 0x41b   : > { %5924 = vpow2.f32 %v4995_v21 }
 0x41c   : > { %5926 = vpow2.f32 %v4996_v23 }
 0x41d   : > { %5928 = vtanh.f32 %v5051_v30 }
 0x41e   : > { %5930 = vtanh.f32 %v5048_v37 }
 0x41f   : > { %5932 = vtanh.f32 %v5053_v31 }
 0x420   : > { %5934 = vtanh.f32 %v5050_v32 }
 0x423   : > { %v5921_v11 = vpop.eup %5920 }
 0x424   : > { %v5923_v33 = vpop.eup %5922  ;;  %v3877_v34 = vadd.f32 1.0, %v5921_v11 }
 0x425   : > { %v5925_v24 = vpop.eup %5924  ;;  %v3878_v39 = vadd.f32 1.0, %v5923_v33 }
 0x426   : > { %v5927_v58 = vpop.eup %5926  ;;  %5936 = vrcp.f32 %v3877_v34  ;;  %v3880_v40 = vadd.f32 1.0, %v5925_v24 }
 0x427   : > { %5938 = vrcp.f32 %v3878_v39  ;;  %v3881_v42 = vadd.f32 1.0, %v5927_v58  ;;  %v5929_v43 = vpop.eup %5928 }
 0x428   : > { %5940 = vrcp.f32 %v3880_v40  ;;  %v5931_v45 = vpop.eup %5930 }
 0x429   : > { %5942 = vrcp.f32 %v3881_v42  ;;  %v5933_v48 = vpop.eup %5932 }
 0x42a   : > { %v5935_v49 = vpop.eup %5934 }
 0x430   : > { %v5937_v51 = vpop.eup %5936 }
 0x431   : > { %v5939_v53 = vpop.eup %5938  ;;  %v3895_v26 = vmul.f32 %v5937_v51, %v5931_v45 }
 0x432   : > { %v5941_v54 = vpop.eup %5940  ;;  %v3896_v12 = vmul.f32 %v5939_v53, %v5929_v43 }
 0x433   : > { %v5943_v60 = vpop.eup %5942  ;;  %v3918_v56 = vmul.f32 %v3909_v41, %v3895_v26  ;;  %v3898_v36 = vmul.f32 %v5941_v54, %v5935_v49 }
 0x434   : > { %v3919_v28 = vmul.f32 %v3913_v52, %v3896_v12  ;;  %v3899_v57 = vmul.f32 %v5943_v60, %v5933_v48  ;;  %v6236_v12 = vmov 1966171168  }
 0x435   : > { %v3923_v59 = vadd.f32 %v3918_v56, %v3917_v55  ;;  %v3921_v62 = vmul.f32 %v3909_v41, %v3898_v36  ;;  %v4178_v60 = vunpack.c.l.s4 %v6236_v12 }
 0x436   : > { %v3922_v0 = vmul.f32 %v3913_v52, %v3899_v57  ;;  %v3963_v52 = vld [vmem:[#allocation3] sm:$0x1] }
 0x437   : > { %v3924_v1 = vadd.f32 %v3923_v59, %v3919_v28  ;;  %v3927_v3 = vadd.f32 %v3921_v62, %v3920_v61  ;;  %v4179_v55 = vunpack.c.0.s8 %v4178_v60 }
 0x439   : > { %3925 = vadd.xlane.f32.xlu0 %v3924_v1  ;;  %v3928_v4 = vadd.f32 %v3927_v3, %v3922_v0  ;;  %v4182_v57 = vsub.s32 %v4179_v55, %v6594_v19 }
 0x43d   : > { %3929 = vadd.xlane.f32.xlu0 %v3928_v4 }
 0x4c6   : > { %v3926_v8 = vpop.xlane.xlu0 %3925 }
 0x4c7   : > { %v3932_v29 = vsel %vm434_vm2, %v3926_v8, -inf }
 0x4ca   : > { %v3930_v63 = vpop.xlane.xlu0 %3929 }
 0x4cb   : > { %v3933_v2 = vsel %vm435_vm3, %v3930_v63, -inf }
 0x4cc   : > { %v3934_v10 = vmax.f32 %v3932_v29, %v3933_v2  ;;  %v6237_v2 = vmov (!%p5007_p4), 0  }
 0x4cd   : > { %5950 = vset.pattern.permute.xlu0 (!%p5007_p4), %v6237_v2 }
 0x4ce   : > { %v3935_v13 = vrot.slane %v3934_v10, 4 }
 0x4d0   : > { %v3936_v14 = vmax.f32 %v3934_v10, %v3935_v13 }
 0x4d2   : > { %v3937_v15 = vrot.slane %v3936_v14, 2 }
 0x4d4   : > { %v3938_v16 = vmax.f32 %v3936_v14, %v3937_v15 }
 0x4d6   : > { %v3939_v17 = vrot.slane %v3938_v16, 1 }
 0x4d8   : > { %v3940_v18 = vmax.f32 %v3938_v16, %v3939_v17 }
 0x4da   : > { %5091 = vpush %v3940_v18 }
 0x50b   : > { %s5092_s13 = spop %5091 }
 0x50c   : > { %v3942_v21 = vstv %s5092_s13 }
 0x50d   : > { %v3943_v22 = vmax.f32 %v3931_v20, %v3942_v21 }
 0x50f   : > { %v3953_v23 = vrot.slane %v3943_v22, %v6598_v35  ;;  %4206 = vst.msk [vmem:[#allocation2] sm:$0x1] %vm3980_vm5, %v3943_v22  ;;  %v3945_v40 = vsub.f32 %v3931_v20, %v3943_v22  ;;  %vm3944_vm7 = vcmp.gt.f32.partialorder %v3943_v22, -inf }
 0x511   : > { %v3955_v27 = vsub.f32 %v3926_v8, %v3953_v23  ;;  %v3956_v30 = vsub.f32 %v3930_v63, %v3953_v23  ;;  %v3946_v42 = vmul.f32 1.442695, %v3945_v40 }
 0x513   : > { %v3959_v37 = vmul.f32 1.442695, %v3956_v30  ;;  %v3957_v31 = vmul.f32 1.442695, %v3955_v27 }
 0x515   : > { %5944 = vpow2.f32 %v3959_v37 }
 0x516   : > { %5946 = vpow2.f32 %v3957_v31  ;;  %v5008_v19 = vld [vmem:[#allocation2] ss:$0 sm:$0xff] (!%p5007_p4) }
 0x517   : > { %5948 = vpow2.f32 %v3946_v42 }
 0x51f   : > { %v5945_v32 = vpop.eup %5944 }
 0x520   : > { %v5947_v11 = vpop.eup %5946  ;;  %v3962_v33 = vsel %vm435_vm3, %v5945_v32, 0.0 }
 0x521   : > { %v3961_v34 = vsel %vm434_vm2, %v5947_v11, 0.0  ;;  %v3967_v24 = vsel %vm3965_vm6, %v3962_v33, 0.0  ;;  %v5949_v43 = vpop.eup %5948 }
 0x522   : > { %3993 = vxpose.xlu1.b32.start [1/2] (short) (narrow) %v3961_v34, 8  ;;  %v3966_v39 = vsel %vm3965_vm6, %v3961_v34, 0.0  ;;  %v3948_v44 = vsel %vm3944_vm7, %v5949_v43, 0.0 }
 0x523   : > { %v3968_v58 = vadd.f32 %v3967_v24, %v3966_v39  ;;  %v3964_v53 = vmul.f32 %v3963_v52, %v3948_v44 }
 0x525   : > { %3969 = vadd.xlane.f32.xlu0 %v3968_v58 }
 0x526   : > { %3994 = vxpose.xlu1.b32.end [2/2] (short) (narrow) %v3962_v33, 8 }
 0x53b   : > { %4244 = vperm.xlu0 (!%p5007_p4), %5950, %v5008_v19  }
 0x544   : > { %5234 = vset.pattern.permute.xlu1 %v6234_v5  ;;  %v3982_v5 = vld [vmem:[#allocation4] sm:$0xf] }
 0x545   : > { %3985 = vperm.xlu1 %5234, %v3948_v44  }
 0x5a2   : > { %v4009_v47 = vpop.trf.xlu1 }
 0x5a3   : > { %5001 = vmatmul.mubr.msk.f32.vlgmr.msra.gmra.mrb[12].mxu0 %vm4025_vm8, %v4009_v47  ;;  %5006 = vmatmul.mubr.msk.f32.vlgmr.msra.gmra.mrb[12].mxu1 %vm4025_vm8, %v4009_v47 }
 0x5b2   : > { %v3970_v46 = vpop.xlane.xlu0 %3969 }
 0x5b3   : > { %v3971_v45 = vrot.slane %v3970_v46, 4 }
 0x5b5   : > { %v3972_v48 = vadd.f32 %v3971_v45, %v3970_v46 }
 0x5b7   : > { %v3973_v49 = vrot.slane %v3972_v48, 2 }
 0x5b9   : > { %v3974_v50 = vadd.f32 %v3973_v49, %v3972_v48 }
 0x5ba   : > { %v4245_v17 = vpop.permute.xlu0 (!%p5007_p4), %4244 }
 0x5bb   : > { %v3975_v41 = vrot.slane %v3974_v50, 1  ;;  %4247 = vst [vmem:[%s6528_s7] sm:$0xff] (!%p5007_p4), %v4245_v17 }
 0x5bd   : > { %v3976_v51 = vadd.f32 %v3975_v41, %v3974_v50 }
 0x5bf   : > { %5093 = vpush %v3976_v51 }
 0x5c4   : > { %v3986_v56 = vpop.permute.xlu1 %3985 }
 0x5c5   : > { %v3991_v1 = vrot.slane %v3986_v56, %v6598_v35 }
 0x5c7   : > { %v3992_v9 = vmul.f32 %v3991_v1, %v3982_v5 }
 0x5f0   : > { %s5094_s19 = spop %5093 }
 0x5f1   : > { %v3978_v26 = vstv %s5094_s19 }
 0x5f2   : > { %v3979_v54 = vadd.f32 %v3978_v26, %v3964_v53 }
 0x5f4   : > { %3981 = vst.msk [vmem:[#allocation3] sm:$0x1] %vm3980_vm5, %v3979_v54 }
 0x5fb   : > { %v5009_v10 = vld [vmem:[#allocation3] ss:$0 sm:$0xff] (!%p5007_p4) }
 0x5fc   : > { %4255 = vperm.xlu0 (!%p5007_p4), %5950, %v5009_v10  }
 0x676   : > { %v4095_v36 = vpop.f32.mrb[12].mxu0  ;;  %v4166_v28 = vpop.f32.mrb[12].mxu1 }
 0x677   : > { %v4097_v59 = vpop.f32.mrb[13].mxu0  ;;  %v4168_v61 = vpop.f32.mrb[13].mxu1 }
 0x678   : > { %v4175_v62 = vcombine.low %v4095_v36, %v4097_v59  ;;  %v4176_v0 = vcombine.low %v4166_v28, %v4168_v61 }
 0x67a   : > { %v4183_v3 = vrot.slane %v4175_v62, %v4182_v57  ;;  %v4190_v4 = vrot.slane %v4176_v0, %v4182_v57 }
 0x67b   : > { %v4256_v18 = vpop.permute.xlu0 (!%p5007_p4), %4255 }
 0x67c   : > { %v4191_v8 = vcombine.low %v4183_v3, %v4190_v4  ;;  %4210 = sbr.rel (%p5007_p4) target bundleno = 1678 (0x68e), region = 64  ;;  %4258 = vst [vmem:[%s6530_s8] sm:$0xff] (!%p5007_p4), %v4256_v18 }
 0x67e   : > { %v4198_v63 = vrot.slane %v4191_v8, %v4182_v57 }
 0x680   : > { %v4200_v29 = vadd.f32 %v4198_v63, %v3992_v9 }
 0x682   : > { %4205 = vst.msk [vmem:[#allocation4] sm:$0xf] %vm4203_vm9, %v4200_v29 }
 0x689   : > { %v4211_v13 = vld [vmem:[#allocation4] sm:$0xf] }
 0x68a   : > { %v4216_v14 = vrot.slane %v4211_v13, %v6598_v35  ;;  %v4220_v25 = vrot.slane %v4211_v13, %v6607_v38  ;;  %v4224_v15 = vrot.slane %v4211_v13, %v6650_v6  ;;  %v4228_v16 = vrot.slane %v4211_v13, %v6653_v7 }
 0x68c   : > { %4233 = vst [vmem:[%s6526_s6] sm:$0xff] %v4216_v14  ;;  %4234 = vst [vmem:[%s6526_s6 + $0x8] sm:$0xff] %v4220_v25 }
 0x68d   : > { %4235 = vst [vmem:[%s6526_s6 + $0x10] sm:$0xff] %v4224_v15  ;;  %4236 = vst [vmem:[%s6526_s6 + $0x18] sm:$0xff] %v4228_v16 }
 0x68e PF: > { %s6928_s11 = sld [smem:[#allocation27_spill]]  ;;  %s4264_s21 = sand.u32 1, %s6342_s16  }
 0x68f   : > { %s5015_s26 = sshll.u32 %s6209_s12, 7  ;;  %s6929_s27 = sld [smem:[#allocation30_spill]] }
 0x690   : > { %s4297_s14 = sshll.u32 %s6528_s7, 4  ;;  %s5022_s23 = sshll.u32 %s6209_s12, 9  ;;  %s6752_s14 = int_to_ptr.vmem [resolvable:$true] %s4297_s14 }
 0x691   : > { %s6755_s24 = scalar_lea.sflag [#allocation13], %s4264_s21  ;;  %s6035_s30 = scalar_lea.vmem %s6752_s14, 128 }
 0x692   : > { %p6036_p6 = scmp.ne.s32.totalorder %s6752_s14, %s6035_s30  ;;  %s6238_s16 = smov [#allocation12]  }
 0x693   : > { %s6039_s18 = sshll.u32 %s6238_s16, 4  ;;  %s6040_s18 = int_to_ptr.vmem [resolvable:$false] %s6039_s18 }
 0x694   : > { %p6931_p10 = scmp.ne.s32.totalorder %s6928_s11, 0  ;;  %s6041_s13 = scalar_lea.vmem %s6040_s18, 256 }
 0x695   : > { %s6930_s22 = smov %s6929_s27  ;;  %s6749_s29 = scalar_lea.hbm %s6929_s27, %s5015_s26 }
 0x696   : > { %p6037_p7 = pnand %p6036_p6, %p6931_p10  ;;  %p6042_p5 = scmp.lt.s32.totalorder %s6752_s14, %s6040_s18 }
 0x697   : > { %p6043_p9 = scmp.lt.s32.totalorder %s6041_s13, %s6035_s30 }
 0x698   : > { %p6038_p13 = pneg %p6037_p7 }
 0x699   : > { %p6044_p2 = por %p6043_p9, %p6042_p5 }
 0x69b   : > { %p6045_p8 = pnand %p6044_p2, %p6038_p13 }
 0x69d   : > { %6048 = shalt.err (!%p6045_p8)
}
 0x69e   : > { %s6049_s7 = scalar_lea.hbm %s6749_s29, 128  ;;  %s6053_s25 = scalar_lea.hbm %s6930_s22, 256 }
 0x69f   : > { %p6050_p3 = scmp.ne.s32.totalorder %s6749_s29, %s6049_s7  ;;  %p6054_p11 = scmp.lt.u32.totalorder %s6749_s29, %s6930_s22 }
 0x6a0   : > { %p6055_p1 = scmp.lt.u32.totalorder %s6053_s25, %s6049_s7  ;;  %p6057_p6 = scmp.lt.u32.totalorder %s6049_s7, %s6749_s29 }
 0x6a1   : > { %p6051_p12 = pnand %p6050_p3, %p6931_p10 }
 0x6a2   : > { %p6056_p4 = por %p6055_p1, %p6054_p11 }
 0x6a3   : > { %p6052_p0 = pneg %p6051_p12 }
 0x6a4   : > { %p6058_p7 = por %p6057_p6, %p6056_p4 }
 0x6a6   : > { %p6059_p13 = pnand %p6058_p7, %p6052_p0 }
 0x6a8   : > { %6062 = shalt.err (!%p6059_p13)
}
 0x6a9   : > { %5105 = dma.vmem_to_hbm [thread:$0]  (%p6931_p10), %s6752_s14, 128, %s6749_s29, %s6755_s24  }
 0x6aa   : > { %s6932_s18 = sld [smem:[#allocation29_spill]]  ;;  %s4284_s7 = sshll.u32 %s6526_s6, 4  ;;  %s6787_s7 = int_to_ptr.vmem [resolvable:$true] %s4284_s7 }
 0x6ab   : > { %s6933_s25 = sld [smem:[#allocation31_spill]]  ;;  %s4260_s27 = scalar_lea.sflag [#allocation7], %s6522_s17 }
 0x6ac   : > { %s6063_s29 = scalar_lea.vmem %s6787_s7, 512  ;;  %s6239_s14 = smov [#allocation11]  }
 0x6ad   : > { %p6064_p5 = scmp.ne.s32.totalorder %s6787_s7, %s6063_s29 }
 0x6af   : > { %p6065_p9 = pnand %p6064_p5, %p6931_p10 }
 0x6b0   : > { %s6784_s13 = scalar_lea.hbm %s6932_s18, %s5022_s23  ;;  %s6067_s23 = sshll.u32 %s6239_s14, 4  ;;  %s6068_s23 = int_to_ptr.vmem [resolvable:$false] %s6067_s23 }
 0x6b1   : > { %s6794_s20 = scalar_lea.hbm %s6933_s25, %s5015_s26  ;;  %p6066_p2 = pneg %p6065_p9 }
 0x6b2   : > { %s6069_s6 = scalar_lea.vmem %s6068_s23, 1024  ;;  %p6070_p8 = scmp.lt.s32.totalorder %s6787_s7, %s6068_s23 }
 0x6b3   : > { %p6071_p3 = scmp.lt.s32.totalorder %s6069_s6, %s6063_s29 }
 0x6b5   : > { %p6072_p12 = por %p6071_p3, %p6070_p8 }
 0x6b7   : > { %p6073_p0 = pnand %p6072_p12, %p6066_p2 }
 0x6b9   : > { %6076 = shalt.err (!%p6073_p0)
}
 0x6ba   : > { %s6077_s12 = scalar_lea.hbm %s6784_s13, 512  ;;  %s6081_s30 = scalar_lea.hbm %s6932_s18, 1024 }
 0x6bb   : > { %p6078_p11 = scmp.ne.s32.totalorder %s6784_s13, %s6077_s12  ;;  %p6082_p6 = scmp.lt.u32.totalorder %s6784_s13, %s6932_s18 }
 0x6bc   : > { %p6083_p7 = scmp.lt.u32.totalorder %s6081_s30, %s6077_s12  ;;  %p6085_p5 = scmp.lt.u32.totalorder %s6077_s12, %s6784_s13 }
 0x6bd   : > { %p6079_p1 = pnand %p6078_p11, %p6931_p10 }
 0x6be   : > { %p6084_p13 = por %p6083_p7, %p6082_p6 }
 0x6bf   : > { %p6080_p4 = pneg %p6079_p1 }
 0x6c0   : > { %p6086_p9 = por %p6085_p5, %p6084_p13 }
 0x6c2   : > { %p6087_p2 = pnand %p6086_p9, %p6080_p4 }
 0x6c4   : > { %6090 = shalt.err (!%p6087_p2)
}
 0x6c5   : > { %5104 = dma.vmem_to_hbm [thread:$0]  (%p6931_p10), %s6787_s7, 512, %s6784_s13, %s4260_s27  }
 0x6c6   : > { %s4310_s21 = sshll.u32 %s6530_s8, 4  ;;  %s6240_s14 = smov [#allocation14]   ;;  %s4311_s21 = int_to_ptr.vmem [resolvable:$true] %s4310_s21 }
 0x6c7   : > { %s6091_s29 = scalar_lea.vmem %s4311_s21, 128  ;;  %s6095_s23 = sshll.u32 %s6240_s14, 4  ;;  %s6096_s23 = int_to_ptr.vmem [resolvable:$false] %s6095_s23 }
 0x6c8   : > { %p6092_p8 = scmp.ne.s32.totalorder %s4311_s21, %s6091_s29  ;;  %s6097_s6 = scalar_lea.vmem %s6096_s23, 256 }
 0x6c9   : > { %p6098_p0 = scmp.lt.s32.totalorder %s4311_s21, %s6096_s23  ;;  %p6099_p11 = scmp.lt.s32.totalorder %s6097_s6, %s6091_s29 }
 0x6ca   : > { %p6093_p3 = pnand %p6092_p8, %p6931_p10 }
 0x6cb   : > { %p6100_p1 = por %p6099_p11, %p6098_p0 }
 0x6cc   : > { %p6094_p12 = pneg %p6093_p3 }
 0x6ce   : > { %p6101_p4 = pnand %p6100_p1, %p6094_p12 }
 0x6d0   : > { %6104 = shalt.err (!%p6101_p4)
}
 0x6d1   : > { %s6105_s8 = scalar_lea.hbm %s6794_s20, 128  ;;  %s6109_s27 = scalar_lea.hbm %s6933_s25, 256 }
 0x6d2   : > { %p6106_p6 = scmp.ne.s32.totalorder %s6794_s20, %s6105_s8  ;;  %p6110_p5 = scmp.lt.u32.totalorder %s6794_s20, %s6933_s25 }
 0x6d3   : > { %p6111_p9 = scmp.lt.u32.totalorder %s6109_s27, %s6105_s8  ;;  %p6113_p8 = scmp.lt.u32.totalorder %s6105_s8, %s6794_s20 }
 0x6d4   : > { %p6107_p7 = pnand %p6106_p6, %p6931_p10 }
 0x6d5   : > { %p6112_p2 = por %p6111_p9, %p6110_p5 }
 0x6d6   : > { %p6108_p13 = pneg %p6107_p7 }
 0x6d7   : > { %p6114_p3 = por %p6113_p8, %p6112_p2 }
 0x6d9   : > { %p6115_p12 = pnand %p6114_p3, %p6108_p13 }
 0x6db   : > { %6118 = shalt.err (!%p6115_p12)
}
 0x6dc   : > { %5106 = dma.vmem_to_hbm [thread:$0]  (%p6931_p10), %s4311_s21, 128, %s6794_s20, %s6755_s24  }
 0x6dd PF: > { %s6934_s26 = sld [smem:[#allocation19_spill]]  ;;  %s6935_s30 = sld [smem:[#allocation28_spill]] }
 0x6de   : > { %p5131_p0 = scmp.ge.s32.totalorder %s6221_s15, 2 }
 0x6e3   : > { %s4322_s16 = sand.u32 1, %s6934_s26   ;;  %p6936_p11 = scmp.ne.s32.totalorder %s6935_s30, 0 }
 0x6e4   : > { %s4323_s19 = scalar_lea.sflag [#allocation7], %s4322_s16 }
 0x6e5   : > { %p5118_p1 = pnand %p5131_p0, %p6936_p11 }
 0x6e7   : > { %6172 = dma.done.wait (!%p5118_p1), %s4323_s19, 512  }
 0x6e8   : > { %6174 = vsyncadd (!%p5118_p1), %s4323_s19, 4294966784  ;;  %s6937_s29 = sadd.s32 4294967294, %s6221_s15  }
 0x6e9   : > { %s4331_s14 = sand.u32 1, %s6937_s29  }
 0x6ea   : > { %s4332_s23 = scalar_lea.sflag [#allocation13], %s4331_s14 }
 0x6eb   : > { %6176 = dma.done.wait (!%p5118_p1), %s4332_s23, 256  }
 0x6ec   : > { %6178 = vsyncadd (!%p5118_p1), %s4332_s23, 4294967040  ;;  %s29_s15 = sadd.s32 1, %s6221_s15   ;;  %s6938_s11 = sld [smem:[#allocation20_spill]] }
 0x6ed   : > { %p26_p10 = scmp.ge.s32.totalorder %s29_s15, 6   ;;  %s6939_s29 = sld [smem:[#allocation25_spill]] }
 0x6ee   : > { %s6940_s24 = sld [smem:[#allocation26_spill]]  ;;  %s6941_s20 = sld [smem:[#allocation21_spill]] }
 0x6ef   : > { %s6942_s12 = sld [smem:[#allocation22_spill]]  ;;  %s6943_s13 = sld [smem:[#allocation23_spill]] }
 0x6f0   : > { %s6944_s14 = sld [smem:[#allocation24_spill]]  ;;  %s6945_s27 = smov %s6185_s28 }
 0x6f1   : > { %s6947_s30 = smov %s6197_s9  ;;  %s6948_s9 = smov %s6201_s10 }
 0x6f2   : > { %s6946_s28 = smov %s6938_s11  ;;  %28 = sbr.rel (!%p26_p10) target bundleno = 16 (0x10), region = 137 }
 0x6f4   : > { %s6949_s10 = smov %s6940_s24  ;;  %s6950_s11 = smov %s6941_s20 }
 0x6f9   :  { %4346 = vsyncpa [#allocation6], 1 }
 0x6fa   :  { %4348 = vsyncpa [#allocation6 + $0x1], 1 }
 0x6fb   :  { %4349 = vsyncpa [#allocation9], 1 }
 0x6fc   :  { %4350 = vsyncpa [#allocation7], 1 }
 0x6fd   :  { %4352 = vsyncpa [#allocation7 + $0x1], 1 }
 0x6fe   :  { %4353 = vsyncpa [#allocation13], 1 }
 0x6ff   :  { %4355 = vsyncpa [#allocation13 + $0x1], 1 }

// kernel: tpu_custom_call.1
= control target key start
LH: loop header
LB: loop body
LE: loop exit
PB: predicated region body
PF: predicated region fallthrough
CT: control target
= control target key end

     0   :  { %s6876_s0 = inlined_call_operand.hbm [shape: bf16[40,1024], index: 0, kind: input, shape index: {}]   ;;  %s6877_s1 = inlined_call_operand.hbm [shape: bf16[1024,512], index: 1, kind: input, shape index: {}]   ;;  %s6878_s2 = inlined_call_operand.vmem [shape: f32[1,512], index: 2, kind: input, shape index: {}]   ;;  %s6879_s3 = inlined_call_operand.hbm [shape: bf16[512,768], index: 3, kind: input, shape index: {}]   ;;  %s6880_s4 = inlined_call_operand.vmem [shape: f32[1,768], index: 4, kind: input, shape index: {}]   ;;  %s6881_s5 = inlined_call_operand.vmem [shape: f32[1,384], index: 5, kind: input, shape index: {}]   ;;  %s6882_s6 = inlined_call_operand.hbm [shape: f32[16,512], index: 6, kind: output, shape index: {0}]   ;;  %s6883_s7 = inlined_call_operand.hbm [shape: f32[16,128], index: 7, kind: output, shape index: {1}]   ;;  %s6884_s8 = inlined_call_operand.hbm [shape: f32[16,128], index: 8, kind: output, shape index: {2}]  }
   0x1   :  { %6901 = sst [smem:[#allocation29_spill]] %s6882_s6 }
   0x2   :  { %6902 = sst [smem:[#allocation30_spill]] %s6883_s7 }
   0x3   :  { %6903 = sst [smem:[#allocation31_spill]] %s6884_s8 }
   0x4   :  { %14 = vsyncpa [#allocation6], 0 }
   0x5   :  { %16 = vsyncpa [#allocation6 + $0x1], 0 }
   0x6   :  { %17 = vsyncpa [#allocation9], 0 }
   0x7   :  { %18 = vsyncpa [#allocation7], 0 }
   0x8   :  { %20 = vsyncpa [#allocation7 + $0x1], 0 }
   0x9   :  { %21 = vsyncpa [#allocation13], 0 }
   0xa   :  { %23 = vsyncpa [#allocation13 + $0x1], 0  ;;  %s6286_s27 = smov 0   ;;  %s6288_s28 = smov 0  }
   0xb   :  { %s6290_s29 = smov 0   ;;  %s6292_s30 = smov 0  }
   0xc   :  { %s6294_s9 = smov 0   ;;  %s6296_s10 = smov 0  }
   0xd   :  { %s6298_s11 = smov 0   ;;  %s6300_s12 = smov 0  }
   0xe   :  { %s6302_s13 = smov 0   ;;  %s6304_s14 = smov 0  }
   0xf   :  { %s6306_s15 = smov 0  }
  0x10 LB: > { %6904 = sst [smem:[#allocation19_spill]] %s6181_s27  ;;  %s6342_s16 = sadd.s32 4294967295, %s6221_s15   ;;  %s6221_s15 = sphi %s6306_s15, %s29_s15   ;;  %s6217_s14 = sphi %s6304_s14, %s6944_s14   ;;  %s6213_s13 = sphi %s6302_s13, %s6943_s13   ;;  %s6209_s12 = sphi %s6300_s12, %s6942_s12   ;;  %s6205_s11 = sphi %s6298_s11, %s6950_s11   ;;  %s6201_s10 = sphi %s6296_s10, %s6949_s10   ;;  %s6197_s9 = sphi %s6294_s9, %s6948_s9   ;;  %s6193_s30 = sphi %s6292_s30, %s6947_s30   ;;  %s6189_s29 = sphi %s6290_s29, %s6939_s29   ;;  %s6185_s28 = sphi %s6288_s28, %s6946_s28   ;;  %s6181_s27 = sphi %s6286_s27, %s6945_s27  }
  0x11   : > { %6905 = sst [smem:[#allocation20_spill]] %s6189_s29  ;;  %s38_s18 = sadd.s32 1, %s6213_s13 }
  0x12   : > { %6906 = sst [smem:[#allocation21_spill]] %s6213_s13  ;;  %s41_s19 = sadd.s32 1, %s6217_s14 }
  0x13   : > { %6907 = sst [smem:[#allocation22_spill]] %s6217_s14  ;;  %p39_p0 = scmp.ge.s32.totalorder %s38_s18, 2 }
  0x14   : > { %s4473_s20 = sshll.u32 %s6217_s14, 1  ;;  %s56_s22 = sadd.s32 1, %s6201_s10 }
  0x15   : > { %s46_s21 = sadd.s32 %s6213_s13, %s4473_s20  ;;  %s6952_s18 = smov (%p39_p0, %s38_s18), 0 }
  0x16   : > { %6908 = sst [smem:[#allocation23_spill]] %s6952_s18  ;;  %s6954_s19 = smov (!%p39_p0, %s41_s19), %s6217_s14 }
  0x17   : > { %p47_p1 = scmp.lt.s32.totalorder %s46_s21, 2  ;;  %p63_p2 = scmp.ne.s32.totalorder %s6201_s10, %s6197_s9 }
  0x18   : > { %p43_p3 = scmp.ge.s32.totalorder %s6954_s19, 2  ;;  %p64_p4 = scmp.eq.s32.totalorder %s6221_s15, 0 }
  0x19   : > { %s6956_s21 = smov (!%p47_p1, %s46_s21), 2  ;;  %p69_p6 = scmp.ne.s32.totalorder %s6197_s9, %s6193_s30 }
  0x1a   : > { %s6958_s19 = smov (%p43_p3, %s6954_s19), 0  ;;  %p6360_p5 = por %p64_p4, %p63_p2 }
  0x1b   : > { %6909 = sst [smem:[#allocation24_spill]] %s6958_s19  ;;  %s4474_s24 = sshll.u32 %s6958_s19, 1 }
  0x1c   : > { %s6910_s23 = scalar_select %p6360_p5, 1, 0 }
  0x1d   : > { %p6893_p7 = scmp.eq.s32.totalorder %s6342_s16, 0  ;;  %s50_s25 = sadd.s32 %s4474_s24, %s6952_s18 }
  0x1e   : > { %s184_s26 = ssub.s32 %s6217_s14, %s6958_s19  ;;  %p51_p8 = scmp.lt.s32.totalorder %s50_s25, 2 }
  0x1f   : > { %p6373_p9 = por %p6893_p7, %p69_p6  ;;  %p185_p10 = scmp.eq.s32.totalorder %s184_s26, 0 }
  0x20   : > { %s187_s17 = sadd.s32 1, %s6189_s29  ;;  %s6960_s25 = smov (!%p51_p8, %s50_s25), 2 }
  0x21   : > { %s6911_s20 = scalar_select %p6373_p9, 1, 0 }
  0x22   : > { %s6379_s13 = scalar_select %p185_p10, %s6189_s29, %s187_s17  }
  0x23   : > { %s53_s30 = ssub.s32 %s6956_s21, %s6960_s25  ;;  %p197_p11 = scmp.ne.s32.totalorder %s6189_s29, %s6185_s28 }
  0x24   : > { %6912 = sst [smem:[#allocation25_spill]] %s6379_s13  ;;  %p54_p12 = scmp.eq.s32.totalorder %s53_s30, 0 }
  0x25   : > { %p198_p13 = scmp.eq.s32.totalorder %s6342_s16, 3  ;;  %p203_p0 = scmp.ne.s32.totalorder %s6185_s28, %s6181_s27 }
  0x26   : > { %s6913_s24 = sadd.s32 4294967294, %s6221_s15   ;;  %p4475_p4 = scmp.ge.s32.totalorder %s6221_s15, 1 }
  0x27   : > { %p204_p1 = scmp.eq.s32.totalorder %s6913_s24, 3  ;;  %p6392_p2 = por %p198_p13, %p197_p11 }
  0x28   : > { %s6390_s19 = scalar_select %p54_p12, %s6201_s10, %s56_s22  }
  0x29   : > { %s6915_s18 = scalar_select %p6392_p2, 1, 0 }
  0x2a   : > { %6914 = sst [smem:[#allocation26_spill]] %s6390_s19  ;;  %p6396_p3 = por %p204_p1, %p203_p0 }
  0x2b   : > { %6916 = sst [smem:[#allocation27_spill]] %s6915_s18  ;;  %p263_p6 = scmp.lt.s32.totalorder %s6221_s15, 5 }
  0x2c   : > { %s6917_s26 = scalar_select %p6396_p3, 1, 0 }
  0x2d   : > { %p6402_p8 = pnand %p4475_p4, %p263_p6  ;;  %s6223_s25 = smov [#allocation8]  }
  0x2e   : > { %6918 = sst [smem:[#allocation28_spill]] %s6917_s26  ;;  %s275_s30 = sshll.u32 %s6223_s25, 4  ;;  %s276_s30 = int_to_ptr.vmem [resolvable:$true] %s275_s30 }
  0x2f   : > { %s6919_s17 = scalar_select %p6402_p8, 1, 0 }
  0x30   : > { %p5110_p10 = pneg %p6402_p8  ;;  %s6224_s24 = smov [#allocation10]  }
  0x31   : > { %s291_s14 = sshll.u32 %s6224_s24, 4  ;;  %s5951_s29 = scalar_lea.hbm %s6877_s1, 32768  ;;  %s6414_s14 = int_to_ptr.vmem [resolvable:$true] %s291_s14 }
  0x32   : > { %p6410_p11 = pnand %p5110_p10, %p6893_p7  ;;  %p5952_p12 = scmp.ne.s32.totalorder %s6877_s1, %s5951_s29 }
  0x33   : > { %p5958_p4 = scmp.lt.u32.totalorder %s5951_s29, %s6877_s1 }
  0x34   : > { %p5953_p13 = pneg %p6410_p11 }
  0x36   : > { %p5954_p0 = pnand %p5953_p13, %p5952_p12 }
  0x38   : > { %p5955_p1 = pneg %p5954_p0 }
  0x3a   : > { %p5960_p6 = pnand %p5958_p4, %p5955_p1 }
  0x3c   : > { %5963 = shalt.err (!%p5960_p6)
}
  0x3d   : > { %s5964_s24 = scalar_lea.vmem %s276_s30, 32768  ;;  %p5972_p2 = scmp.lt.s32.totalorder %s276_s30, %s276_s30 }
  0x3e   : > { %p5965_p10 = scmp.ne.s32.totalorder %s276_s30, %s5964_s24  ;;  %p5973_p9 = scmp.lt.s32.totalorder %s5964_s24, %s5964_s24 }
  0x40   : > { %p5967_p7 = pnand %p5965_p10, %p5953_p13  ;;  %p5974_p8 = por %p5973_p9, %p5972_p2 }
  0x42   : > { %p5968_p3 = pneg %p5967_p7 }
  0x44   : > { %p5975_p5 = pnand %p5974_p8, %p5968_p3 }
  0x46   : > { %5978 = shalt.err (!%p5975_p5)
}
  0x47   : > { %s6225_s13 = smov 256   ;;  %s6226_s19 = smov 16  }
  0x48   : > { %5113 = dma.hbm_to_vmem [thread:$0]  (!%p6410_p11), %s6877_s1, 32768, %s276_s30, [#allocation9], %s6225_s13, %s6225_s13, %s6226_s19  }
  0x49   : > { %s5979_s25 = scalar_lea.hbm %s6879_s3, 24576 }
  0x4a   : > { %p5980_p7 = scmp.ne.s32.totalorder %s6879_s3, %s5979_s25  ;;  %p5986_p2 = scmp.lt.u32.totalorder %s5979_s25, %s6879_s3 }
  0x4c   : > { %p5982_p5 = pnand %p5980_p7, %p5953_p13 }
  0x4e   : > { %p5983_p9 = pneg %p5982_p5 }
  0x50   : > { %p5988_p3 = pnand %p5986_p2, %p5983_p9 }
  0x52   : > { %5991 = shalt.err (!%p5988_p3)
}
  0x53   : > { %s5992_s30 = scalar_lea.vmem %s6414_s14, 24576  ;;  %p6000_p1 = scmp.lt.s32.totalorder %s6414_s14, %s6414_s14 }
  0x54   : > { %p5993_p8 = scmp.ne.s32.totalorder %s6414_s14, %s5992_s30  ;;  %p6001_p4 = scmp.lt.s32.totalorder %s5992_s30, %s5992_s30 }
  0x56   : > { %p5995_p12 = pnand %p5993_p8, %p5953_p13  ;;  %p6002_p6 = por %p6001_p4, %p6000_p1 }
  0x58   : > { %p5996_p0 = pneg %p5995_p12 }
  0x5a   : > { %p6003_p10 = pnand %p6002_p6, %p5996_p0 }
  0x5c   : > { %6006 = shalt.err (!%p6003_p10)
}
  0x5d   : > { %s6227_s6 = smov 384   ;;  %s6228_s7 = smov 24  }
  0x5e   : > { %5116 = dma.hbm_to_vmem [thread:$0]  (!%p6410_p11), %s6879_s3, 24576, %s6414_s14, [#allocation9], %s6227_s6, %s6227_s6, %s6228_s7  }
  0x5f   : > { %p4478_p7 = scmp.ge.s32.totalorder %s6221_s15, 4 }
  0x60   : > { %p6921_p13 = scmp.ne.s32.totalorder (!%p4478_p7), %s6910_s23, 0 }
  0x61   : > { %307 = sbr.rel (%p4478_p7) target bundleno = 139 (0x8b), region = 36 }
  0x68   : > { %310 = sbr.rel (!%p6921_p13) target bundleno = 139 (0x8b), region = 40  ;;  %s311_s19 = sand.u32 (%p6921_p13), 1, %s6201_s10  }
  0x69   : > { %s4481_s8 = sshll.u32 (%p6921_p13), %s6956_s21, 1  ;;  %s4479_s27 = sshll.u32 (%p6921_p13), %s311_s19, 6 }
  0x6a   : > { %s321_s29 = ssub.s32 (%p6921_p13), 5, %s4481_s8  ;;  %s6471_s25 = scalar_lea.sflag (%p6921_p13), [#allocation6], %s311_s19 }
  0x6b   : > { %p322_p5 = scmp.lt.s32.totalorder (%p6921_p13), %s321_s29, 2  ;;  %s315_s14 = scalar_lea.vmem (%p6921_p13), [#allocation5], %s4479_s27 }
  0x6f   : > { %s6962_s29 = smov (!%p322_p5, %s321_s29), 2 }
  0x70   : > { %s6468_s26 = sshll.u32 %s6962_s29, 9 }
  0x71   : > { %s327_s22 = ssub.s32 1024, %s6468_s26 }
  0x72   : > { %328 = vsyncadd %s6471_s25, %s327_s22  ;;  %p4484_p11 = scmp.ne.s32.totalorder %s6468_s26, 0  ;;  %s5021_s23 = sshll.u32 %s6956_s21, 10 }
  0x73   : > { %s6479_s6 = scalar_lea.hbm %s6876_s0, %s5021_s23  ;;  %s334_s7 = sshll.u32 %s315_s14, 4  ;;  %s6481_s7 = int_to_ptr.vmem [resolvable:$true] %s334_s7 }
  0x74   : > { %s6007_s18 = scalar_lea.hbm %s6479_s6, %s6468_s26  ;;  %s6011_s21 = scalar_lea.hbm %s6876_s0, 2560 }
  0x75   : > { %p6008_p9 = scmp.ne.s32.totalorder %s6479_s6, %s6007_s18  ;;  %p6012_p8 = scmp.lt.u32.totalorder %s6479_s6, %s6876_s0 }
  0x76   : > { %p6013_p12 = scmp.lt.u32.totalorder %s6011_s21, %s6007_s18  ;;  %p6015_p1 = scmp.lt.u32.totalorder %s6007_s18, %s6479_s6 }
  0x77   : > { %p6009_p2 = pnand %p6008_p9, %p4484_p11 }
  0x78   : > { %p6014_p0 = por %p6013_p12, %p6012_p8 }
  0x79   : > { %p6010_p3 = pneg %p6009_p2 }
  0x7a   : > { %p6016_p4 = por %p6015_p1, %p6014_p0 }
  0x7c   : > { %p6017_p6 = pnand %p6016_p4, %p6010_p3 }
  0x7e   : > { %6020 = shalt.err (!%p6017_p6)
}
  0x7f   : > { %s6021_s29 = scalar_lea.vmem %s6481_s7, %s6468_s26  ;;  %s6229_s22 = smov [#allocation5]  }
  0x80   : > { %p6022_p10 = scmp.ne.s32.totalorder %s6481_s7, %s6021_s29  ;;  %s6025_s14 = sshll.u32 %s6229_s22, 4  ;;  %s6026_s14 = int_to_ptr.vmem [resolvable:$false] %s6025_s14 }
  0x81   : > { %s6027_s23 = scalar_lea.vmem %s6026_s14, 2048  ;;  %p6028_p5 = scmp.lt.s32.totalorder %s6481_s7, %s6026_s14 }
  0x82   : > { %p6023_p7 = pnand %p6022_p10, %p4484_p11  ;;  %p6029_p9 = scmp.lt.s32.totalorder %s6027_s23, %s6021_s29 }
  0x84   : > { %p6024_p13 = pneg %p6023_p7  ;;  %p6030_p2 = por %p6029_p9, %p6028_p5 }
  0x86   : > { %p6031_p8 = pnand %p6030_p2, %p6024_p13 }
  0x88   : > { %6034 = shalt.err (!%p6031_p8)
}
  0x89   : > { %s6230_s24 = smov 512   ;;  %s6231_s30 = smov 32  }
  0x8a   : > { %340 = dma.hbm_to_vmem [thread:$0]  (%p4484_p11), %s6479_s6, %s6468_s26, %s6481_s7, %s6471_s25, %s6230_s24, %s6230_s24, %s6231_s30  }
  0x8b PF: > { %p6922_p3 = scmp.ne.s32.totalorder %s6919_s17, 0 }
  0x8c   : > { %s348_s18 = sand.u32 (!%p6922_p3), 1, %s6197_s9   ;;  %p6923_p12 = scmp.ne.s32.totalorder (!%p6922_p3), %s6911_s20, 0 }
  0x8d   : > { %346 = sbr.rel (%p6922_p3) target bundleno = 1757 (0x6dd), region = 44  ;;  %s4490_s13 = sshll.u32 (!%p6922_p3), %s348_s18, 6 }
  0x8e   : > { %s349_s19 = scalar_lea.sflag (!%p6922_p3), [#allocation6], %s348_s18  ;;  %s6511_s21 = scalar_lea.vmem (!%p6922_p3), [#allocation5], %s4490_s13 }
  0x94   : > { %6164 = dma.done.wait (%p6923_p12), %s349_s19, 1024  }
  0x95   : > { %6166 = vsyncadd (%p6923_p12), %s349_s19, 4294966272  ;;  %p6924_p0 = scmp.eq.s32.totalorder %s6342_s16, 0 }
  0x97   : > { %6168 = dma.done.wait (%p6924_p0), [#allocation9], 57344   ;;  %p6925_p11 = pmov %p6924_p0 }
  0x98   : > { %s6522_s17 = sand.u32 1, %s6185_s28   ;;  %p4496_p1 = scmp.ne.s32.totalorder %s6205_s11, 0 }
  0x99   : > { %6170 = vsyncadd (%p6925_p11), [#allocation9], 4294909952  ;;  %s4493_s26 = sshll.u32 %s6522_s17, 5  ;;  %s4494_s25 = sshll.u32 %s6522_s17, 3  ;;  %vm417_vm0 = vcmask (!%p4496_p1), 0   ;;  %v420_v0 = vlaneseq (!%p4496_p1)  ;;  %v6232_v1 = vmov (!%p4496_p1), -inf  }
  0x9a   : > { %s6526_s6 = scalar_lea.vmem [#allocation11], %s4493_s26  ;;  %s6528_s7 = scalar_lea.vmem [#allocation12], %s4494_s25  ;;  %418 = vst.msk [vmem:[#allocation2] sm:$0x1] (!%p4496_p1), %vm417_vm0, %v6232_v1  ;;  %v6233_v2 = vmov (!%p4496_p1), 0.0  }
  0x9b   : > { %s6530_s8 = scalar_lea.vmem [#allocation14], %s4494_s25  ;;  %416 = sbr.rel (%p4496_p1) target bundleno = 162 (0xa2), region = 60  ;;  %419 = vst.msk [vmem:[#allocation3] sm:$0x1] (!%p4496_p1), %vm417_vm0, %v6233_v2  ;;  %vm422_vm1 = vcmp.lt.s32.totalorder (!%p4496_p1), %v420_v0, 512 }
  0x9c   : > { %424 = vst.msk [vmem:[#allocation4] sm:$0xf] (!%p4496_p1), %vm422_vm1, %v6233_v2 }
  0xa2 PF: > { %v5236_v3 = vld [vmem:[#allocation8 + $0x4] ss:$16 sps:$4 sm:$0xff]   ;;  %v5240_v5 = vld [vmem:[#allocation8] ss:$16 sps:$4 sm:$0xff]   ;;  %v437_v53 = vld [vmem:[%s6511_s21 + $0x8] sm:$0xff]  ;;  %s4497_s20 = sshll.u32 %s6209_s12, 1 }
  0xa3   : > { %v5238_v4 = vld [vmem:[#allocation8 + $0x204] ss:$16 sps:$4 sm:$0xff]   ;;  %2042 = vmatprep.subr.bf16.mxu1 %v5236_v3  ;;  %v5241_v6 = vld [vmem:[#allocation8 + $0x200] ss:$16 sps:$4 sm:$0xff]   ;;  %v441_v54 = vld [vmem:[%s6511_s21 + $0x28] sm:$0xff]  ;;  %s426_s27 = sadd.s32 %s6205_s11, %s4497_s20  ;;  %vm3980_vm5 = vcmask 0  }
  0xa4   : > { %2085 = vmatprep.subr.bf16.mxu0 %v5238_v4  ;;  %v5242_v7 = vld [vmem:[#allocation8 + $0x24] ss:$16 sps:$4 sm:$0xff]   ;;  %2043 = vmatpush1.bf16.msra.mxu1 %v5240_v5  ;;  %v5246_v9 = vld [vmem:[#allocation8 + $0x20] ss:$16 sps:$4 sm:$0xff]   ;;  %v6537_v58 = vcombine.high %v437_v53, %v441_v54  ;;  %s4498_s14 = sshll.u32 %s426_s27, 4  ;;  %vm3965_vm6 = vcmask 7168  }
  0xa5   : > { %2086 = vmatpush1.bf16.msra.mxu0 %v5241_v6  ;;  %v5244_v8 = vld [vmem:[#allocation8 + $0x224] ss:$16 sps:$4 sm:$0xff]   ;;  %2044 = vmatprep.subr.bf16.mxu1 %v5242_v7  ;;  %v5247_v10 = vld [vmem:[#allocation8 + $0x220] ss:$16 sps:$4 sm:$0xff]   ;;  %vm4025_vm8 = vcmask 130048   ;;  %p5007_p4 = scmp.ne.s32.totalorder %s6205_s11, 1 }
  0xa6   : > { %2087 = vmatprep.subr.bf16.mxu0 %v5244_v8  ;;  %v5248_v11 = vld [vmem:[#allocation8 + $0x44] ss:$16 sps:$4 sm:$0xff]   ;;  %v5252_v13 = vld [vmem:[#allocation8 + $0x40] ss:$16 sps:$4 sm:$0xff]   ;;  %2117 = vmatprep.mubr.bf16.mxu0 %v6537_v58 }
  0xa7   : > { %v5250_v12 = vld [vmem:[#allocation8 + $0x244] ss:$16 sps:$4 sm:$0xff]   ;;  %v5253_v14 = vld [vmem:[#allocation8 + $0x240] ss:$16 sps:$4 sm:$0xff]  }
  0xa8   : > { %2045 = vmatpush1.bf16.msra.mxu1 %v5246_v9  ;;  %v5254_v15 = vld [vmem:[#allocation8 + $0x64] ss:$16 sps:$4 sm:$0xff]   ;;  %v5258_v17 = vld [vmem:[#allocation8 + $0x60] ss:$16 sps:$4 sm:$0xff]  }
  0xa9   : > { %2088 = vmatpush1.bf16.msra.mxu0 %v5247_v10  ;;  %2046 = vmatprep.subr.bf16.mxu1 %v5248_v11  ;;  %v5256_v16 = vld [vmem:[#allocation8 + $0x264] ss:$16 sps:$4 sm:$0xff]   ;;  %v5259_v18 = vld [vmem:[#allocation8 + $0x260] ss:$16 sps:$4 sm:$0xff]   ;;  %v5337_v10 = vld [vmem:[#allocation8 + $0xc] ss:$16 sps:$4 sm:$0xff]  }
  0xaa   : > { %2089 = vmatprep.subr.bf16.mxu0 %v5250_v12  ;;  %v5260_v19 = vld [vmem:[#allocation8 + $0x84] ss:$16 sps:$4 sm:$0xff]   ;;  %v5264_v21 = vld [vmem:[#allocation8 + $0x80] ss:$16 sps:$4 sm:$0xff]   ;;  %v6542_v12 = vcombine.low %v437_v53, %v441_v54  ;;  %v5389_v53 = vld [vmem:[#allocation8 + $0x128] ss:$16 sps:$4 sm:$0xff]  }
  0xab   : > { %v5262_v20 = vld [vmem:[#allocation8 + $0x284] ss:$16 sps:$4 sm:$0xff]   ;;  %v5265_v22 = vld [vmem:[#allocation8 + $0x280] ss:$16 sps:$4 sm:$0xff]  }
  0xac   : > { %2047 = vmatpush1.bf16.msra.mxu1 %v5252_v13  ;;  %v5266_v23 = vld [vmem:[#allocation8 + $0xa4] ss:$16 sps:$4 sm:$0xff]   ;;  %v5270_v25 = vld [vmem:[#allocation8 + $0xa0] ss:$16 sps:$4 sm:$0xff]  }
  0xad   : > { %2090 = vmatpush1.bf16.msra.mxu0 %v5253_v14  ;;  %2048 = vmatprep.subr.bf16.mxu1 %v5254_v15  ;;  %v5268_v24 = vld [vmem:[#allocation8 + $0x2a4] ss:$16 sps:$4 sm:$0xff]   ;;  %v5271_v26 = vld [vmem:[#allocation8 + $0x2a0] ss:$16 sps:$4 sm:$0xff]   ;;  %v5335_v14 = vld [vmem:[#allocation8 + $0x8] ss:$16 sps:$4 sm:$0xff]  }
  0xae   : > { %2091 = vmatprep.subr.bf16.mxu0 %v5256_v16  ;;  %v5272_v27 = vld [vmem:[#allocation8 + $0xc4] ss:$16 sps:$4 sm:$0xff]   ;;  %v5276_v29 = vld [vmem:[#allocation8 + $0xc0] ss:$16 sps:$4 sm:$0xff]   ;;  %v5343_v16 = vld [vmem:[#allocation8 + $0x2c] ss:$16 sps:$4 sm:$0xff]  }
  0xaf   : > { %v5274_v28 = vld [vmem:[#allocation8 + $0x2c4] ss:$16 sps:$4 sm:$0xff]   ;;  %v5277_v30 = vld [vmem:[#allocation8 + $0x2c0] ss:$16 sps:$4 sm:$0xff]  }
  0xb0   : > { %2049 = vmatpush1.bf16.msra.mxu1 %v5258_v17  ;;  %v5278_v31 = vld [vmem:[#allocation8 + $0xe4] ss:$16 sps:$4 sm:$0xff]   ;;  %v5282_v33 = vld [vmem:[#allocation8 + $0xe0] ss:$16 sps:$4 sm:$0xff]  }
  0xb1   : > { %2092 = vmatpush1.bf16.msra.mxu0 %v5259_v18  ;;  %2050 = vmatprep.subr.bf16.mxu1 %v5260_v19  ;;  %v5280_v32 = vld [vmem:[#allocation8 + $0x2e4] ss:$16 sps:$4 sm:$0xff]   ;;  %v5283_v34 = vld [vmem:[#allocation8 + $0x2e0] ss:$16 sps:$4 sm:$0xff]   ;;  %v5341_v18 = vld [vmem:[#allocation8 + $0x28] ss:$16 sps:$4 sm:$0xff]  }
  0xb2   : > { %2093 = vmatprep.subr.bf16.mxu0 %v5262_v20  ;;  %v5284_v35 = vld [vmem:[#allocation8 + $0x104] ss:$16 sps:$4 sm:$0xff]   ;;  %v5288_v37 = vld [vmem:[#allocation8 + $0x100] ss:$16 sps:$4 sm:$0xff]   ;;  %v5349_v20 = vld [vmem:[#allocation8 + $0x4c] ss:$16 sps:$4 sm:$0xff]  }
  0xb3   : > { %v5286_v36 = vld [vmem:[#allocation8 + $0x304] ss:$16 sps:$4 sm:$0xff]   ;;  %v5289_v38 = vld [vmem:[#allocation8 + $0x300] ss:$16 sps:$4 sm:$0xff]  }
  0xb4   : > { %2051 = vmatpush1.bf16.msra.mxu1 %v5264_v21  ;;  %v5290_v39 = vld [vmem:[#allocation8 + $0x124] ss:$16 sps:$4 sm:$0xff]   ;;  %v5294_v41 = vld [vmem:[#allocation8 + $0x120] ss:$16 sps:$4 sm:$0xff]  }
  0xb5   : > { %2094 = vmatpush1.bf16.msra.mxu0 %v5265_v22  ;;  %2052 = vmatprep.subr.bf16.mxu1 %v5266_v23  ;;  %v5292_v40 = vld [vmem:[#allocation8 + $0x324] ss:$16 sps:$4 sm:$0xff]   ;;  %v5295_v42 = vld [vmem:[#allocation8 + $0x320] ss:$16 sps:$4 sm:$0xff]   ;;  %v5347_v22 = vld [vmem:[#allocation8 + $0x48] ss:$16 sps:$4 sm:$0xff]  }
  0xb6   : > { %2095 = vmatprep.subr.bf16.mxu0 %v5268_v24  ;;  %v5296_v43 = vld [vmem:[#allocation8 + $0x144] ss:$16 sps:$4 sm:$0xff]   ;;  %v5300_v45 = vld [vmem:[#allocation8 + $0x140] ss:$16 sps:$4 sm:$0xff]   ;;  %v5355_v24 = vld [vmem:[#allocation8 + $0x6c] ss:$16 sps:$4 sm:$0xff]  }
  0xb7   : > { %v5298_v44 = vld [vmem:[#allocation8 + $0x344] ss:$16 sps:$4 sm:$0xff]   ;;  %v5301_v46 = vld [vmem:[#allocation8 + $0x340] ss:$16 sps:$4 sm:$0xff]  }
  0xb8   : > { %2053 = vmatpush1.bf16.msra.mxu1 %v5270_v25  ;;  %v5302_v47 = vld [vmem:[#allocation8 + $0x164] ss:$16 sps:$4 sm:$0xff]   ;;  %v5306_v49 = vld [vmem:[#allocation8 + $0x160] ss:$16 sps:$4 sm:$0xff]  }
  0xb9   : > { %2096 = vmatpush1.bf16.msra.mxu0 %v5271_v26  ;;  %2054 = vmatprep.subr.bf16.mxu1 %v5272_v27  ;;  %v5304_v48 = vld [vmem:[#allocation8 + $0x364] ss:$16 sps:$4 sm:$0xff]   ;;  %v5307_v50 = vld [vmem:[#allocation8 + $0x360] ss:$16 sps:$4 sm:$0xff]   ;;  %v5353_v26 = vld [vmem:[#allocation8 + $0x68] ss:$16 sps:$4 sm:$0xff]  }
  0xba   : > { %2097 = vmatprep.subr.bf16.mxu0 %v5274_v28  ;;  %v436_v51 = vld [vmem:[%s6511_s21] sm:$0xff]  ;;  %v5361_v28 = vld [vmem:[#allocation8 + $0x8c] ss:$16 sps:$4 sm:$0xff]  }
  0xbb   : > { %v440_v52 = vld [vmem:[%s6511_s21 + $0x20] sm:$0xff] }
  0xbc   : > { %2055 = vmatpush1.bf16.msra.mxu1 %v5276_v29  ;;  %v5308_v55 = vld [vmem:[#allocation8 + $0x184] ss:$16 sps:$4 sm:$0xff]   ;;  %v4500_v56 = vcombine.high %v436_v51, %v440_v52  ;;  %v5312_v59 = vld [vmem:[#allocation8 + $0x180] ss:$16 sps:$4 sm:$0xff]   ;;  %v6540_v11 = vcombine.low %v436_v51, %v440_v52  ;;  %v5391_v51 = vld [vmem:[#allocation8 + $0x12c] ss:$16 sps:$4 sm:$0xff]  }
  0xbd   : > { %2098 = vmatpush1.bf16.msra.mxu0 %v5277_v30  ;;  %2056 = vmatprep.subr.bf16.mxu1 %v5278_v31  ;;  %v5310_v57 = vld [vmem:[#allocation8 + $0x384] ss:$16 sps:$4 sm:$0xff]   ;;  %v5313_v60 = vld [vmem:[#allocation8 + $0x380] ss:$16 sps:$4 sm:$0xff]   ;;  %v5359_v30 = vld [vmem:[#allocation8 + $0x88] ss:$16 sps:$4 sm:$0xff]  }
  0xbe   : > { %2099 = vmatprep.subr.bf16.mxu0 %v5280_v32  ;;  %2074 = vmatprep.mubr.bf16.mxu1 %v4500_v56  ;;  %v5314_v61 = vld [vmem:[#allocation8 + $0x1a4] ss:$16 sps:$4 sm:$0xff]   ;;  %v5318_v63 = vld [vmem:[#allocation8 + $0x1a0] ss:$16 sps:$4 sm:$0xff]   ;;  %v5367_v32 = vld [vmem:[#allocation8 + $0xac] ss:$16 sps:$4 sm:$0xff]  }
  0xbf   : > { %v5316_v62 = vld [vmem:[#allocation8 + $0x3a4] ss:$16 sps:$4 sm:$0xff]   ;;  %v5319_v0 = vld [vmem:[#allocation8 + $0x3a0] ss:$16 sps:$4 sm:$0xff]  }
  0xc0   : > { %2057 = vmatpush1.bf16.msra.mxu1 %v5282_v33  ;;  %v5320_v1 = vld [vmem:[#allocation8 + $0x1c4] ss:$16 sps:$4 sm:$0xff]   ;;  %v5324_v3 = vld [vmem:[#allocation8 + $0x1c0] ss:$16 sps:$4 sm:$0xff]  }
  0xc1   : > { %2100 = vmatpush1.bf16.msra.mxu0 %v5283_v34  ;;  %2058 = vmatprep.subr.bf16.mxu1 %v5284_v35  ;;  %v5322_v2 = vld [vmem:[#allocation8 + $0x3c4] ss:$16 sps:$4 sm:$0xff]   ;;  %v5325_v4 = vld [vmem:[#allocation8 + $0x3c0] ss:$16 sps:$4 sm:$0xff]   ;;  %v5365_v34 = vld [vmem:[#allocation8 + $0xa8] ss:$16 sps:$4 sm:$0xff]  }
  0xc2   : > { %2101 = vmatprep.subr.bf16.mxu0 %v5286_v36  ;;  %v5326_v5 = vld [vmem:[#allocation8 + $0x1e4] ss:$16 sps:$4 sm:$0xff]   ;;  %v5330_v7 = vld [vmem:[#allocation8 + $0x1e0] ss:$16 sps:$4 sm:$0xff]   ;;  %v5373_v36 = vld [vmem:[#allocation8 + $0xcc] ss:$16 sps:$4 sm:$0xff]  }
  0xc3   : > { %v5328_v6 = vld [vmem:[#allocation8 + $0x3e4] ss:$16 sps:$4 sm:$0xff]   ;;  %v5331_v8 = vld [vmem:[#allocation8 + $0x3e0] ss:$16 sps:$4 sm:$0xff]  }
  0xc4   : > { %2059 = vmatpush1.bf16.msra.mxu1 %v5288_v37  ;;  %v5334_v9 = vld [vmem:[#allocation8 + $0x404] ss:$16 sps:$4 sm:$0xff]   ;;  %v5332_v13 = vld [vmem:[#allocation8 + $0x400] ss:$16 sps:$4 sm:$0xff]  }
  0xc5   : > { %2102 = vmatpush1.bf16.msra.mxu0 %v5289_v38  ;;  %2060 = vmatprep.subr.bf16.mxu1 %v5290_v39  ;;  %v5340_v15 = vld [vmem:[#allocation8 + $0x424] ss:$16 sps:$4 sm:$0xff]   ;;  %v5338_v17 = vld [vmem:[#allocation8 + $0x420] ss:$16 sps:$4 sm:$0xff]  }
  0xc6   : > { %2103 = vmatprep.subr.bf16.mxu0 %v5292_v40  ;;  %v5346_v19 = vld [vmem:[#allocation8 + $0x444] ss:$16 sps:$4 sm:$0xff]   ;;  %v5344_v21 = vld [vmem:[#allocation8 + $0x440] ss:$16 sps:$4 sm:$0xff]   ;;  %v5371_v40 = vld [vmem:[#allocation8 + $0xc8] ss:$16 sps:$4 sm:$0xff]  }
  0xc7   : > { %v5352_v23 = vld [vmem:[#allocation8 + $0x464] ss:$16 sps:$4 sm:$0xff]   ;;  %v5350_v25 = vld [vmem:[#allocation8 + $0x460] ss:$16 sps:$4 sm:$0xff]  }
  0xc8   : > { %2061 = vmatpush1.bf16.msra.mxu1 %v5294_v41  ;;  %v5358_v27 = vld [vmem:[#allocation8 + $0x484] ss:$16 sps:$4 sm:$0xff]   ;;  %v5356_v29 = vld [vmem:[#allocation8 + $0x480] ss:$16 sps:$4 sm:$0xff]  }
  0xc9   : > { %2104 = vmatpush1.bf16.msra.mxu0 %v5295_v42  ;;  %2062 = vmatprep.subr.bf16.mxu1 %v5296_v43  ;;  %v5364_v31 = vld [vmem:[#allocation8 + $0x4a4] ss:$16 sps:$4 sm:$0xff]   ;;  %v5362_v33 = vld [vmem:[#allocation8 + $0x4a0] ss:$16 sps:$4 sm:$0xff]   ;;  %v5379_v43 = vld [vmem:[#allocation8 + $0xec] ss:$16 sps:$4 sm:$0xff]  }
  0xca   : > { %2105 = vmatprep.subr.bf16.mxu0 %v5298_v44  ;;  %v5370_v35 = vld [vmem:[#allocation8 + $0x4c4] ss:$16 sps:$4 sm:$0xff]   ;;  %v5368_v39 = vld [vmem:[#allocation8 + $0x4c0] ss:$16 sps:$4 sm:$0xff]  }
  0xcb   : > { %v6547_v37 = vld [vmem:[%s6511_s21 + $0x10] sm:$0xff] }
  0xcc   : > { %2063 = vmatpush1.bf16.msra.mxu1 %v5300_v45  ;;  %v6550_v38 = vld [vmem:[%s6511_s21 + $0x30] sm:$0xff]  ;;  %v5377_v45 = vld [vmem:[#allocation8 + $0xe8] ss:$16 sps:$4 sm:$0xff]  }
  0xcd   : > { %2106 = vmatpush1.bf16.msra.mxu0 %v5301_v46  ;;  %2064 = vmatprep.subr.bf16.mxu1 %v5302_v47  ;;  %v6554_v41 = vcombine.high %v6547_v37, %v6550_v38  ;;  %v5376_v42 = vld [vmem:[#allocation8 + $0x4e4] ss:$16 sps:$4 sm:$0xff]   ;;  %v5374_v44 = vld [vmem:[#allocation8 + $0x4e0] ss:$16 sps:$4 sm:$0xff]   ;;  %v5385_v47 = vld [vmem:[#allocation8 + $0x10c] ss:$16 sps:$4 sm:$0xff]  }
  0xce   : > { %2107 = vmatprep.subr.bf16.mxu0 %v5304_v48  ;;  %v5382_v46 = vld [vmem:[#allocation8 + $0x504] ss:$16 sps:$4 sm:$0xff]   ;;  %v5380_v48 = vld [vmem:[#allocation8 + $0x500] ss:$16 sps:$4 sm:$0xff]  }
  0xcf   : > { %v5386_v52 = vld [vmem:[#allocation8 + $0x520] ss:$16 sps:$4 sm:$0xff]   ;;  %v5394_v54 = vld [vmem:[#allocation8 + $0x544] ss:$16 sps:$4 sm:$0xff]  }
  0xd0   : > { %2065 = vmatpush1.bf16.msra.mxu1 %v5306_v49  ;;  %v5383_v49 = vld [vmem:[#allocation8 + $0x108] ss:$16 sps:$4 sm:$0xff]  }
  0xd1   : > { %2108 = vmatpush1.bf16.msra.mxu0 %v5307_v50  ;;  %2066 = vmatprep.subr.bf16.mxu1 %v5308_v55  ;;  %v5388_v50 = vld [vmem:[#allocation8 + $0x524] ss:$16 sps:$4 sm:$0xff]   ;;  %v5397_v55 = vld [vmem:[#allocation8 + $0x14c] ss:$16 sps:$4 sm:$0xff]  }
  0xd2   : > { %2109 = vmatprep.subr.bf16.mxu0 %v5310_v57  ;;  %v5395_v57 = vld [vmem:[#allocation8 + $0x148] ss:$16 sps:$4 sm:$0xff]  }
  0xd4   : > { %2067 = vmatpush1.bf16.msra.mxu1 %v5312_v59  ;;  %v5400_v59 = vld [vmem:[#allocation8 + $0x564] ss:$16 sps:$4 sm:$0xff]  }
  0xd5   : > { %2110 = vmatpush1.bf16.msra.mxu0 %v5313_v60  ;;  %2068 = vmatprep.subr.bf16.mxu1 %v5314_v61  ;;  %v5403_v60 = vld [vmem:[#allocation8 + $0x16c] ss:$16 sps:$4 sm:$0xff]   ;;  %v5398_v61 = vld [vmem:[#allocation8 + $0x560] ss:$16 sps:$4 sm:$0xff]  }
  0xd6   : > { %2111 = vmatprep.subr.bf16.mxu0 %v5316_v62  ;;  %v5401_v62 = vld [vmem:[#allocation8 + $0x168] ss:$16 sps:$4 sm:$0xff]  }
  0xd8   : > { %2069 = vmatpush1.bf16.msra.mxu1 %v5318_v63  ;;  %v5406_v63 = vld [vmem:[#allocation8 + $0x584] ss:$16 sps:$4 sm:$0xff]  }
  0xd9   : > { %2112 = vmatpush1.bf16.msra.mxu0 %v5319_v0  ;;  %2070 = vmatprep.subr.bf16.mxu1 %v5320_v1  ;;  %v5409_v0 = vld [vmem:[#allocation8 + $0x18c] ss:$16 sps:$4 sm:$0xff]   ;;  %v5404_v1 = vld [vmem:[#allocation8 + $0x580] ss:$16 sps:$4 sm:$0xff]  }
  0xda   : > { %2113 = vmatprep.subr.bf16.mxu0 %v5322_v2  ;;  %v5407_v2 = vld [vmem:[#allocation8 + $0x188] ss:$16 sps:$4 sm:$0xff]  }
  0xdc   : > { %2071 = vmatpush1.bf16.msra.mxu1 %v5324_v3  ;;  %v5412_v3 = vld [vmem:[#allocation8 + $0x5a4] ss:$16 sps:$4 sm:$0xff]  }
  0xdd   : > { %2114 = vmatpush1.bf16.msra.mxu0 %v5325_v4  ;;  %2072 = vmatprep.subr.bf16.mxu1 %v5326_v5  ;;  %v5415_v4 = vld [vmem:[#allocation8 + $0x1ac] ss:$16 sps:$4 sm:$0xff]   ;;  %v5410_v5 = vld [vmem:[#allocation8 + $0x5a0] ss:$16 sps:$4 sm:$0xff]  }
  0xde   : > { %2115 = vmatprep.subr.bf16.mxu0 %v5328_v6  ;;  %v5413_v6 = vld [vmem:[#allocation8 + $0x1a8] ss:$16 sps:$4 sm:$0xff]  }
  0xe0   : > { %2073 = vmatpush1.bf16.msra.mxu1 %v5330_v7  ;;  %v5418_v7 = vld [vmem:[#allocation8 + $0x5c4] ss:$16 sps:$4 sm:$0xff]  }
  0xe1   : > { %2116 = vmatpush1.bf16.msra.mxu0 %v5331_v8  ;;  %2214 = vmatprep.subr.bf16.mxu1 %v5337_v10  ;;  %v5421_v8 = vld [vmem:[#allocation8 + $0x1cc] ss:$16 sps:$4 sm:$0xff]   ;;  %v5419_v10 = vld [vmem:[#allocation8 + $0x1c8] ss:$16 sps:$4 sm:$0xff]  }
  0xe2   : > { %2128 = vmatprep.subr.bf16.mxu0 %v5334_v9  ;;  %v5416_v9 = vld [vmem:[#allocation8 + $0x5c0] ss:$16 sps:$4 sm:$0xff]  }
  0xe3   : > { %2075 = vmatmul.mubr.bf16.vlgmr.msra.gmra.mrb[0].mxu1 %v6540_v11 }
  0xe4   : > { %2118 = vmatmul.mubr.bf16.vlgmr.msra.gmra.mrb[0].mxu0 %v6542_v12  ;;  %2215 = vmatpush1.bf16.msra.mxu1 %v5335_v14  ;;  %v5427_v14 = vld [vmem:[#allocation8 + $0x1ec] ss:$16 sps:$4 sm:$0xff]  }
  0xe5   : > { %2129 = vmatpush1.bf16.msra.mxu0 %v5332_v13  ;;  %2216 = vmatprep.subr.bf16.mxu1 %v5343_v16  ;;  %v5424_v13 = vld [vmem:[#allocation8 + $0x5e4] ss:$16 sps:$4 sm:$0xff]   ;;  %v5425_v16 = vld [vmem:[#allocation8 + $0x1e8] ss:$16 sps:$4 sm:$0xff]  }
  0xe6   : > { %2130 = vmatprep.subr.bf16.mxu0 %v5340_v15  ;;  %2246 = vmatprep.mubr.bf16.mxu1 %v4500_v56  ;;  %v5392_v56 = vld [vmem:[#allocation8 + $0x540] ss:$16 sps:$4 sm:$0xff]  }
  0xe7   : > { %2160 = vmatprep.mubr.bf16.mxu0 %v6554_v41  ;;  %v5422_v15 = vld [vmem:[#allocation8 + $0x5e0] ss:$16 sps:$4 sm:$0xff]  }
  0xe8   : > { %2217 = vmatpush1.bf16.msra.mxu1 %v5341_v18  ;;  %v5433_v18 = vld [vmem:[#allocation8 + $0x20c] ss:$16 sps:$4 sm:$0xff]  }
  0xe9   : > { %2131 = vmatpush1.bf16.msra.mxu0 %v5338_v17  ;;  %2218 = vmatprep.subr.bf16.mxu1 %v5349_v20  ;;  %v5430_v17 = vld [vmem:[#allocation8 + $0x604] ss:$16 sps:$4 sm:$0xff]   ;;  %v5428_v20 = vld [vmem:[#allocation8 + $0x600] ss:$16 sps:$4 sm:$0xff]  }
  0xea   : > { %2132 = vmatprep.subr.bf16.mxu0 %v5346_v19  ;;  %v6559_v19 = vcombine.low %v6547_v37, %v6550_v38  ;;  %v5457_v37 = vld [vmem:[#allocation8 + $0x28c] ss:$16 sps:$4 sm:$0xff]   ;;  %v5452_v38 = vld [vmem:[#allocation8 + $0x680] ss:$16 sps:$4 sm:$0xff]  }
  0xec   : > { %2219 = vmatpush1.bf16.msra.mxu1 %v5347_v22  ;;  %v5436_v22 = vld [vmem:[#allocation8 + $0x624] ss:$16 sps:$4 sm:$0xff]  }
  0xed   : > { %2133 = vmatpush1.bf16.msra.mxu0 %v5344_v21  ;;  %2220 = vmatprep.subr.bf16.mxu1 %v5355_v24  ;;  %v5431_v21 = vld [vmem:[#allocation8 + $0x208] ss:$16 sps:$4 sm:$0xff]  }
  0xee   : > { %2134 = vmatprep.subr.bf16.mxu0 %v5352_v23  ;;  %v5439_v23 = vld [vmem:[#allocation8 + $0x22c] ss:$16 sps:$4 sm:$0xff]  }
  0xef   : > { %v6562_v24 = vld [vmem:[%s6511_s21 + $0x18] sm:$0xff] }
  0xf0   : > { %2221 = vmatpush1.bf16.msra.mxu1 %v5353_v26  ;;  %v5434_v26 = vld [vmem:[#allocation8 + $0x620] ss:$16 sps:$4 sm:$0xff]  }
  0xf1   : > { %2135 = vmatpush1.bf16.msra.mxu0 %v5350_v25  ;;  %2222 = vmatprep.subr.bf16.mxu1 %v5361_v28  ;;  %v6565_v25 = vld [vmem:[%s6511_s21 + $0x38] sm:$0xff] }
  0xf2   : > { %2136 = vmatprep.subr.bf16.mxu0 %v5358_v27  ;;  %v5437_v27 = vld [vmem:[#allocation8 + $0x228] ss:$16 sps:$4 sm:$0xff]   ;;  %v6571_v28 = vcombine.high %v6562_v24, %v6565_v25 }
  0xf4   : > { %2223 = vmatpush1.bf16.msra.mxu1 %v5359_v30  ;;  %v5445_v30 = vld [vmem:[#allocation8 + $0x24c] ss:$16 sps:$4 sm:$0xff]  }
  0xf5   : > { %2137 = vmatpush1.bf16.msra.mxu0 %v5356_v29  ;;  %2224 = vmatprep.subr.bf16.mxu1 %v5367_v32  ;;  %v5442_v29 = vld [vmem:[#allocation8 + $0x644] ss:$16 sps:$4 sm:$0xff]   ;;  %v5443_v32 = vld [vmem:[#allocation8 + $0x248] ss:$16 sps:$4 sm:$0xff]  }
  0xf6   : > { %2138 = vmatprep.subr.bf16.mxu0 %v5364_v31  ;;  %v5440_v31 = vld [vmem:[#allocation8 + $0x640] ss:$16 sps:$4 sm:$0xff]  }
  0xf8   : > { %2225 = vmatpush1.bf16.msra.mxu1 %v5365_v34  ;;  %v5446_v34 = vld [vmem:[#allocation8 + $0x660] ss:$16 sps:$4 sm:$0xff]  }
  0xf9   : > { %2139 = vmatpush1.bf16.msra.mxu0 %v5362_v33  ;;  %2226 = vmatprep.subr.bf16.mxu1 %v5373_v36  ;;  %v5451_v33 = vld [vmem:[#allocation8 + $0x26c] ss:$16 sps:$4 sm:$0xff]   ;;  %v5454_v36 = vld [vmem:[#allocation8 + $0x684] ss:$16 sps:$4 sm:$0xff]  }
  0xfa   : > { %2140 = vmatprep.subr.bf16.mxu0 %v5370_v35  ;;  %v5449_v35 = vld [vmem:[#allocation8 + $0x268] ss:$16 sps:$4 sm:$0xff]  }
  0xfc   : > { %2227 = vmatpush1.bf16.msra.mxu1 %v5371_v40  ;;  %v5463_v40 = vld [vmem:[#allocation8 + $0x2ac] ss:$16 sps:$4 sm:$0xff]  }
  0xfd   : > { %2141 = vmatpush1.bf16.msra.mxu0 %v5368_v39  ;;  %2228 = vmatprep.subr.bf16.mxu1 %v5379_v43  ;;  %v5455_v39 = vld [vmem:[#allocation8 + $0x288] ss:$16 sps:$4 sm:$0xff]  }
  0xfe   : > { %2142 = vmatprep.subr.bf16.mxu0 %v5376_v42  ;;  %v5458_v42 = vld [vmem:[#allocation8 + $0x6a0] ss:$16 sps:$4 sm:$0xff]   ;;  %v5461_v43 = vld [vmem:[#allocation8 + $0x2a8] ss:$16 sps:$4 sm:$0xff]  }
 0x100   : > { %2229 = vmatpush1.bf16.msra.mxu1 %v5377_v45  ;;  %v5469_v45 = vld [vmem:[#allocation8 + $0x2cc] ss:$16 sps:$4 sm:$0xff]  }
 0x101   : > { %2143 = vmatpush1.bf16.msra.mxu0 %v5374_v44  ;;  %2230 = vmatprep.subr.bf16.mxu1 %v5385_v47  ;;  %v5466_v44 = vld [vmem:[#allocation8 + $0x6c4] ss:$16 sps:$4 sm:$0xff]   ;;  %v5467_v47 = vld [vmem:[#allocation8 + $0x2c8] ss:$16 sps:$4 sm:$0xff]  }
 0x102   : > { %2144 = vmatprep.subr.bf16.mxu0 %v5382_v46  ;;  %v5464_v46 = vld [vmem:[#allocation8 + $0x6c0] ss:$16 sps:$4 sm:$0xff]  }
 0x104   : > { %2231 = vmatpush1.bf16.msra.mxu1 %v5383_v49  ;;  %v5475_v49 = vld [vmem:[#allocation8 + $0x2ec] ss:$16 sps:$4 sm:$0xff]  }
 0x105   : > { %2145 = vmatpush1.bf16.msra.mxu0 %v5380_v48  ;;  %2232 = vmatprep.subr.bf16.mxu1 %v5391_v51  ;;  %v5472_v48 = vld [vmem:[#allocation8 + $0x6e4] ss:$16 sps:$4 sm:$0xff]   ;;  %v5473_v51 = vld [vmem:[#allocation8 + $0x2e8] ss:$16 sps:$4 sm:$0xff]  }
 0x106   : > { %2146 = vmatprep.subr.bf16.mxu0 %v5388_v50  ;;  %v5470_v50 = vld [vmem:[#allocation8 + $0x6e0] ss:$16 sps:$4 sm:$0xff]  }
 0x108   : > { %2233 = vmatpush1.bf16.msra.mxu1 %v5389_v53  ;;  %v5481_v53 = vld [vmem:[#allocation8 + $0x30c] ss:$16 sps:$4 sm:$0xff]  }
 0x109   : > { %2147 = vmatpush1.bf16.msra.mxu0 %v5386_v52  ;;  %2234 = vmatprep.subr.bf16.mxu1 %v5397_v55  ;;  %v5478_v52 = vld [vmem:[#allocation8 + $0x704] ss:$16 sps:$4 sm:$0xff]   ;;  %v5479_v55 = vld [vmem:[#allocation8 + $0x308] ss:$16 sps:$4 sm:$0xff]  }
 0x10a   : > { %2148 = vmatprep.subr.bf16.mxu0 %v5394_v54  ;;  %v5476_v54 = vld [vmem:[#allocation8 + $0x700] ss:$16 sps:$4 sm:$0xff]  }
 0x10c   : > { %2235 = vmatpush1.bf16.msra.mxu1 %v5395_v57  ;;  %v5487_v57 = vld [vmem:[#allocation8 + $0x32c] ss:$16 sps:$4 sm:$0xff]  }
 0x10d   : > { %2149 = vmatpush1.bf16.msra.mxu0 %v5392_v56  ;;  %2236 = vmatprep.subr.bf16.mxu1 %v5403_v60  ;;  %v5484_v56 = vld [vmem:[#allocation8 + $0x724] ss:$16 sps:$4 sm:$0xff]   ;;  %v5485_v60 = vld [vmem:[#allocation8 + $0x328] ss:$16 sps:$4 sm:$0xff]  }
 0x10e   : > { %2150 = vmatprep.subr.bf16.mxu0 %v5400_v59  ;;  %v5482_v59 = vld [vmem:[#allocation8 + $0x720] ss:$16 sps:$4 sm:$0xff]  }
 0x110   : > { %2237 = vmatpush1.bf16.msra.mxu1 %v5401_v62  ;;  %v5493_v62 = vld [vmem:[#allocation8 + $0x34c] ss:$16 sps:$4 sm:$0xff]  }
 0x111   : > { %2151 = vmatpush1.bf16.msra.mxu0 %v5398_v61  ;;  %2238 = vmatprep.subr.bf16.mxu1 %v5409_v0  ;;  %v5490_v61 = vld [vmem:[#allocation8 + $0x744] ss:$16 sps:$4 sm:$0xff]   ;;  %v5491_v0 = vld [vmem:[#allocation8 + $0x348] ss:$16 sps:$4 sm:$0xff]  }
 0x112   : > { %2152 = vmatprep.subr.bf16.mxu0 %v5406_v63  ;;  %v5488_v63 = vld [vmem:[#allocation8 + $0x740] ss:$16 sps:$4 sm:$0xff]  }
 0x114   : > { %2239 = vmatpush1.bf16.msra.mxu1 %v5407_v2  ;;  %v5499_v2 = vld [vmem:[#allocation8 + $0x36c] ss:$16 sps:$4 sm:$0xff]  }
 0x115   : > { %2153 = vmatpush1.bf16.msra.mxu0 %v5404_v1  ;;  %2240 = vmatprep.subr.bf16.mxu1 %v5415_v4  ;;  %v5496_v1 = vld [vmem:[#allocation8 + $0x764] ss:$16 sps:$4 sm:$0xff]   ;;  %v5497_v4 = vld [vmem:[#allocation8 + $0x368] ss:$16 sps:$4 sm:$0xff]  }
 0x116   : > { %2154 = vmatprep.subr.bf16.mxu0 %v5412_v3  ;;  %v5494_v3 = vld [vmem:[#allocation8 + $0x760] ss:$16 sps:$4 sm:$0xff]  }
 0x118   : > { %2241 = vmatpush1.bf16.msra.mxu1 %v5413_v6  ;;  %v5505_v6 = vld [vmem:[#allocation8 + $0x38c] ss:$16 sps:$4 sm:$0xff]  }
 0x119   : > { %2155 = vmatpush1.bf16.msra.mxu0 %v5410_v5  ;;  %2242 = vmatprep.subr.bf16.mxu1 %v5421_v8  ;;  %v5502_v5 = vld [vmem:[#allocation8 + $0x784] ss:$16 sps:$4 sm:$0xff]   ;;  %v5503_v8 = vld [vmem:[#allocation8 + $0x388] ss:$16 sps:$4 sm:$0xff]  }
 0x11a   : > { %2156 = vmatprep.subr.bf16.mxu0 %v5418_v7  ;;  %v5500_v7 = vld [vmem:[#allocation8 + $0x780] ss:$16 sps:$4 sm:$0xff]  }
 0x11c   : > { %2243 = vmatpush1.bf16.msra.mxu1 %v5419_v10  ;;  %v5511_v10 = vld [vmem:[#allocation8 + $0x3ac] ss:$16 sps:$4 sm:$0xff]  }
 0x11d   : > { %2157 = vmatpush1.bf16.msra.mxu0 %v5416_v9  ;;  %2244 = vmatprep.subr.bf16.mxu1 %v5427_v14  ;;  %v5508_v9 = vld [vmem:[#allocation8 + $0x7a4] ss:$16 sps:$4 sm:$0xff]   ;;  %v5509_v14 = vld [vmem:[#allocation8 + $0x3a8] ss:$16 sps:$4 sm:$0xff]  }
 0x11e   : > { %2158 = vmatprep.subr.bf16.mxu0 %v5424_v13  ;;  %v5506_v13 = vld [vmem:[#allocation8 + $0x7a0] ss:$16 sps:$4 sm:$0xff]  }
 0x120   : > { %2245 = vmatpush1.bf16.msra.mxu1 %v5425_v16  ;;  %v5517_v16 = vld [vmem:[#allocation8 + $0x3cc] ss:$16 sps:$4 sm:$0xff]  }
 0x121   : > { %2159 = vmatpush1.bf16.msra.mxu0 %v5422_v15  ;;  %2257 = vmatprep.subr.bf16.mxu1 %v5433_v18  ;;  %v5514_v15 = vld [vmem:[#allocation8 + $0x7c4] ss:$16 sps:$4 sm:$0xff]   ;;  %v5515_v18 = vld [vmem:[#allocation8 + $0x3c8] ss:$16 sps:$4 sm:$0xff]  }
 0x122   : > { %2171 = vmatprep.subr.bf16.mxu0 %v5430_v17  ;;  %v5512_v17 = vld [vmem:[#allocation8 + $0x7c0] ss:$16 sps:$4 sm:$0xff]  }
 0x123   : > { %2247 = vmatmul.mubr.bf16.vlgmr.msra.gmra.mrb[4].mxu1 %v6540_v11  ;;  %v5448_v11 = vld [vmem:[#allocation8 + $0x664] ss:$16 sps:$4 sm:$0xff]  }
 0x124   : > { %2161 = vmatmul.mubr.bf16.vlgmr.msra.gmra.mrb[0].mxu0 %v6559_v19  ;;  %2258 = vmatpush1.bf16.msra.mxu1 %v5431_v21  ;;  %v5523_v21 = vld [vmem:[#allocation8 + $0x3ec] ss:$16 sps:$4 sm:$0xff]  }
 0x125   : > { %2172 = vmatpush1.bf16.msra.mxu0 %v5428_v20  ;;  %2259 = vmatprep.subr.bf16.mxu1 %v5439_v23  ;;  %v5520_v20 = vld [vmem:[#allocation8 + $0x7e4] ss:$16 sps:$4 sm:$0xff]   ;;  %v5521_v23 = vld [vmem:[#allocation8 + $0x3e8] ss:$16 sps:$4 sm:$0xff]  }
 0x126   : > { %2173 = vmatprep.subr.bf16.mxu0 %v5436_v22  ;;  %2203 = vmatprep.mubr.bf16.mxu0 %v6571_v28  ;;  %v5518_v22 = vld [vmem:[#allocation8 + $0x7e0] ss:$16 sps:$4 sm:$0xff]  }
 0x127   : > { %2289 = vmatprep.mubr.bf16.mxu1 %v6537_v58  ;;  %v5460_v58 = vld [vmem:[#allocation8 + $0x6a4] ss:$16 sps:$4 sm:$0xff]  }
 0x128   : > { %2260 = vmatpush1.bf16.msra.mxu1 %v5437_v27  ;;  %v5524_v27 = vld [vmem:[#allocation8 + $0x408] ss:$16 sps:$4 sm:$0xff]  }
 0x129   : > { %2174 = vmatpush1.bf16.msra.mxu0 %v5434_v26  ;;  %2261 = vmatprep.subr.bf16.mxu1 %v5445_v30  ;;  %v5526_v26 = vld [vmem:[#allocation8 + $0x40c] ss:$16 sps:$4 sm:$0xff]  }
 0x12a   : > { %2175 = vmatprep.subr.bf16.mxu0 %v5442_v29  ;;  %v6577_v29 = vcombine.low %v6562_v24, %v6565_v25  ;;  %v5529_v30 = vld [vmem:[#allocation8 + $0x42c] ss:$16 sps:$4 sm:$0xff]   ;;  %v5626_v24 = vld [vmem:[#allocation10 + $0x30] ss:$24 sps:$4 sm:$0xff]  }
 0x12b   : > { %v5530_v25 = vld [vmem:[#allocation8 + $0x448] ss:$16 sps:$4 sm:$0xff]  }
 0x12c   : > { %2262 = vmatpush1.bf16.msra.mxu1 %v5443_v32  ;;  %v5622_v32 = vld [vmem:[#allocation10 + $0x4] ss:$24 sps:$4 sm:$0xff]  }
 0x12d   : > { %2176 = vmatpush1.bf16.msra.mxu0 %v5440_v31  ;;  %2263 = vmatprep.subr.bf16.mxu1 %v5451_v33  ;;  %v5620_v31 = vld [vmem:[#allocation10] ss:$24 sps:$4 sm:$0xff]   ;;  %v5628_v33 = vld [vmem:[#allocation10 + $0x34] ss:$24 sps:$4 sm:$0xff]  }
 0x12e   : > { %2177 = vmatprep.subr.bf16.mxu0 %v5448_v11  ;;  %v5527_v11 = vld [vmem:[#allocation8 + $0x428] ss:$16 sps:$4 sm:$0xff]  }
 0x130   : > { %2264 = vmatpush1.bf16.msra.mxu1 %v5449_v35  ;;  %v5535_v35 = vld [vmem:[#allocation8 + $0x46c] ss:$16 sps:$4 sm:$0xff]  }
 0x131   : > { %2178 = vmatpush1.bf16.msra.mxu0 %v5446_v34  ;;  %2265 = vmatprep.subr.bf16.mxu1 %v5457_v37  ;;  %v5532_v34 = vld [vmem:[#allocation8 + $0x44c] ss:$16 sps:$4 sm:$0xff]   ;;  %v5632_v37 = vld [vmem:[#allocation10 + $0x60] ss:$24 sps:$4 sm:$0xff]  }
 0x132   : > { %2179 = vmatprep.subr.bf16.mxu0 %v5454_v36  ;;  %v5634_v36 = vld [vmem:[#allocation10 + $0x64] ss:$24 sps:$4 sm:$0xff]  }
 0x134   : > { %2266 = vmatpush1.bf16.msra.mxu1 %v5455_v39  ;;  %v5640_v39 = vld [vmem:[#allocation10 + $0x94] ss:$24 sps:$4 sm:$0xff]  }
 0x135   : > { %2180 = vmatpush1.bf16.msra.mxu0 %v5452_v38  ;;  %2267 = vmatprep.subr.bf16.mxu1 %v5463_v40  ;;  %v5538_v38 = vld [vmem:[#allocation8 + $0x48c] ss:$16 sps:$4 sm:$0xff]  }
 0x136   : > { %2181 = vmatprep.subr.bf16.mxu0 %v5460_v58  ;;  %v5536_v58 = vld [vmem:[#allocation8 + $0x488] ss:$16 sps:$4 sm:$0xff]   ;;  %v5541_v40 = vld [vmem:[#allocation8 + $0x4ac] ss:$16 sps:$4 sm:$0xff]  }
 0x138   : > { %2268 = vmatpush1.bf16.msra.mxu1 %v5461_v43  ;;  %v5644_v43 = vld [vmem:[#allocation10 + $0xc0] ss:$24 sps:$4 sm:$0xff]  }
 0x139   : > { %2182 = vmatpush1.bf16.msra.mxu0 %v5458_v42  ;;  %2269 = vmatprep.subr.bf16.mxu1 %v5469_v45  ;;  %v5646_v42 = vld [vmem:[#allocation10 + $0xc4] ss:$24 sps:$4 sm:$0xff]  }
 0x13a   : > { %2183 = vmatprep.subr.bf16.mxu0 %v5466_v44  ;;  %v5539_v44 = vld [vmem:[#allocation8 + $0x4a8] ss:$16 sps:$4 sm:$0xff]   ;;  %v5544_v45 = vld [vmem:[#allocation8 + $0x4cc] ss:$16 sps:$4 sm:$0xff]  }
 0x13c   : > { %2270 = vmatpush1.bf16.msra.mxu1 %v5467_v47  ;;  %v5650_v47 = vld [vmem:[#allocation10 + $0xf0] ss:$24 sps:$4 sm:$0xff]  }
 0x13d   : > { %2184 = vmatpush1.bf16.msra.mxu0 %v5464_v46  ;;  %2271 = vmatprep.subr.bf16.mxu1 %v5475_v49  ;;  %v5652_v46 = vld [vmem:[#allocation10 + $0xf4] ss:$24 sps:$4 sm:$0xff]  }
 0x13e   : > { %2185 = vmatprep.subr.bf16.mxu0 %v5472_v48  ;;  %v5542_v48 = vld [vmem:[#allocation8 + $0x4c8] ss:$16 sps:$4 sm:$0xff]   ;;  %v5547_v49 = vld [vmem:[#allocation8 + $0x4ec] ss:$16 sps:$4 sm:$0xff]  }
 0x140   : > { %2272 = vmatpush1.bf16.msra.mxu1 %v5473_v51  ;;  %v5656_v51 = vld [vmem:[#allocation10 + $0x120] ss:$24 sps:$4 sm:$0xff]  }
 0x141   : > { %2186 = vmatpush1.bf16.msra.mxu0 %v5470_v50  ;;  %2273 = vmatprep.subr.bf16.mxu1 %v5481_v53  ;;  %v5658_v50 = vld [vmem:[#allocation10 + $0x124] ss:$24 sps:$4 sm:$0xff]  }
 0x142   : > { %2187 = vmatprep.subr.bf16.mxu0 %v5478_v52  ;;  %v5545_v52 = vld [vmem:[#allocation8 + $0x4e8] ss:$16 sps:$4 sm:$0xff]   ;;  %v5550_v53 = vld [vmem:[#allocation8 + $0x50c] ss:$16 sps:$4 sm:$0xff]  }
 0x144   : > { %2274 = vmatpush1.bf16.msra.mxu1 %v5479_v55  ;;  %v5662_v55 = vld [vmem:[#allocation10 + $0x150] ss:$24 sps:$4 sm:$0xff]  }
 0x145   : > { %2188 = vmatpush1.bf16.msra.mxu0 %v5476_v54  ;;  %2275 = vmatprep.subr.bf16.mxu1 %v5487_v57  ;;  %v5664_v54 = vld [vmem:[#allocation10 + $0x154] ss:$24 sps:$4 sm:$0xff]  }
 0x146   : > { %2189 = vmatprep.subr.bf16.mxu0 %v5484_v56  ;;  %v5548_v56 = vld [vmem:[#allocation8 + $0x508] ss:$16 sps:$4 sm:$0xff]   ;;  %v5553_v57 = vld [vmem:[#allocation8 + $0x52c] ss:$16 sps:$4 sm:$0xff]  }
 0x148   : > { %2276 = vmatpush1.bf16.msra.mxu1 %v5485_v60  ;;  %v5668_v60 = vld [vmem:[#allocation10 + $0x180] ss:$24 sps:$4 sm:$0xff]  }
 0x149   : > { %2190 = vmatpush1.bf16.msra.mxu0 %v5482_v59  ;;  %2277 = vmatprep.subr.bf16.mxu1 %v5493_v62  ;;  %v5670_v59 = vld [vmem:[#allocation10 + $0x184] ss:$24 sps:$4 sm:$0xff]  }
 0x14a   : > { %2191 = vmatprep.subr.bf16.mxu0 %v5490_v61  ;;  %v5551_v61 = vld [vmem:[#allocation8 + $0x528] ss:$16 sps:$4 sm:$0xff]   ;;  %v5556_v62 = vld [vmem:[#allocation8 + $0x54c] ss:$16 sps:$4 sm:$0xff]  }
 0x14c   : > { %2278 = vmatpush1.bf16.msra.mxu1 %v5491_v0  ;;  %v5674_v0 = vld [vmem:[#allocation10 + $0x1b0] ss:$24 sps:$4 sm:$0xff]  }
 0x14d   : > { %2192 = vmatpush1.bf16.msra.mxu0 %v5488_v63  ;;  %2279 = vmatprep.subr.bf16.mxu1 %v5499_v2  ;;  %v5676_v63 = vld [vmem:[#allocation10 + $0x1b4] ss:$24 sps:$4 sm:$0xff]  }
 0x14e   : > { %2193 = vmatprep.subr.bf16.mxu0 %v5496_v1  ;;  %v5554_v1 = vld [vmem:[#allocation8 + $0x548] ss:$16 sps:$4 sm:$0xff]   ;;  %v5559_v2 = vld [vmem:[#allocation8 + $0x56c] ss:$16 sps:$4 sm:$0xff]  }
 0x150   : > { %2280 = vmatpush1.bf16.msra.mxu1 %v5497_v4  ;;  %v5680_v4 = vld [vmem:[#allocation10 + $0x1e0] ss:$24 sps:$4 sm:$0xff]  }
 0x151   : > { %2194 = vmatpush1.bf16.msra.mxu0 %v5494_v3  ;;  %2281 = vmatprep.subr.bf16.mxu1 %v5505_v6  ;;  %v5682_v3 = vld [vmem:[#allocation10 + $0x1e4] ss:$24 sps:$4 sm:$0xff]  }
 0x152   : > { %2195 = vmatprep.subr.bf16.mxu0 %v5502_v5  ;;  %v5557_v5 = vld [vmem:[#allocation8 + $0x568] ss:$16 sps:$4 sm:$0xff]   ;;  %v5562_v6 = vld [vmem:[#allocation8 + $0x58c] ss:$16 sps:$4 sm:$0xff]  }
 0x154   : > { %2282 = vmatpush1.bf16.msra.mxu1 %v5503_v8  ;;  %v5686_v8 = vld [vmem:[#allocation10 + $0x210] ss:$24 sps:$4 sm:$0xff]  }
 0x155   : > { %2196 = vmatpush1.bf16.msra.mxu0 %v5500_v7  ;;  %2283 = vmatprep.subr.bf16.mxu1 %v5511_v10  ;;  %v5688_v7 = vld [vmem:[#allocation10 + $0x214] ss:$24 sps:$4 sm:$0xff]  }
 0x156   : > { %2197 = vmatprep.subr.bf16.mxu0 %v5508_v9  ;;  %v5560_v9 = vld [vmem:[#allocation8 + $0x588] ss:$16 sps:$4 sm:$0xff]   ;;  %v5565_v10 = vld [vmem:[#allocation8 + $0x5ac] ss:$16 sps:$4 sm:$0xff]  }
 0x158   : > { %2284 = vmatpush1.bf16.msra.mxu1 %v5509_v14  ;;  %v5692_v14 = vld [vmem:[#allocation10 + $0x240] ss:$24 sps:$4 sm:$0xff]  }
 0x159   : > { %2198 = vmatpush1.bf16.msra.mxu0 %v5506_v13  ;;  %2285 = vmatprep.subr.bf16.mxu1 %v5517_v16  ;;  %v5694_v13 = vld [vmem:[#allocation10 + $0x244] ss:$24 sps:$4 sm:$0xff]  }
 0x15a   : > { %2199 = vmatprep.subr.bf16.mxu0 %v5514_v15  ;;  %v5563_v15 = vld [vmem:[#allocation8 + $0x5a8] ss:$16 sps:$4 sm:$0xff]   ;;  %v5568_v16 = vld [vmem:[#allocation8 + $0x5cc] ss:$16 sps:$4 sm:$0xff]  }
 0x15c   : > { %2286 = vmatpush1.bf16.msra.mxu1 %v5515_v18  ;;  %v5698_v18 = vld [vmem:[#allocation10 + $0x270] ss:$24 sps:$4 sm:$0xff]  }
 0x15d   : > { %2200 = vmatpush1.bf16.msra.mxu0 %v5512_v17  ;;  %2287 = vmatprep.subr.bf16.mxu1 %v5523_v21  ;;  %v5700_v17 = vld [vmem:[#allocation10 + $0x274] ss:$24 sps:$4 sm:$0xff]  }
 0x15e   : > { %2201 = vmatprep.subr.bf16.mxu0 %v5520_v20  ;;  %v5566_v20 = vld [vmem:[#allocation8 + $0x5c8] ss:$16 sps:$4 sm:$0xff]   ;;  %v5571_v21 = vld [vmem:[#allocation8 + $0x5ec] ss:$16 sps:$4 sm:$0xff]  }
 0x160   : > { %2288 = vmatpush1.bf16.msra.mxu1 %v5521_v23  ;;  %v5574_v23 = vld [vmem:[#allocation8 + $0x60c] ss:$16 sps:$4 sm:$0xff]  }
 0x161   : > { %2202 = vmatpush1.bf16.msra.mxu0 %v5518_v22  ;;  %2300 = vmatprep.subr.bf16.mxu1 %v5526_v26  ;;  %v5569_v22 = vld [vmem:[#allocation8 + $0x5e8] ss:$16 sps:$4 sm:$0xff]  }
 0x162   : > { %3594 = vmatprep.subr.bf16.mxu0 %v5622_v32  ;;  %v5572_v26 = vld [vmem:[#allocation8 + $0x608] ss:$16 sps:$4 sm:$0xff]  }
 0x163   : > { %2290 = vmatmul.mubr.bf16.vlgmr.msra.gmra.mrb[4].mxu1 %v6542_v12  ;;  %v5533_v12 = vld [vmem:[#allocation8 + $0x468] ss:$16 sps:$4 sm:$0xff]  }
 0x164   : > { %2204 = vmatmul.mubr.bf16.vlgmr.msra.gmra.mrb[0].mxu0 %v6577_v29  ;;  %2301 = vmatpush1.bf16.msra.mxu1 %v5524_v27  ;;  %v5577_v27 = vld [vmem:[#allocation8 + $0x62c] ss:$16 sps:$4 sm:$0xff]   ;;  %v5578_v32 = vld [vmem:[#allocation8 + $0x648] ss:$16 sps:$4 sm:$0xff]  }
 0x165   : > { %2332 = vmatprep.mubr.bf16.mxu1 %v6554_v41  ;;  %2302 = vmatprep.subr.bf16.mxu1 %v5529_v30  ;;  %v5638_v41 = vld [vmem:[#allocation10 + $0x90] ss:$24 sps:$4 sm:$0xff]  }
 0x166   : > { %3595 = vmatpush1.bf16.msra.mxu0 %v5620_v31  ;;  %v5575_v30 = vld [vmem:[#allocation8 + $0x628] ss:$16 sps:$4 sm:$0xff]   ;;  %v5580_v31 = vld [vmem:[#allocation8 + $0x64c] ss:$16 sps:$4 sm:$0xff]  }
 0x167   : > { %3596 = vmatprep.subr.bf16.mxu0 %v5628_v33  ;;  %v5581_v33 = vld [vmem:[#allocation8 + $0x668] ss:$16 sps:$4 sm:$0xff]  }
 0x168   : > { %2303 = vmatpush1.bf16.msra.mxu1 %v5527_v11  ;;  %v5583_v11 = vld [vmem:[#allocation8 + $0x66c] ss:$16 sps:$4 sm:$0xff]  }
 0x169   : > { %2304 = vmatprep.subr.bf16.mxu1 %v5532_v34  ;;  %v5586_v34 = vld [vmem:[#allocation8 + $0x68c] ss:$16 sps:$4 sm:$0xff]  }
 0x16a   : > { %3597 = vmatpush1.bf16.msra.mxu0 %v5626_v24  ;;  %v5584_v24 = vld [vmem:[#allocation8 + $0x688] ss:$16 sps:$4 sm:$0xff]  }
 0x16b   : > { %3598 = vmatprep.subr.bf16.mxu0 %v5634_v36 }
 0x16c   : > { %2305 = vmatpush1.bf16.msra.mxu1 %v5530_v25  ;;  %v5589_v25 = vld [vmem:[#allocation8 + $0x6ac] ss:$16 sps:$4 sm:$0xff]  }
 0x16d   : > { %2306 = vmatprep.subr.bf16.mxu1 %v5535_v35  ;;  %v5592_v35 = vld [vmem:[#allocation8 + $0x6cc] ss:$16 sps:$4 sm:$0xff]  }
 0x16e   : > { %3599 = vmatpush1.bf16.msra.mxu0 %v5632_v37  ;;  %v5706_v37 = vld [vmem:[#allocation10 + $0x2a4] ss:$24 sps:$4 sm:$0xff]  }
 0x16f   : > { %3600 = vmatprep.subr.bf16.mxu0 %v5640_v39  ;;  %v5704_v39 = vld [vmem:[#allocation10 + $0x2a0] ss:$24 sps:$4 sm:$0xff]  }
 0x170   : > { %2307 = vmatpush1.bf16.msra.mxu1 %v5533_v12 }
 0x171   : > { %2308 = vmatprep.subr.bf16.mxu1 %v5538_v38  ;;  %v5590_v38 = vld [vmem:[#allocation8 + $0x6c8] ss:$16 sps:$4 sm:$0xff]  }
 0x172   : > { %3601 = vmatpush1.bf16.msra.mxu0 %v5638_v41 }
 0x173   : > { %3602 = vmatprep.subr.bf16.mxu0 %v5646_v42  ;;  %v5593_v42 = vld [vmem:[#allocation8 + $0x6e8] ss:$16 sps:$4 sm:$0xff]  }
 0x174   : > { %2309 = vmatpush1.bf16.msra.mxu1 %v5536_v58  ;;  %v5595_v58 = vld [vmem:[#allocation8 + $0x6ec] ss:$16 sps:$4 sm:$0xff]  }
 0x175   : > { %2310 = vmatprep.subr.bf16.mxu1 %v5541_v40  ;;  %v5712_v40 = vld [vmem:[#allocation10 + $0x2d4] ss:$24 sps:$4 sm:$0xff]  }
 0x176   : > { %3603 = vmatpush1.bf16.msra.mxu0 %v5644_v43  ;;  %v5710_v43 = vld [vmem:[#allocation10 + $0x2d0] ss:$24 sps:$4 sm:$0xff]  }
 0x177   : > { %3604 = vmatprep.subr.bf16.mxu0 %v5652_v46  ;;  %v5601_v46 = vld [vmem:[#allocation8 + $0x72c] ss:$16 sps:$4 sm:$0xff]  }
 0x178   : > { %2311 = vmatpush1.bf16.msra.mxu1 %v5539_v44  ;;  %v5598_v44 = vld [vmem:[#allocation8 + $0x70c] ss:$16 sps:$4 sm:$0xff]  }
 0x179   : > { %2312 = vmatprep.subr.bf16.mxu1 %v5544_v45  ;;  %v5596_v45 = vld [vmem:[#allocation8 + $0x708] ss:$16 sps:$4 sm:$0xff]  }
 0x17a   : > { %3605 = vmatpush1.bf16.msra.mxu0 %v5650_v47  ;;  %v5718_v47 = vld [vmem:[#allocation10 + $0x304] ss:$24 sps:$4 sm:$0xff]  }
 0x17b   : > { %3606 = vmatprep.subr.bf16.mxu0 %v5658_v50  ;;  %v5602_v50 = vld [vmem:[#allocation8 + $0x748] ss:$16 sps:$4 sm:$0xff]  }
 0x17c   : > { %2313 = vmatpush1.bf16.msra.mxu1 %v5542_v48  ;;  %v5599_v48 = vld [vmem:[#allocation8 + $0x728] ss:$16 sps:$4 sm:$0xff]  }
 0x17d   : > { %2314 = vmatprep.subr.bf16.mxu1 %v5547_v49  ;;  %v5604_v49 = vld [vmem:[#allocation8 + $0x74c] ss:$16 sps:$4 sm:$0xff]  }
 0x17e   : > { %3607 = vmatpush1.bf16.msra.mxu0 %v5656_v51  ;;  %v5607_v51 = vld [vmem:[#allocation8 + $0x76c] ss:$16 sps:$4 sm:$0xff]  }
 0x17f   : > { %3608 = vmatprep.subr.bf16.mxu0 %v5664_v54  ;;  %v5608_v54 = vld [vmem:[#allocation8 + $0x788] ss:$16 sps:$4 sm:$0xff]  }
 0x180   : > { %2315 = vmatpush1.bf16.msra.mxu1 %v5545_v52  ;;  %v5605_v52 = vld [vmem:[#allocation8 + $0x768] ss:$16 sps:$4 sm:$0xff]  }
 0x181   : > { %2316 = vmatprep.subr.bf16.mxu1 %v5550_v53  ;;  %v5610_v53 = vld [vmem:[#allocation8 + $0x78c] ss:$16 sps:$4 sm:$0xff]  }
 0x182   : > { %3609 = vmatpush1.bf16.msra.mxu0 %v5662_v55  ;;  %v5613_v55 = vld [vmem:[#allocation8 + $0x7ac] ss:$16 sps:$4 sm:$0xff]  }
 0x183   : > { %3610 = vmatprep.subr.bf16.mxu0 %v5670_v59  ;;  %v5614_v59 = vld [vmem:[#allocation8 + $0x7c8] ss:$16 sps:$4 sm:$0xff]  }
 0x184   : > { %2317 = vmatpush1.bf16.msra.mxu1 %v5548_v56  ;;  %v5611_v56 = vld [vmem:[#allocation8 + $0x7a8] ss:$16 sps:$4 sm:$0xff]  }
 0x185   : > { %2318 = vmatprep.subr.bf16.mxu1 %v5553_v57  ;;  %v5616_v57 = vld [vmem:[#allocation8 + $0x7cc] ss:$16 sps:$4 sm:$0xff]  }
 0x186   : > { %3611 = vmatpush1.bf16.msra.mxu0 %v5668_v60  ;;  %v5619_v60 = vld [vmem:[#allocation8 + $0x7ec] ss:$16 sps:$4 sm:$0xff]  }
 0x187   : > { %3612 = vmatprep.subr.bf16.mxu0 %v5676_v63  ;;  %v5623_v63 = vld [vmem:[#allocation10 + $0x8] ss:$24 sps:$4 sm:$0xff]  }
 0x188   : > { %2319 = vmatpush1.bf16.msra.mxu1 %v5551_v61  ;;  %v5617_v61 = vld [vmem:[#allocation8 + $0x7e8] ss:$16 sps:$4 sm:$0xff]  }
 0x189   : > { %2320 = vmatprep.subr.bf16.mxu1 %v5556_v62  ;;  %v5625_v62 = vld [vmem:[#allocation10 + $0xc] ss:$24 sps:$4 sm:$0xff]  }
 0x18a   : > { %3613 = vmatpush1.bf16.msra.mxu0 %v5674_v0  ;;  %v5631_v0 = vld [vmem:[#allocation10 + $0x3c] ss:$24 sps:$4 sm:$0xff]  }
 0x18b   : > { %3614 = vmatprep.subr.bf16.mxu0 %v5682_v3  ;;  %v5635_v3 = vld [vmem:[#allocation10 + $0x68] ss:$24 sps:$4 sm:$0xff]  }
 0x18c   : > { %2321 = vmatpush1.bf16.msra.mxu1 %v5554_v1  ;;  %v5629_v1 = vld [vmem:[#allocation10 + $0x38] ss:$24 sps:$4 sm:$0xff]  }
 0x18d   : > { %2322 = vmatprep.subr.bf16.mxu1 %v5559_v2  ;;  %v5637_v2 = vld [vmem:[#allocation10 + $0x6c] ss:$24 sps:$4 sm:$0xff]  }
 0x18e   : > { %3615 = vmatpush1.bf16.msra.mxu0 %v5680_v4  ;;  %v5643_v4 = vld [vmem:[#allocation10 + $0x9c] ss:$24 sps:$4 sm:$0xff]  }
 0x18f   : > { %3616 = vmatprep.subr.bf16.mxu0 %v5688_v7  ;;  %v5647_v7 = vld [vmem:[#allocation10 + $0xc8] ss:$24 sps:$4 sm:$0xff]  }
 0x190   : > { %2323 = vmatpush1.bf16.msra.mxu1 %v5557_v5  ;;  %v5641_v5 = vld [vmem:[#allocation10 + $0x98] ss:$24 sps:$4 sm:$0xff]  }
 0x191   : > { %2324 = vmatprep.subr.bf16.mxu1 %v5562_v6  ;;  %v5649_v6 = vld [vmem:[#allocation10 + $0xcc] ss:$24 sps:$4 sm:$0xff]  }
 0x192   : > { %3617 = vmatpush1.bf16.msra.mxu0 %v5686_v8  ;;  %v5655_v8 = vld [vmem:[#allocation10 + $0xfc] ss:$24 sps:$4 sm:$0xff]  }
 0x193   : > { %3618 = vmatprep.subr.bf16.mxu0 %v5694_v13  ;;  %v5667_v13 = vld [vmem:[#allocation10 + $0x15c] ss:$24 sps:$4 sm:$0xff]  }
 0x194   : > { %2325 = vmatpush1.bf16.msra.mxu1 %v5560_v9  ;;  %v5653_v9 = vld [vmem:[#allocation10 + $0xf8] ss:$24 sps:$4 sm:$0xff]  }
 0x195   : > { %2326 = vmatprep.subr.bf16.mxu1 %v5565_v10  ;;  %v5659_v10 = vld [vmem:[#allocation10 + $0x128] ss:$24 sps:$4 sm:$0xff]  }
 0x196   : > { %3619 = vmatpush1.bf16.msra.mxu0 %v5692_v14  ;;  %v5665_v14 = vld [vmem:[#allocation10 + $0x158] ss:$24 sps:$4 sm:$0xff]  }
 0x197   : > { %3620 = vmatprep.subr.bf16.mxu0 %v5700_v17  ;;  %v5679_v17 = vld [vmem:[#allocation10 + $0x1bc] ss:$24 sps:$4 sm:$0xff]  }
 0x198   : > { %2327 = vmatpush1.bf16.msra.mxu1 %v5563_v15  ;;  %v5673_v15 = vld [vmem:[#allocation10 + $0x18c] ss:$24 sps:$4 sm:$0xff]  }
 0x199   : > { %2328 = vmatprep.subr.bf16.mxu1 %v5568_v16  ;;  %v5671_v16 = vld [vmem:[#allocation10 + $0x188] ss:$24 sps:$4 sm:$0xff]  }
 0x19a   : > { %3621 = vmatpush1.bf16.msra.mxu0 %v5698_v18  ;;  %v5677_v18 = vld [vmem:[#allocation10 + $0x1b8] ss:$24 sps:$4 sm:$0xff]  }
 0x19b   : > { %3622 = vmatprep.subr.bf16.mxu0 %v5706_v37  ;;  %v6604_v37 = vld [vmem:[%s6878_s2] sm:$0xf] }
 0x19c   : > { %2329 = vmatpush1.bf16.msra.mxu1 %v5566_v20  ;;  %v5685_v20 = vld [vmem:[#allocation10 + $0x1ec] ss:$24 sps:$4 sm:$0xff]  }
 0x19d   : > { %2330 = vmatprep.subr.bf16.mxu1 %v5571_v21  ;;  %v5683_v21 = vld [vmem:[#allocation10 + $0x1e8] ss:$24 sps:$4 sm:$0xff]  }
 0x19e   : > { %3623 = vmatpush1.bf16.msra.mxu0 %v5704_v39 }
 0x19f   : > { %3624 = vmatprep.subr.bf16.mxu0 %v5712_v40 }
 0x1a0   : > { %2331 = vmatpush1.bf16.msra.mxu1 %v5569_v22  ;;  %v5691_v22 = vld [vmem:[#allocation10 + $0x21c] ss:$24 sps:$4 sm:$0xff]  }
 0x1a1   : > { %2343 = vmatprep.subr.bf16.mxu1 %v5574_v23  ;;  %v5689_v23 = vld [vmem:[#allocation10 + $0x218] ss:$24 sps:$4 sm:$0xff]  }
 0x1a2   : > { %3625 = vmatpush1.bf16.msra.mxu0 %v5710_v43 }
 0x1a3   : > { %2333 = vmatmul.mubr.bf16.vlgmr.msra.gmra.mrb[4].mxu1 %v6559_v19  ;;  %v5587_v19 = vld [vmem:[#allocation8 + $0x6a8] ss:$16 sps:$4 sm:$0xff]   ;;  %3637 = vmatprep.subr.bf16.mxu0 %v5718_v47 }
 0x1a4   : > { %2344 = vmatpush1.bf16.msra.mxu1 %v5572_v26  ;;  %2375 = vmatprep.mubr.bf16.mxu1 %v6571_v28  ;;  %v5697_v26 = vld [vmem:[#allocation10 + $0x24c] ss:$24 sps:$4 sm:$0xff]  }
 0x1a5   : > { %2345 = vmatprep.subr.bf16.mxu1 %v5577_v27  ;;  %v5695_v27 = vld [vmem:[#allocation10 + $0x248] ss:$24 sps:$4 sm:$0xff]  }
 0x1a8   : > { %2346 = vmatpush1.bf16.msra.mxu1 %v5575_v30  ;;  %v5703_v30 = vld [vmem:[#allocation10 + $0x27c] ss:$24 sps:$4 sm:$0xff]  }
 0x1a9   : > { %2347 = vmatprep.subr.bf16.mxu1 %v5580_v31  ;;  %v5701_v31 = vld [vmem:[#allocation10 + $0x278] ss:$24 sps:$4 sm:$0xff]  }
 0x1ac   : > { %2348 = vmatpush1.bf16.msra.mxu1 %v5578_v32  ;;  %v5709_v32 = vld [vmem:[#allocation10 + $0x2ac] ss:$24 sps:$4 sm:$0xff]  }
 0x1ad   : > { %2349 = vmatprep.subr.bf16.mxu1 %v5583_v11  ;;  %v5707_v11 = vld [vmem:[#allocation10 + $0x2a8] ss:$24 sps:$4 sm:$0xff]  }
 0x1b0   : > { %2350 = vmatpush1.bf16.msra.mxu1 %v5581_v33  ;;  %v5715_v33 = vld [vmem:[#allocation10 + $0x2dc] ss:$24 sps:$4 sm:$0xff]  }
 0x1b1   : > { %2351 = vmatprep.subr.bf16.mxu1 %v5586_v34  ;;  %v5713_v34 = vld [vmem:[#allocation10 + $0x2d8] ss:$24 sps:$4 sm:$0xff]  }
 0x1b4   : > { %2352 = vmatpush1.bf16.msra.mxu1 %v5584_v24  ;;  %v5721_v24 = vld [vmem:[#allocation10 + $0x30c] ss:$24 sps:$4 sm:$0xff]  }
 0x1b5   : > { %2353 = vmatprep.subr.bf16.mxu1 %v5589_v25  ;;  %v428_v25 = vlaneseq }
 0x1b6   : > { %v6584_v36 = vpop.f32.mrb[0].mxu1 }
 0x1b7   : > { %v6586_v28 = vpop.f32.mrb[1].mxu1  ;;  %vm4203_vm9 = vcmp.lt.s32.totalorder %v428_v25, 512 }
 0x1b8   : > { %v6588_v12 = vpop.f32.mrb[2].mxu1  ;;  %2354 = vmatpush1.bf16.msra.mxu1 %v5587_v19  ;;  %v6594_v19 = vshrl.u32 %v428_v25, 7 }
 0x1b9   : > { %v6590_v41 = vpop.f32.mrb[3].mxu1  ;;  %2355 = vmatprep.subr.bf16.mxu1 %v5592_v35 }
 0x1ba   : > { %v6598_v35 = vsub.s32 0, %v6594_v19  ;;  %v430_v40 = vadd.s32 8, %v6594_v19 }
 0x1bc   : > { %2356 = vmatpush1.bf16.msra.mxu1 %v5590_v38  ;;  %v6607_v38 = vsub.s32 1, %v6594_v19  ;;  %v705_v39 = vrot.slane %v6604_v37, %v6598_v35 }
 0x1bd   : > { %2357 = vmatprep.subr.bf16.mxu1 %v5595_v58 }
 0x1be   : > { %v709_v58 = vrot.slane %v6604_v37, %v6607_v38  ;;  %v2077_v43 = vadd.f32 %v6584_v36, %v705_v39 }
 0x1c0   : > { %2358 = vmatpush1.bf16.msra.mxu1 %v5593_v42  ;;  %v431_v42 = vstv %s4498_s14 }
 0x1c1   : > { %2359 = vmatprep.subr.bf16.mxu1 %v5598_v44  ;;  %v2079_v44 = vadd.f32 %v6586_v28, %v709_v58  ;;  %v6619_v47 = vadd.s32 %v431_v42, %v430_v40  ;;  %v5770_v40 = vld [vmem:[#allocation10 + $0x4b0] ss:$24 sps:$4 sm:$0xff]  }
 0x1c3   : > { %vm435_vm3 = vcmp.lt.s32.totalorder %v6619_v47, 40 }
 0x1c4   : > { %2360 = vmatpush1.bf16.msra.mxu1 %v5596_v45 }
 0x1c5   : > { %2361 = vmatprep.subr.bf16.mxu1 %v5601_v46  ;;  %v6617_v46 = vadd.s32 %v431_v42, %v6594_v19  ;;  %v5773_v42 = vld [vmem:[#allocation10 + $0x4b8] ss:$24 sps:$4 sm:$0xff]  }
 0x1c7   : > { %vm434_vm2 = vcmp.lt.s32.totalorder %v6617_v46, 40 }
 0x1c8   : > { %2362 = vmatpush1.bf16.msra.mxu1 %v5599_v48  ;;  %v2081_v48 = vadd.f32 %v6588_v12, %v705_v39  ;;  %vm6631_vm4 = vmpackc.low %vm435_vm3, %vm434_vm2  ;;  %v5772_v39 = vld [vmem:[#allocation10 + $0x4b4] ss:$24 sps:$4 sm:$0xff]  }
 0x1c9   : > { %2363 = vmatprep.subr.bf16.mxu1 %v5604_v49 }
 0x1cc   : > { %2364 = vmatpush1.bf16.msra.mxu1 %v5602_v50 }
 0x1cd   : > { %2365 = vmatprep.subr.bf16.mxu1 %v5607_v51  ;;  %v2083_v51 = vadd.f32 %v6590_v41, %v709_v58  ;;  %v5775_v58 = vld [vmem:[#allocation10 + $0x4bc] ss:$24 sps:$4 sm:$0xff]  }
 0x1d0   : > { %2366 = vmatpush1.bf16.msra.mxu1 %v5605_v52 }
 0x1d1   : > { %2367 = vmatprep.subr.bf16.mxu1 %v5610_v53 }
 0x1d4   : > { %2368 = vmatpush1.bf16.msra.mxu1 %v5608_v54 }
 0x1d5   : > { %2369 = vmatprep.subr.bf16.mxu1 %v5613_v55 }
 0x1d8   : > { %2370 = vmatpush1.bf16.msra.mxu1 %v5611_v56 }
 0x1d9   : > { %2371 = vmatprep.subr.bf16.mxu1 %v5616_v57 }
 0x1dc   : > { %2372 = vmatpush1.bf16.msra.mxu1 %v5614_v59 }
 0x1dd   : > { %2373 = vmatprep.subr.bf16.mxu1 %v5619_v60 }
 0x1e0   : > { %2374 = vmatpush1.bf16.msra.mxu1 %v5617_v61  ;;  %v5716_v61 = vld [vmem:[#allocation10 + $0x300] ss:$24 sps:$4 sm:$0xff]  }
 0x1e1   : > { %3680 = vmatprep.subr.bf16.mxu1 %v5625_v62  ;;  %v5719_v62 = vld [vmem:[#allocation10 + $0x308] ss:$24 sps:$4 sm:$0xff]  }
 0x1e3   : > { %2376 = vmatmul.mubr.bf16.vlgmr.msra.gmra.mrb[4].mxu1 %v6577_v29  ;;  %v5661_v29 = vld [vmem:[#allocation10 + $0x12c] ss:$24 sps:$4 sm:$0xff]  }
 0x1e4   : > { %3681 = vmatpush1.bf16.msra.mxu1 %v5623_v63  ;;  %v5724_v63 = vld [vmem:[#allocation10 + $0x334] ss:$24 sps:$4 sm:$0xff]  }
 0x1e5   : > { %3682 = vmatprep.subr.bf16.mxu1 %v5631_v0  ;;  %v5727_v0 = vld [vmem:[#allocation10 + $0x33c] ss:$24 sps:$4 sm:$0xff]  }
 0x1e8   : > { %3683 = vmatpush1.bf16.msra.mxu1 %v5629_v1  ;;  %v5722_v1 = vld [vmem:[#allocation10 + $0x330] ss:$24 sps:$4 sm:$0xff]  }
 0x1e9   : > { %3684 = vmatprep.subr.bf16.mxu1 %v5637_v2  ;;  %v5725_v2 = vld [vmem:[#allocation10 + $0x338] ss:$24 sps:$4 sm:$0xff]  }
 0x1ec   : > { %3685 = vmatpush1.bf16.msra.mxu1 %v5635_v3  ;;  %v5730_v3 = vld [vmem:[#allocation10 + $0x364] ss:$24 sps:$4 sm:$0xff]  }
 0x1ed   : > { %3686 = vmatprep.subr.bf16.mxu1 %v5643_v4  ;;  %v5733_v4 = vld [vmem:[#allocation10 + $0x36c] ss:$24 sps:$4 sm:$0xff]  }
 0x1f0   : > { %3687 = vmatpush1.bf16.msra.mxu1 %v5641_v5  ;;  %v5728_v5 = vld [vmem:[#allocation10 + $0x360] ss:$24 sps:$4 sm:$0xff]  }
 0x1f1   : > { %3688 = vmatprep.subr.bf16.mxu1 %v5649_v6  ;;  %v5731_v6 = vld [vmem:[#allocation10 + $0x368] ss:$24 sps:$4 sm:$0xff]  }
 0x1f4   : > { %3689 = vmatpush1.bf16.msra.mxu1 %v5647_v7  ;;  %v5736_v7 = vld [vmem:[#allocation10 + $0x394] ss:$24 sps:$4 sm:$0xff]  }
 0x1f5   : > { %3690 = vmatprep.subr.bf16.mxu1 %v5655_v8  ;;  %v5739_v8 = vld [vmem:[#allocation10 + $0x39c] ss:$24 sps:$4 sm:$0xff]  }
 0x1f8   : > { %3691 = vmatpush1.bf16.msra.mxu1 %v5653_v9  ;;  %v5734_v9 = vld [vmem:[#allocation10 + $0x390] ss:$24 sps:$4 sm:$0xff]  }
 0x1f9   : > { %3692 = vmatprep.subr.bf16.mxu1 %v5661_v29  ;;  %v5737_v29 = vld [vmem:[#allocation10 + $0x398] ss:$24 sps:$4 sm:$0xff]  }
 0x1fc   : > { %3693 = vmatpush1.bf16.msra.mxu1 %v5659_v10  ;;  %v5742_v10 = vld [vmem:[#allocation10 + $0x3c4] ss:$24 sps:$4 sm:$0xff]  }
 0x1fd   : > { %3694 = vmatprep.subr.bf16.mxu1 %v5667_v13  ;;  %v5745_v13 = vld [vmem:[#allocation10 + $0x3cc] ss:$24 sps:$4 sm:$0xff]  }
 0x200   : > { %3695 = vmatpush1.bf16.msra.mxu1 %v5665_v14  ;;  %v5740_v14 = vld [vmem:[#allocation10 + $0x3c0] ss:$24 sps:$4 sm:$0xff]  }
 0x201   : > { %3696 = vmatprep.subr.bf16.mxu1 %v5673_v15  ;;  %v5743_v15 = vld [vmem:[#allocation10 + $0x3c8] ss:$24 sps:$4 sm:$0xff]  }
 0x204   : > { %3697 = vmatpush1.bf16.msra.mxu1 %v5671_v16  ;;  %v5748_v16 = vld [vmem:[#allocation10 + $0x3f4] ss:$24 sps:$4 sm:$0xff]  }
 0x205   : > { %3698 = vmatprep.subr.bf16.mxu1 %v5679_v17  ;;  %v5751_v17 = vld [vmem:[#allocation10 + $0x3fc] ss:$24 sps:$4 sm:$0xff]  }
 0x208   : > { %3699 = vmatpush1.bf16.msra.mxu1 %v5677_v18  ;;  %v5746_v18 = vld [vmem:[#allocation10 + $0x3f0] ss:$24 sps:$4 sm:$0xff]  }
 0x209   : > { %3700 = vmatprep.subr.bf16.mxu1 %v5685_v20  ;;  %v5749_v20 = vld [vmem:[#allocation10 + $0x3f8] ss:$24 sps:$4 sm:$0xff]  }
 0x20c   : > { %3701 = vmatpush1.bf16.msra.mxu1 %v5683_v21  ;;  %v5754_v21 = vld [vmem:[#allocation10 + $0x424] ss:$24 sps:$4 sm:$0xff]  }
 0x20d   : > { %3702 = vmatprep.subr.bf16.mxu1 %v5691_v22  ;;  %v5757_v22 = vld [vmem:[#allocation10 + $0x42c] ss:$24 sps:$4 sm:$0xff]  }
 0x210   : > { %3703 = vmatpush1.bf16.msra.mxu1 %v5689_v23  ;;  %v5752_v23 = vld [vmem:[#allocation10 + $0x420] ss:$24 sps:$4 sm:$0xff]  }
 0x211   : > { %3704 = vmatprep.subr.bf16.mxu1 %v5697_v26  ;;  %v5755_v26 = vld [vmem:[#allocation10 + $0x428] ss:$24 sps:$4 sm:$0xff]  }
 0x214   : > { %3705 = vmatpush1.bf16.msra.mxu1 %v5695_v27  ;;  %v5760_v27 = vld [vmem:[#allocation10 + $0x454] ss:$24 sps:$4 sm:$0xff]  }
 0x215   : > { %3706 = vmatprep.subr.bf16.mxu1 %v5703_v30  ;;  %v5763_v30 = vld [vmem:[#allocation10 + $0x45c] ss:$24 sps:$4 sm:$0xff]  }
 0x218   : > { %3707 = vmatpush1.bf16.msra.mxu1 %v5701_v31  ;;  %v5758_v31 = vld [vmem:[#allocation10 + $0x450] ss:$24 sps:$4 sm:$0xff]  }
 0x219   : > { %3708 = vmatprep.subr.bf16.mxu1 %v5709_v32  ;;  %v5761_v32 = vld [vmem:[#allocation10 + $0x458] ss:$24 sps:$4 sm:$0xff]  }
 0x21c   : > { %3709 = vmatpush1.bf16.msra.mxu1 %v5707_v11  ;;  %v5766_v11 = vld [vmem:[#allocation10 + $0x484] ss:$24 sps:$4 sm:$0xff]  }
 0x21d   : > { %3710 = vmatprep.subr.bf16.mxu1 %v5715_v33  ;;  %v5769_v33 = vld [vmem:[#allocation10 + $0x48c] ss:$24 sps:$4 sm:$0xff]  }
 0x220   : > { %3711 = vmatpush1.bf16.msra.mxu1 %v5713_v34  ;;  %v5764_v34 = vld [vmem:[#allocation10 + $0x480] ss:$24 sps:$4 sm:$0xff]  }
 0x221   : > { %3723 = vmatprep.subr.bf16.mxu1 %v5721_v24  ;;  %v5767_v24 = vld [vmem:[#allocation10 + $0x488] ss:$24 sps:$4 sm:$0xff]  }
 0x237   : > { %v2205_v45 = vpop.f32.mrb[0].mxu0 }
 0x238   : > { %v5036_v49 = vadd.f32 %v2205_v45, %v2077_v43  ;;  %v2207_v50 = vpop.f32.mrb[1].mxu0  ;;  %v5778_v43 = vld [vmem:[#allocation10 + $0x4e4] ss:$24 sps:$4 sm:$0xff]   ;;  %v5776_v45 = vld [vmem:[#allocation10 + $0x4e0] ss:$24 sps:$4 sm:$0xff]  }
 0x239   : > { %v5038_v52 = vadd.f32 %v2207_v50, %v2079_v44  ;;  %v2209_v53 = vpop.f32.mrb[2].mxu0  ;;  %v5781_v44 = vld [vmem:[#allocation10 + $0x4ec] ss:$24 sps:$4 sm:$0xff]   ;;  %v5787_v50 = vld [vmem:[#allocation10 + $0x51c] ss:$24 sps:$4 sm:$0xff]  }
 0x23a   : > { %v5040_v54 = vadd.f32 %v2209_v53, %v2081_v48  ;;  %v2211_v55 = vpop.f32.mrb[3].mxu0  ;;  %v2386_v36 = vmax.f32 %v5036_v49, 0.0  ;;  %v5779_v48 = vld [vmem:[#allocation10 + $0x4e8] ss:$24 sps:$4 sm:$0xff]   ;;  %v5784_v49 = vld [vmem:[#allocation10 + $0x514] ss:$24 sps:$4 sm:$0xff]  }
 0x23b   : > { %v5042_v56 = vadd.f32 %v2211_v55, %v2083_v51  ;;  %v2387_v57 = vmax.f32 %v5038_v52, 0.0  ;;  %v5782_v51 = vld [vmem:[#allocation10 + $0x510] ss:$24 sps:$4 sm:$0xff]   ;;  %v5790_v53 = vld [vmem:[#allocation10 + $0x544] ss:$24 sps:$4 sm:$0xff]  }
 0x23c   : > { %v2390_v28 = vmax.f32 %v5040_v54, 0.0  ;;  %v5785_v52 = vld [vmem:[#allocation10 + $0x518] ss:$24 sps:$4 sm:$0xff]   ;;  %v5793_v54 = vld [vmem:[#allocation10 + $0x54c] ss:$24 sps:$4 sm:$0xff]  }
 0x23d   : > { %v2391_v59 = vmax.f32 %v5042_v56, 0.0  ;;  %v5788_v55 = vld [vmem:[#allocation10 + $0x540] ss:$24 sps:$4 sm:$0xff]  }
 0x23e   : > { %v6625_v60 = vpack.c.bf16 %v2390_v28, %v2386_v36  ;;  %v5791_v56 = vld [vmem:[#allocation10 + $0x548] ss:$24 sps:$4 sm:$0xff]   ;;  %v5796_v36 = vld [vmem:[#allocation10 + $0x574] ss:$24 sps:$4 sm:$0xff]  }
 0x23f   : > { %v6635_v41 = vpack.c.bf16 %v2391_v59, %v2387_v57  ;;  %v5799_v28 = vld [vmem:[#allocation10 + $0x57c] ss:$24 sps:$4 sm:$0xff]   ;;  %v5794_v57 = vld [vmem:[#allocation10 + $0x570] ss:$24 sps:$4 sm:$0xff]  }
 0x240   : > { %v5797_v59 = vld [vmem:[#allocation10 + $0x578] ss:$24 sps:$4 sm:$0xff]  }
 0x241   : > { %4957 = vmatprep.mubr.msk.bf16.mxu0 %vm6631_vm4, %v6635_v41  ;;  %4969 = vmatprep.mubr.msk.bf16.mxu1 %vm6631_vm4, %v6635_v41 }
 0x242   : > { %4960 = vmatmul.mubr.msk.bf16.vlgmr.msra.gmra.mrb[4].mxu0 %vm6631_vm4, %v6625_v60  ;;  %4972 = vmatmul.mubr.msk.bf16.vlgmr.msra.gmra.mrb[8].mxu1 %vm6631_vm4, %v6625_v60 }
 0x243   : > { %3638 = vmatpush1.bf16.msra.mxu0 %v5716_v61  ;;  %3724 = vmatpush1.bf16.msra.mxu1 %v5719_v62  ;;  %v5802_v61 = vld [vmem:[#allocation10 + $0x5a4] ss:$24 sps:$4 sm:$0xff]  }
 0x244   : > { %3639 = vmatprep.subr.bf16.mxu0 %v5724_v63  ;;  %3725 = vmatprep.subr.bf16.mxu1 %v5727_v0  ;;  %v5805_v62 = vld [vmem:[#allocation10 + $0x5ac] ss:$24 sps:$4 sm:$0xff]   ;;  %v5800_v63 = vld [vmem:[#allocation10 + $0x5a0] ss:$24 sps:$4 sm:$0xff]  }
 0x245   : > { %v5803_v0 = vld [vmem:[#allocation10 + $0x5a8] ss:$24 sps:$4 sm:$0xff]  }
 0x247   : > { %3640 = vmatpush1.bf16.msra.mxu0 %v5722_v1  ;;  %3726 = vmatpush1.bf16.msra.mxu1 %v5725_v2  ;;  %v5808_v1 = vld [vmem:[#allocation10 + $0x5d4] ss:$24 sps:$4 sm:$0xff]  }
 0x248   : > { %3641 = vmatprep.subr.bf16.mxu0 %v5730_v3  ;;  %3727 = vmatprep.subr.bf16.mxu1 %v5733_v4  ;;  %v5811_v2 = vld [vmem:[#allocation10 + $0x5dc] ss:$24 sps:$4 sm:$0xff]   ;;  %v5806_v3 = vld [vmem:[#allocation10 + $0x5d0] ss:$24 sps:$4 sm:$0xff]  }
 0x249   : > { %v5809_v4 = vld [vmem:[#allocation10 + $0x5d8] ss:$24 sps:$4 sm:$0xff]  }
 0x24b   : > { %3642 = vmatpush1.bf16.msra.mxu0 %v5728_v5  ;;  %3728 = vmatpush1.bf16.msra.mxu1 %v5731_v6  ;;  %v5814_v5 = vld [vmem:[#allocation10 + $0x14] ss:$24 sps:$4 sm:$0xff]   ;;  %v6650_v6 = vsub.s32 2, %v6594_v19 }
 0x24c   : > { %3643 = vmatprep.subr.bf16.mxu0 %v5736_v7  ;;  %3729 = vmatprep.subr.bf16.mxu1 %v5739_v8  ;;  %v6653_v7 = vsub.s32 3, %v6594_v19 }
 0x24d   : > { %v713_v8 = vrot.slane %v6604_v37, %v6650_v6 }
 0x24f   : > { %3644 = vmatpush1.bf16.msra.mxu0 %v5734_v9  ;;  %3730 = vmatpush1.bf16.msra.mxu1 %v5737_v29  ;;  %v717_v9 = vrot.slane %v6604_v37, %v6653_v7  ;;  %v5817_v37 = vld [vmem:[#allocation10 + $0x44] ss:$24 sps:$4 sm:$0xff]  }
 0x250   : > { %3645 = vmatprep.subr.bf16.mxu0 %v5742_v10  ;;  %3731 = vmatprep.subr.bf16.mxu1 %v5745_v13 }
 0x253   : > { %3646 = vmatpush1.bf16.msra.mxu0 %v5740_v14  ;;  %3732 = vmatpush1.bf16.msra.mxu1 %v5743_v15 }
 0x254   : > { %3647 = vmatprep.subr.bf16.mxu0 %v5748_v16  ;;  %3733 = vmatprep.subr.bf16.mxu1 %v5751_v17 }
 0x257   : > { %3648 = vmatpush1.bf16.msra.mxu0 %v5746_v18  ;;  %3734 = vmatpush1.bf16.msra.mxu1 %v5749_v20 }
 0x258   : > { %3649 = vmatprep.subr.bf16.mxu0 %v5754_v21  ;;  %3735 = vmatprep.subr.bf16.mxu1 %v5757_v22 }
 0x25b   : > { %3650 = vmatpush1.bf16.msra.mxu0 %v5752_v23  ;;  %3736 = vmatpush1.bf16.msra.mxu1 %v5755_v26 }
 0x25c   : > { %3651 = vmatprep.subr.bf16.mxu0 %v5760_v27  ;;  %3737 = vmatprep.subr.bf16.mxu1 %v5763_v30  ;;  %v5812_v30 = vld [vmem:[#allocation10 + $0x10] ss:$24 sps:$4 sm:$0xff]  }
 0x25f   : > { %3652 = vmatpush1.bf16.msra.mxu0 %v5758_v31  ;;  %3738 = vmatpush1.bf16.msra.mxu1 %v5761_v32  ;;  %v5815_v31 = vld [vmem:[#allocation10 + $0x40] ss:$24 sps:$4 sm:$0xff]   ;;  %v5820_v32 = vld [vmem:[#allocation10 + $0x74] ss:$24 sps:$4 sm:$0xff]  }
 0x260   : > { %3653 = vmatprep.subr.bf16.mxu0 %v5766_v11  ;;  %3739 = vmatprep.subr.bf16.mxu1 %v5769_v33  ;;  %v5818_v11 = vld [vmem:[#allocation10 + $0x70] ss:$24 sps:$4 sm:$0xff]   ;;  %v5823_v33 = vld [vmem:[#allocation10 + $0xa4] ss:$24 sps:$4 sm:$0xff]  }
 0x263   : > { %3654 = vmatpush1.bf16.msra.mxu0 %v5764_v34  ;;  %3740 = vmatpush1.bf16.msra.mxu1 %v5767_v24  ;;  %v5821_v34 = vld [vmem:[#allocation10 + $0xa0] ss:$24 sps:$4 sm:$0xff]   ;;  %v5826_v24 = vld [vmem:[#allocation10 + $0xd4] ss:$24 sps:$4 sm:$0xff]  }
 0x264   : > { %3655 = vmatprep.subr.bf16.mxu0 %v5772_v39  ;;  %3741 = vmatprep.subr.bf16.mxu1 %v5775_v58  ;;  %v5824_v39 = vld [vmem:[#allocation10 + $0xd0] ss:$24 sps:$4 sm:$0xff]   ;;  %v5829_v58 = vld [vmem:[#allocation10 + $0x104] ss:$24 sps:$4 sm:$0xff]  }
 0x267   : > { %3656 = vmatpush1.bf16.msra.mxu0 %v5770_v40  ;;  %3742 = vmatpush1.bf16.msra.mxu1 %v5773_v42  ;;  %v5827_v40 = vld [vmem:[#allocation10 + $0x100] ss:$24 sps:$4 sm:$0xff]   ;;  %v5832_v42 = vld [vmem:[#allocation10 + $0x134] ss:$24 sps:$4 sm:$0xff]  }
 0x268   : > { %3657 = vmatprep.subr.bf16.mxu0 %v5778_v43  ;;  %3743 = vmatprep.subr.bf16.mxu1 %v5781_v44  ;;  %v5830_v43 = vld [vmem:[#allocation10 + $0x130] ss:$24 sps:$4 sm:$0xff]   ;;  %v5835_v44 = vld [vmem:[#allocation10 + $0x164] ss:$24 sps:$4 sm:$0xff]  }
 0x26b   : > { %3658 = vmatpush1.bf16.msra.mxu0 %v5776_v45  ;;  %3744 = vmatpush1.bf16.msra.mxu1 %v5779_v48  ;;  %v5833_v45 = vld [vmem:[#allocation10 + $0x160] ss:$24 sps:$4 sm:$0xff]   ;;  %v5838_v48 = vld [vmem:[#allocation10 + $0x194] ss:$24 sps:$4 sm:$0xff]  }
 0x26c   : > { %3659 = vmatprep.subr.bf16.mxu0 %v5784_v49  ;;  %3745 = vmatprep.subr.bf16.mxu1 %v5787_v50  ;;  %v5836_v49 = vld [vmem:[#allocation10 + $0x190] ss:$24 sps:$4 sm:$0xff]   ;;  %v5841_v50 = vld [vmem:[#allocation10 + $0x1c4] ss:$24 sps:$4 sm:$0xff]  }
 0x26f   : > { %3660 = vmatpush1.bf16.msra.mxu0 %v5782_v51  ;;  %3746 = vmatpush1.bf16.msra.mxu1 %v5785_v52  ;;  %v5839_v51 = vld [vmem:[#allocation10 + $0x1c0] ss:$24 sps:$4 sm:$0xff]   ;;  %v5844_v52 = vld [vmem:[#allocation10 + $0x1f4] ss:$24 sps:$4 sm:$0xff]  }
 0x270   : > { %3661 = vmatprep.subr.bf16.mxu0 %v5790_v53  ;;  %3747 = vmatprep.subr.bf16.mxu1 %v5793_v54  ;;  %v5842_v53 = vld [vmem:[#allocation10 + $0x1f0] ss:$24 sps:$4 sm:$0xff]   ;;  %v5847_v54 = vld [vmem:[#allocation10 + $0x224] ss:$24 sps:$4 sm:$0xff]  }
 0x273   : > { %3662 = vmatpush1.bf16.msra.mxu0 %v5788_v55  ;;  %3748 = vmatpush1.bf16.msra.mxu1 %v5791_v56  ;;  %v5845_v55 = vld [vmem:[#allocation10 + $0x220] ss:$24 sps:$4 sm:$0xff]   ;;  %v5850_v56 = vld [vmem:[#allocation10 + $0x254] ss:$24 sps:$4 sm:$0xff]  }
 0x274   : > { %3663 = vmatprep.subr.bf16.mxu0 %v5796_v36  ;;  %3749 = vmatprep.subr.bf16.mxu1 %v5799_v28  ;;  %v5848_v36 = vld [vmem:[#allocation10 + $0x250] ss:$24 sps:$4 sm:$0xff]   ;;  %v5853_v28 = vld [vmem:[#allocation10 + $0x284] ss:$24 sps:$4 sm:$0xff]  }
 0x277   : > { %3664 = vmatpush1.bf16.msra.mxu0 %v5794_v57  ;;  %3750 = vmatpush1.bf16.msra.mxu1 %v5797_v59  ;;  %v5851_v57 = vld [vmem:[#allocation10 + $0x280] ss:$24 sps:$4 sm:$0xff]   ;;  %v5856_v59 = vld [vmem:[#allocation10 + $0x2b4] ss:$24 sps:$4 sm:$0xff]  }
 0x278   : > { %3665 = vmatprep.subr.bf16.mxu0 %v5802_v61  ;;  %3751 = vmatprep.subr.bf16.mxu1 %v5805_v62  ;;  %v5854_v61 = vld [vmem:[#allocation10 + $0x2b0] ss:$24 sps:$4 sm:$0xff]   ;;  %v5859_v62 = vld [vmem:[#allocation10 + $0x2e4] ss:$24 sps:$4 sm:$0xff]  }
 0x27b   : > { %3666 = vmatpush1.bf16.msra.mxu0 %v5800_v63  ;;  %3752 = vmatpush1.bf16.msra.mxu1 %v5803_v0  ;;  %v5857_v63 = vld [vmem:[#allocation10 + $0x2e0] ss:$24 sps:$4 sm:$0xff]   ;;  %v5862_v0 = vld [vmem:[#allocation10 + $0x314] ss:$24 sps:$4 sm:$0xff]  }
 0x27c   : > { %3667 = vmatprep.subr.bf16.mxu0 %v5808_v1  ;;  %3753 = vmatprep.subr.bf16.mxu1 %v5811_v2  ;;  %v5860_v1 = vld [vmem:[#allocation10 + $0x310] ss:$24 sps:$4 sm:$0xff]   ;;  %v5865_v2 = vld [vmem:[#allocation10 + $0x344] ss:$24 sps:$4 sm:$0xff]  }
 0x27f   : > { %3668 = vmatpush1.bf16.msra.mxu0 %v5806_v3  ;;  %3754 = vmatpush1.bf16.msra.mxu1 %v5809_v4  ;;  %v5863_v3 = vld [vmem:[#allocation10 + $0x340] ss:$24 sps:$4 sm:$0xff]   ;;  %v5868_v4 = vld [vmem:[#allocation10 + $0x374] ss:$24 sps:$4 sm:$0xff]  }
 0x280   : > { %3766 = vmatprep.subr.bf16.mxu0 %v5814_v5  ;;  %v5866_v5 = vld [vmem:[#allocation10 + $0x370] ss:$24 sps:$4 sm:$0xff]  }
 0x2b6   : > { %v2377_v29 = vpop.f32.mrb[4].mxu1 }
 0x2b7   : > { %v5043_v10 = vadd.f32 %v2377_v29, %v713_v8  ;;  %v2379_v13 = vpop.f32.mrb[5].mxu1  ;;  %v5874_v29 = vld [vmem:[#allocation10 + $0x3d4] ss:$24 sps:$4 sm:$0xff]  }
 0x2b8   : > { %v5044_v14 = vadd.f32 %v2379_v13, %v717_v9  ;;  %v2381_v15 = vpop.f32.mrb[6].mxu1  ;;  %v5877_v13 = vld [vmem:[#allocation10 + $0x404] ss:$24 sps:$4 sm:$0xff]  }
 0x2b9   : > { %v5045_v16 = vadd.f32 %v2381_v15, %v713_v8  ;;  %v2383_v17 = vpop.f32.mrb[7].mxu1  ;;  %v2388_v20 = vmax.f32 %v5043_v10, 0.0  ;;  %v5871_v8 = vld [vmem:[#allocation10 + $0x3a4] ss:$24 sps:$4 sm:$0xff]   ;;  %v5872_v10 = vld [vmem:[#allocation10 + $0x3d0] ss:$24 sps:$4 sm:$0xff]  }
 0x2ba   : > { %v5046_v18 = vadd.f32 %v2383_v17, %v717_v9  ;;  %v2389_v22 = vmax.f32 %v5044_v14, 0.0  ;;  %v5869_v9 = vld [vmem:[#allocation10 + $0x3a0] ss:$24 sps:$4 sm:$0xff]   ;;  %v5880_v15 = vld [vmem:[#allocation10 + $0x434] ss:$24 sps:$4 sm:$0xff]  }
 0x2bb   : > { %v2392_v21 = vmax.f32 %v5045_v16, 0.0  ;;  %v5875_v14 = vld [vmem:[#allocation10 + $0x400] ss:$24 sps:$4 sm:$0xff]   ;;  %v5878_v16 = vld [vmem:[#allocation10 + $0x430] ss:$24 sps:$4 sm:$0xff]  }
 0x2bc   : > { %v2393_v23 = vmax.f32 %v5046_v18, 0.0  ;;  %v5883_v17 = vld [vmem:[#allocation10 + $0x464] ss:$24 sps:$4 sm:$0xff]   ;;  %v5881_v18 = vld [vmem:[#allocation10 + $0x460] ss:$24 sps:$4 sm:$0xff]  }
 0x2bd   : > { %v6659_v26 = vpack.c.bf16 %v2392_v21, %v2388_v20  ;;  %v5886_v20 = vld [vmem:[#allocation10 + $0x494] ss:$24 sps:$4 sm:$0xff]   ;;  %v5884_v21 = vld [vmem:[#allocation10 + $0x490] ss:$24 sps:$4 sm:$0xff]  }
 0x2be   : > { %v6661_v27 = vpack.c.bf16 %v2393_v23, %v2389_v22  ;;  %v5889_v22 = vld [vmem:[#allocation10 + $0x4c4] ss:$24 sps:$4 sm:$0xff]   ;;  %v5887_v23 = vld [vmem:[#allocation10 + $0x4c0] ss:$24 sps:$4 sm:$0xff]  }
 0x2c0   : > { %4963 = vmatprep.mubr.msk.bf16.mxu0 %vm6631_vm4, %v6661_v27  ;;  %4975 = vmatprep.mubr.msk.bf16.mxu1 %vm6631_vm4, %v6661_v27 }
 0x2c1   : > { %5031 = vmatprep.subr.msk.bf16.mxu1 %vm6631_vm4, %v6661_v27  ;;  %4966 = vmatmul.mubr.msk.bf16.vlgmr.msra.gmra.mrb[4].mxu0 %vm6631_vm4, %v6659_v26 }
 0x2c2   : > { %4978 = vmatmul.mubr.msk.bf16.vlgmr.msra.gmra.mrb[8].mxu1 %vm6631_vm4, %v6659_v26  ;;  %3767 = vmatpush1.bf16.msra.mxu0 %v5812_v30  ;;  %v5890_v30 = vld [vmem:[#allocation10 + $0x4f0] ss:$24 sps:$4 sm:$0xff]  }
 0x2c3   : > { %5034 = vmatpush1.bf16.msk.msra.mxu1 %vm6631_vm4, %v6659_v26  ;;  %4981 = vmatprep.mubr.msk.bf16.mxu0 %vm6631_vm4, %v6635_v41 }
 0x2c4   : > { %3768 = vmatprep.subr.bf16.mxu0 %v5817_v37  ;;  %v5895_v37 = vld [vmem:[#allocation10 + $0x524] ss:$24 sps:$4 sm:$0xff]  }
 0x2c6   : > { %3769 = vmatpush1.bf16.msra.mxu0 %v5815_v31  ;;  %v5893_v31 = vld [vmem:[#allocation10 + $0x520] ss:$24 sps:$4 sm:$0xff]  }
 0x2c7   : > { %3770 = vmatprep.subr.bf16.mxu0 %v5820_v32  ;;  %v5898_v32 = vld [vmem:[#allocation10 + $0x554] ss:$24 sps:$4 sm:$0xff]  }
 0x2ca   : > { %3771 = vmatpush1.bf16.msra.mxu0 %v5818_v11  ;;  %v5896_v11 = vld [vmem:[#allocation10 + $0x550] ss:$24 sps:$4 sm:$0xff]  }
 0x2cb   : > { %3772 = vmatprep.subr.bf16.mxu0 %v5823_v33  ;;  %v5901_v33 = vld [vmem:[#allocation10 + $0x584] ss:$24 sps:$4 sm:$0xff]  }
 0x2ce   : > { %3773 = vmatpush1.bf16.msra.mxu0 %v5821_v34  ;;  %v5899_v34 = vld [vmem:[#allocation10 + $0x580] ss:$24 sps:$4 sm:$0xff]  }
 0x2cf   : > { %3774 = vmatprep.subr.bf16.mxu0 %v5826_v24  ;;  %v5904_v24 = vld [vmem:[#allocation10 + $0x5b4] ss:$24 sps:$4 sm:$0xff]  }
 0x2d2   : > { %3775 = vmatpush1.bf16.msra.mxu0 %v5824_v39  ;;  %v5902_v39 = vld [vmem:[#allocation10 + $0x5b0] ss:$24 sps:$4 sm:$0xff]  }
 0x2d3   : > { %3776 = vmatprep.subr.bf16.mxu0 %v5829_v58  ;;  %v5907_v58 = vld [vmem:[#allocation10 + $0x5e4] ss:$24 sps:$4 sm:$0xff]  }
 0x2d6   : > { %3777 = vmatpush1.bf16.msra.mxu0 %v5827_v40  ;;  %v5905_v40 = vld [vmem:[#allocation10 + $0x5e0] ss:$24 sps:$4 sm:$0xff]  }
 0x2d7   : > { %3778 = vmatprep.subr.bf16.mxu0 %v5832_v42  ;;  %v2602_v42 = vld [vmem:[%s6880_s4] sm:$0x3f] }
 0x2da   : > { %3779 = vmatpush1.bf16.msra.mxu0 %v5830_v43  ;;  %v2619_v43 = vrot.slane %v2602_v42, %v6653_v7 }
 0x2db   : > { %3780 = vmatprep.subr.bf16.mxu0 %v5835_v44 }
 0x2de   : > { %3781 = vmatpush1.bf16.msra.mxu0 %v5833_v45 }
 0x2df   : > { %3782 = vmatprep.subr.bf16.mxu0 %v5838_v48 }
 0x2e2   : > { %3783 = vmatpush1.bf16.msra.mxu0 %v5836_v49 }
 0x2e3   : > { %3784 = vmatprep.subr.bf16.mxu0 %v5841_v50 }
 0x2e6   : > { %3785 = vmatpush1.bf16.msra.mxu0 %v5839_v51 }
 0x2e7   : > { %3786 = vmatprep.subr.bf16.mxu0 %v5844_v52 }
 0x2ea   : > { %3787 = vmatpush1.bf16.msra.mxu0 %v5842_v53 }
 0x2eb   : > { %3788 = vmatprep.subr.bf16.mxu0 %v5847_v54 }
 0x2ee   : > { %3789 = vmatpush1.bf16.msra.mxu0 %v5845_v55 }
 0x2ef   : > { %3790 = vmatprep.subr.bf16.mxu0 %v5850_v56 }
 0x2f2   : > { %3791 = vmatpush1.bf16.msra.mxu0 %v5848_v36 }
 0x2f3   : > { %3792 = vmatprep.subr.bf16.mxu0 %v5853_v28 }
 0x2f6   : > { %3793 = vmatpush1.bf16.msra.mxu0 %v5851_v57 }
 0x2f7   : > { %3794 = vmatprep.subr.bf16.mxu0 %v5856_v59 }
 0x2fa   : > { %3795 = vmatpush1.bf16.msra.mxu0 %v5854_v61 }
 0x2fb   : > { %3796 = vmatprep.subr.bf16.mxu0 %v5859_v62 }
 0x2fe   : > { %3797 = vmatpush1.bf16.msra.mxu0 %v5857_v63 }
 0x2ff   : > { %3809 = vmatprep.subr.bf16.mxu0 %v5862_v0 }
 0x301   : > { %4984 = vmatmul.mubr.msk.bf16.vlgmr.msra.gmra.mrb[8].mxu0 %vm6631_vm4, %v6625_v60 }
 0x302   : > { %3810 = vmatpush1.bf16.msra.mxu0 %v5860_v1  ;;  %4987 = vmatprep.mubr.msk.bf16.mxu0 %vm6631_vm4, %v6661_v27  ;;  %v5892_v27 = vld [vmem:[#allocation10 + $0x4f4] ss:$24 sps:$4 sm:$0xff]  }
 0x303   : > { %3811 = vmatprep.subr.bf16.mxu0 %v5865_v2 }
 0x306   : > { %3812 = vmatpush1.bf16.msra.mxu0 %v5863_v3  ;;  %v2622_v3 = vsub.s32 4, %v6594_v19 }
 0x307   : > { %3813 = vmatprep.subr.bf16.mxu0 %v5868_v4  ;;  %v2626_v4 = vsub.s32 5, %v6594_v19 }
 0x30a   : > { %3814 = vmatpush1.bf16.msra.mxu0 %v5866_v5  ;;  %v2623_v5 = vrot.slane %v2602_v42, %v2622_v3 }
 0x30b   : > { %3815 = vmatprep.subr.bf16.mxu0 %v5871_v8  ;;  %v2627_v8 = vrot.slane %v2602_v42, %v2626_v4 }
 0x30e   : > { %3816 = vmatpush1.bf16.msra.mxu0 %v5869_v9 }
 0x30f   : > { %3817 = vmatprep.subr.bf16.mxu0 %v5874_v29 }
 0x312   : > { %3818 = vmatpush1.bf16.msra.mxu0 %v5872_v10 }
 0x313   : > { %3819 = vmatprep.subr.bf16.mxu0 %v5877_v13 }
 0x316   : > { %3820 = vmatpush1.bf16.msra.mxu0 %v5875_v14 }
 0x317   : > { %3821 = vmatprep.subr.bf16.mxu0 %v5880_v15 }
 0x31a   : > { %3822 = vmatpush1.bf16.msra.mxu0 %v5878_v16 }
 0x31b   : > { %3823 = vmatprep.subr.bf16.mxu0 %v5883_v17 }
 0x31e   : > { %3824 = vmatpush1.bf16.msra.mxu0 %v5881_v18 }
 0x31f   : > { %3825 = vmatprep.subr.bf16.mxu0 %v5886_v20 }
 0x322   : > { %3826 = vmatpush1.bf16.msra.mxu0 %v5884_v21 }
 0x323   : > { %3827 = vmatprep.subr.bf16.mxu0 %v5889_v22  ;;  %v2615_v22 = vrot.slane %v2602_v42, %v6650_v6 }
 0x326   : > { %3828 = vmatpush1.bf16.msra.mxu0 %v5887_v23 }
 0x327   : > { %3829 = vmatprep.subr.bf16.mxu0 %v5892_v27  ;;  %v2611_v27 = vrot.slane %v2602_v42, %v6607_v38 }
 0x32a   : > { %3830 = vmatpush1.bf16.msra.mxu0 %v5890_v30 }
 0x32b   : > { %3831 = vmatprep.subr.bf16.mxu0 %v5895_v37 }
 0x32e   : > { %3832 = vmatpush1.bf16.msra.mxu0 %v5893_v31 }
 0x32f   : > { %3833 = vmatprep.subr.bf16.mxu0 %v5898_v32 }
 0x332   : > { %3834 = vmatpush1.bf16.msra.mxu0 %v5896_v11 }
 0x333   : > { %3835 = vmatprep.subr.bf16.mxu0 %v5901_v33 }
 0x336   : > { %3836 = vmatpush1.bf16.msra.mxu0 %v5899_v34 }
 0x337   : > { %3837 = vmatprep.subr.bf16.mxu0 %v5904_v24 }
 0x33a   : > { %3838 = vmatpush1.bf16.msra.mxu0 %v5902_v39 }
 0x33b   : > { %3839 = vmatprep.subr.bf16.mxu0 %v5907_v58 }
 0x33e   : > { %3840 = vmatpush1.bf16.msra.mxu0 %v5905_v40 }
 0x33f   : > { %5025 = vmatprep.subr.msk.bf16.mxu0 %vm6631_vm4, %v6635_v41 }
 0x341   : > { %4990 = vmatmul.mubr.msk.bf16.vlgmr.msra.gmra.mrb[8].mxu0 %vm6631_vm4, %v6659_v26 }
 0x342   : > { %5028 = vmatpush1.bf16.msk.msra.mxu0 %vm6631_vm4, %v6625_v60  ;;  %v2607_v60 = vrot.slane %v2602_v42, %v6598_v35 }
 0x394   : > { %v3671_v44 = vpop.f32.mrb[4].mxu0 }
 0x395   : > { %v3757_v45 = vpop.f32.mrb[8].mxu1  ;;  %v3673_v48 = vpop.f32.mrb[5].mxu0  ;;  %v5047_v55 = vadd.f32 %v3671_v44, %v2607_v60  ;;  %v3900_v44 = vld [vmem:[%s6881_s5] sm:$0x7] }
 0x396   : > { %v3759_v49 = vpop.f32.mrb[9].mxu1  ;;  %v3675_v50 = vpop.f32.mrb[6].mxu0  ;;  %v5051_v30 = vadd.f32 %v3757_v45, %v2615_v22  ;;  %v5048_v37 = vadd.f32 %v3673_v48, %v2611_v27 }
 0x397   : > { %v5052_v41 = vadd.f32 %v3759_v49, %v2619_v43  ;;  %v3761_v51 = vpop.f32.mrb[10].mxu1  ;;  %v3677_v52 = vpop.f32.mrb[7].mxu0  ;;  %v5049_v28 = vadd.f32 %v3675_v50, %v2607_v60  ;;  %v3905_v50 = vrot.slane %v3900_v44, %v6598_v35 }
 0x398   : > { %v3763_v53 = vpop.f32.mrb[11].mxu1  ;;  %v5053_v31 = vadd.f32 %v3761_v51, %v2615_v22  ;;  %v5050_v32 = vadd.f32 %v3677_v52, %v2611_v27  ;;  %v3913_v52 = vrot.slane %v3900_v44, %v6650_v6 }
 0x399   : > { %v4991_v26 = vmul.f32 -1.442695, %v5052_v41  ;;  %v5054_v54 = vadd.f32 %v3763_v53, %v2619_v43  ;;  %v3909_v41 = vrot.slane %v3900_v44, %v6607_v38 }
 0x39b   : > { %5908 = vpow2.f32 %v4991_v26  ;;  %v4994_v12 = vmul.f32 -1.442695, %v5054_v54 }
 0x39d   : > { %5910 = vpow2.f32 %v4994_v12 }
 0x39e   : > { %5912 = vtanh.f32 %v5047_v55 }
 0x3a5   : > { %v5909_v56 = vpop.eup %5908 }
 0x3a6   : > { %v3876_v36 = vadd.f32 1.0, %v5909_v56 }
 0x3a7   : > { %v5911_v57 = vpop.eup %5910 }
 0x3a8   : > { %5914 = vrcp.f32 %v3876_v36  ;;  %v3879_v59 = vadd.f32 1.0, %v5911_v57  ;;  %v5913_v61 = vpop.eup %5912 }
 0x3a9   : > { %5916 = vtanh.f32 %v5049_v28 }
 0x3aa   : > { %5918 = vrcp.f32 %v3879_v59 }
 0x3b2   : > { %v5915_v62 = vpop.eup %5914 }
 0x3b3   : > { %v3894_v63 = vmul.f32 %v5915_v62, %v5913_v61  ;;  %v5917_v0 = vpop.eup %5916 }
 0x3b4   : > { %v5919_v1 = vpop.eup %5918 }
 0x3b5   : > { %v6704_v2 = vmul.f32 %v5919_v1, %v5917_v0  ;;  %v3917_v55 = vmul.f32 %v3905_v50, %v3894_v63 }
 0x3b7   : > { %v3920_v61 = vmul.f32 %v3905_v50, %v6704_v2 }
 0x414   : > { %v3843_v9 = vpop.f32.mrb[8].mxu0 }
 0x415   : > { %v5055_v29 = vadd.f32 %v3843_v9, %v2623_v5  ;;  %v3845_v10 = vpop.f32.mrb[9].mxu0  ;;  %v6235_v9 = vmov 0.0  }
 0x416   : > { %v5056_v13 = vadd.f32 %v3845_v10, %v2627_v8  ;;  %v3847_v14 = vpop.f32.mrb[10].mxu0  ;;  %4093 = vmatprep.mubr.f32.mxu0 %v6235_v9  ;;  %4164 = vmatprep.mubr.f32.mxu1 %v6235_v9 }
 0x417   : > { %v4992_v15 = vmul.f32 -1.442695, %v5055_v29  ;;  %v5057_v16 = vadd.f32 %v3847_v14, %v2623_v5  ;;  %v3849_v17 = vpop.f32.mrb[11].mxu0  ;;  %v6234_v5 = vmov 0  }
 0x418   : > { %v4993_v18 = vmul.f32 -1.442695, %v5056_v13  ;;  %v5058_v20 = vadd.f32 %v3849_v17, %v2627_v8  ;;  %5235 = vset.pattern.permute.xlu0 %v6234_v5 }
 0x419   : > { %5920 = vpow2.f32 %v4992_v15  ;;  %v4995_v21 = vmul.f32 -1.442695, %v5057_v16 }
 0x41a   : > { %5922 = vpow2.f32 %v4993_v18  ;;  %v4996_v23 = vmul.f32 -1.442695, %v5058_v20  ;;  %v3931_v20 = vld [vmem:[#allocation2] sm:$0x1] }
 0x41b   : > { %5924 = vpow2.f32 %v4995_v21 }
 0x41c   : > { %5926 = vpow2.f32 %v4996_v23 }
 0x41d   : > { %5928 = vtanh.f32 %v5051_v30 }
 0x41e   : > { %5930 = vtanh.f32 %v5048_v37 }
 0x41f   : > { %5932 = vtanh.f32 %v5053_v31 }
 0x420   : > { %5934 = vtanh.f32 %v5050_v32 }
 0x423   : > { %v5921_v11 = vpop.eup %5920 }
 0x424   : > { %v5923_v33 = vpop.eup %5922  ;;  %v3877_v34 = vadd.f32 1.0, %v5921_v11 }
 0x425   : > { %v5925_v24 = vpop.eup %5924  ;;  %v3878_v39 = vadd.f32 1.0, %v5923_v33 }
 0x426   : > { %v5927_v58 = vpop.eup %5926  ;;  %5936 = vrcp.f32 %v3877_v34  ;;  %v3880_v40 = vadd.f32 1.0, %v5925_v24 }
 0x427   : > { %5938 = vrcp.f32 %v3878_v39  ;;  %v3881_v42 = vadd.f32 1.0, %v5927_v58  ;;  %v5929_v43 = vpop.eup %5928 }
 0x428   : > { %5940 = vrcp.f32 %v3880_v40  ;;  %v5931_v45 = vpop.eup %5930 }
 0x429   : > { %5942 = vrcp.f32 %v3881_v42  ;;  %v5933_v48 = vpop.eup %5932 }
 0x42a   : > { %v5935_v49 = vpop.eup %5934 }
 0x430   : > { %v5937_v51 = vpop.eup %5936 }
 0x431   : > { %v5939_v53 = vpop.eup %5938  ;;  %v3895_v26 = vmul.f32 %v5937_v51, %v5931_v45 }
 0x432   : > { %v5941_v54 = vpop.eup %5940  ;;  %v3896_v12 = vmul.f32 %v5939_v53, %v5929_v43 }
 0x433   : > { %v5943_v60 = vpop.eup %5942  ;;  %v3918_v56 = vmul.f32 %v3909_v41, %v3895_v26  ;;  %v3898_v36 = vmul.f32 %v5941_v54, %v5935_v49 }
 0x434   : > { %v3919_v28 = vmul.f32 %v3913_v52, %v3896_v12  ;;  %v3899_v57 = vmul.f32 %v5943_v60, %v5933_v48  ;;  %v6236_v12 = vmov 1966171168  }
 0x435   : > { %v3923_v59 = vadd.f32 %v3918_v56, %v3917_v55  ;;  %v3921_v62 = vmul.f32 %v3909_v41, %v3898_v36  ;;  %v4178_v60 = vunpack.c.l.s4 %v6236_v12 }
 0x436   : > { %v3922_v0 = vmul.f32 %v3913_v52, %v3899_v57  ;;  %v3963_v52 = vld [vmem:[#allocation3] sm:$0x1] }
 0x437   : > { %v3924_v1 = vadd.f32 %v3923_v59, %v3919_v28  ;;  %v3927_v3 = vadd.f32 %v3921_v62, %v3920_v61  ;;  %v4179_v55 = vunpack.c.0.s8 %v4178_v60 }
 0x439   : > { %3925 = vadd.xlane.f32.xlu0 %v3924_v1  ;;  %v3928_v4 = vadd.f32 %v3927_v3, %v3922_v0  ;;  %v4182_v57 = vsub.s32 %v4179_v55, %v6594_v19 }
 0x43d   : > { %3929 = vadd.xlane.f32.xlu0 %v3928_v4 }
 0x4c6   : > { %v3926_v8 = vpop.xlane.xlu0 %3925 }
 0x4c7   : > { %v3932_v29 = vsel %vm434_vm2, %v3926_v8, -inf }
 0x4ca   : > { %v3930_v63 = vpop.xlane.xlu0 %3929 }
 0x4cb   : > { %v3933_v2 = vsel %vm435_vm3, %v3930_v63, -inf }
 0x4cc   : > { %v3934_v10 = vmax.f32 %v3932_v29, %v3933_v2  ;;  %v6237_v2 = vmov (!%p5007_p4), 0  }
 0x4cd   : > { %5950 = vset.pattern.permute.xlu0 (!%p5007_p4), %v6237_v2 }
 0x4ce   : > { %v3935_v13 = vrot.slane %v3934_v10, 4 }
 0x4d0   : > { %v3936_v14 = vmax.f32 %v3934_v10, %v3935_v13 }
 0x4d2   : > { %v3937_v15 = vrot.slane %v3936_v14, 2 }
 0x4d4   : > { %v3938_v16 = vmax.f32 %v3936_v14, %v3937_v15 }
 0x4d6   : > { %v3939_v17 = vrot.slane %v3938_v16, 1 }
 0x4d8   : > { %v3940_v18 = vmax.f32 %v3938_v16, %v3939_v17 }
 0x4da   : > { %5091 = vpush %v3940_v18 }
 0x50b   : > { %s5092_s13 = spop %5091 }
 0x50c   : > { %v3942_v21 = vstv %s5092_s13 }
 0x50d   : > { %v3943_v22 = vmax.f32 %v3931_v20, %v3942_v21 }
 0x50f   : > { %v3953_v23 = vrot.slane %v3943_v22, %v6598_v35  ;;  %4206 = vst.msk [vmem:[#allocation2] sm:$0x1] %vm3980_vm5, %v3943_v22  ;;  %v3945_v40 = vsub.f32 %v3931_v20, %v3943_v22  ;;  %vm3944_vm7 = vcmp.gt.f32.partialorder %v3943_v22, -inf }
 0x511   : > { %v3955_v27 = vsub.f32 %v3926_v8, %v3953_v23  ;;  %v3956_v30 = vsub.f32 %v3930_v63, %v3953_v23  ;;  %v3946_v42 = vmul.f32 1.442695, %v3945_v40 }
 0x513   : > { %v3959_v37 = vmul.f32 1.442695, %v3956_v30  ;;  %v3957_v31 = vmul.f32 1.442695, %v3955_v27 }
 0x515   : > { %5944 = vpow2.f32 %v3959_v37 }
 0x516   : > { %5946 = vpow2.f32 %v3957_v31  ;;  %v5008_v19 = vld [vmem:[#allocation2] ss:$0 sm:$0xff] (!%p5007_p4) }
 0x517   : > { %5948 = vpow2.f32 %v3946_v42 }
 0x51f   : > { %v5945_v32 = vpop.eup %5944 }
 0x520   : > { %v5947_v11 = vpop.eup %5946  ;;  %v3962_v33 = vsel %vm435_vm3, %v5945_v32, 0.0 }
 0x521   : > { %v3961_v34 = vsel %vm434_vm2, %v5947_v11, 0.0  ;;  %v3967_v24 = vsel %vm3965_vm6, %v3962_v33, 0.0  ;;  %v5949_v43 = vpop.eup %5948 }
 0x522   : > { %3993 = vxpose.xlu1.b32.start [1/2] (short) (narrow) %v3961_v34, 8  ;;  %v3966_v39 = vsel %vm3965_vm6, %v3961_v34, 0.0  ;;  %v3948_v44 = vsel %vm3944_vm7, %v5949_v43, 0.0 }
 0x523   : > { %v3968_v58 = vadd.f32 %v3967_v24, %v3966_v39  ;;  %v3964_v53 = vmul.f32 %v3963_v52, %v3948_v44 }
 0x525   : > { %3969 = vadd.xlane.f32.xlu0 %v3968_v58 }
 0x526   : > { %3994 = vxpose.xlu1.b32.end [2/2] (short) (narrow) %v3962_v33, 8 }
 0x53b   : > { %4244 = vperm.xlu0 (!%p5007_p4), %5950, %v5008_v19  }
 0x544   : > { %5234 = vset.pattern.permute.xlu1 %v6234_v5  ;;  %v3982_v5 = vld [vmem:[#allocation4] sm:$0xf] }
 0x545   : > { %3985 = vperm.xlu1 %5234, %v3948_v44  }
 0x5a2   : > { %v4009_v47 = vpop.trf.xlu1 }
 0x5a3   : > { %5001 = vmatmul.mubr.msk.f32.vlgmr.msra.gmra.mrb[12].mxu0 %vm4025_vm8, %v4009_v47  ;;  %5006 = vmatmul.mubr.msk.f32.vlgmr.msra.gmra.mrb[12].mxu1 %vm4025_vm8, %v4009_v47 }
 0x5b2   : > { %v3970_v46 = vpop.xlane.xlu0 %3969 }
 0x5b3   : > { %v3971_v45 = vrot.slane %v3970_v46, 4 }
 0x5b5   : > { %v3972_v48 = vadd.f32 %v3971_v45, %v3970_v46 }
 0x5b7   : > { %v3973_v49 = vrot.slane %v3972_v48, 2 }
 0x5b9   : > { %v3974_v50 = vadd.f32 %v3973_v49, %v3972_v48 }
 0x5ba   : > { %v4245_v17 = vpop.permute.xlu0 (!%p5007_p4), %4244 }
 0x5bb   : > { %v3975_v41 = vrot.slane %v3974_v50, 1  ;;  %4247 = vst [vmem:[%s6528_s7] sm:$0xff] (!%p5007_p4), %v4245_v17 }
 0x5bd   : > { %v3976_v51 = vadd.f32 %v3975_v41, %v3974_v50 }
 0x5bf   : > { %5093 = vpush %v3976_v51 }
 0x5c4   : > { %v3986_v56 = vpop.permute.xlu1 %3985 }
 0x5c5   : > { %v3991_v1 = vrot.slane %v3986_v56, %v6598_v35 }
 0x5c7   : > { %v3992_v9 = vmul.f32 %v3991_v1, %v3982_v5 }
 0x5f0   : > { %s5094_s19 = spop %5093 }
 0x5f1   : > { %v3978_v26 = vstv %s5094_s19 }
 0x5f2   : > { %v3979_v54 = vadd.f32 %v3978_v26, %v3964_v53 }
 0x5f4   : > { %3981 = vst.msk [vmem:[#allocation3] sm:$0x1] %vm3980_vm5, %v3979_v54 }
 0x5fb   : > { %v5009_v10 = vld [vmem:[#allocation3] ss:$0 sm:$0xff] (!%p5007_p4) }
 0x5fc   : > { %4255 = vperm.xlu0 (!%p5007_p4), %5950, %v5009_v10  }
 0x676   : > { %v4095_v36 = vpop.f32.mrb[12].mxu0  ;;  %v4166_v28 = vpop.f32.mrb[12].mxu1 }
 0x677   : > { %v4097_v59 = vpop.f32.mrb[13].mxu0  ;;  %v4168_v61 = vpop.f32.mrb[13].mxu1 }
 0x678   : > { %v4175_v62 = vcombine.low %v4095_v36, %v4097_v59  ;;  %v4176_v0 = vcombine.low %v4166_v28, %v4168_v61 }
 0x67a   : > { %v4183_v3 = vrot.slane %v4175_v62, %v4182_v57  ;;  %v4190_v4 = vrot.slane %v4176_v0, %v4182_v57 }
 0x67b   : > { %v4256_v18 = vpop.permute.xlu0 (!%p5007_p4), %4255 }
 0x67c   : > { %v4191_v8 = vcombine.low %v4183_v3, %v4190_v4  ;;  %4210 = sbr.rel (%p5007_p4) target bundleno = 1678 (0x68e), region = 64  ;;  %4258 = vst [vmem:[%s6530_s8] sm:$0xff] (!%p5007_p4), %v4256_v18 }
 0x67e   : > { %v4198_v63 = vrot.slane %v4191_v8, %v4182_v57 }
 0x680   : > { %v4200_v29 = vadd.f32 %v4198_v63, %v3992_v9 }
 0x682   : > { %4205 = vst.msk [vmem:[#allocation4] sm:$0xf] %vm4203_vm9, %v4200_v29 }
 0x689   : > { %v4211_v13 = vld [vmem:[#allocation4] sm:$0xf] }
 0x68a   : > { %v4216_v14 = vrot.slane %v4211_v13, %v6598_v35  ;;  %v4220_v25 = vrot.slane %v4211_v13, %v6607_v38  ;;  %v4224_v15 = vrot.slane %v4211_v13, %v6650_v6  ;;  %v4228_v16 = vrot.slane %v4211_v13, %v6653_v7 }
 0x68c   : > { %4233 = vst [vmem:[%s6526_s6] sm:$0xff] %v4216_v14  ;;  %4234 = vst [vmem:[%s6526_s6 + $0x8] sm:$0xff] %v4220_v25 }
 0x68d   : > { %4235 = vst [vmem:[%s6526_s6 + $0x10] sm:$0xff] %v4224_v15  ;;  %4236 = vst [vmem:[%s6526_s6 + $0x18] sm:$0xff] %v4228_v16 }
 0x68e PF: > { %s6928_s11 = sld [smem:[#allocation27_spill]]  ;;  %s4264_s21 = sand.u32 1, %s6342_s16  }
 0x68f   : > { %s5015_s26 = sshll.u32 %s6209_s12, 7  ;;  %s6929_s27 = sld [smem:[#allocation30_spill]] }
 0x690   : > { %s4297_s14 = sshll.u32 %s6528_s7, 4  ;;  %s5022_s23 = sshll.u32 %s6209_s12, 9  ;;  %s6752_s14 = int_to_ptr.vmem [resolvable:$true] %s4297_s14 }
 0x691   : > { %s6755_s24 = scalar_lea.sflag [#allocation13], %s4264_s21  ;;  %s6035_s30 = scalar_lea.vmem %s6752_s14, 128 }
 0x692   : > { %p6036_p6 = scmp.ne.s32.totalorder %s6752_s14, %s6035_s30  ;;  %s6238_s16 = smov [#allocation12]  }
 0x693   : > { %s6039_s18 = sshll.u32 %s6238_s16, 4  ;;  %s6040_s18 = int_to_ptr.vmem [resolvable:$false] %s6039_s18 }
 0x694   : > { %p6931_p10 = scmp.ne.s32.totalorder %s6928_s11, 0  ;;  %s6041_s13 = scalar_lea.vmem %s6040_s18, 256 }
 0x695   : > { %s6930_s22 = smov %s6929_s27  ;;  %s6749_s29 = scalar_lea.hbm %s6929_s27, %s5015_s26 }
 0x696   : > { %p6037_p7 = pnand %p6036_p6, %p6931_p10  ;;  %p6042_p5 = scmp.lt.s32.totalorder %s6752_s14, %s6040_s18 }
 0x697   : > { %p6043_p9 = scmp.lt.s32.totalorder %s6041_s13, %s6035_s30 }
 0x698   : > { %p6038_p13 = pneg %p6037_p7 }
 0x699   : > { %p6044_p2 = por %p6043_p9, %p6042_p5 }
 0x69b   : > { %p6045_p8 = pnand %p6044_p2, %p6038_p13 }
 0x69d   : > { %6048 = shalt.err (!%p6045_p8)
}
 0x69e   : > { %s6049_s7 = scalar_lea.hbm %s6749_s29, 128  ;;  %s6053_s25 = scalar_lea.hbm %s6930_s22, 256 }
 0x69f   : > { %p6050_p3 = scmp.ne.s32.totalorder %s6749_s29, %s6049_s7  ;;  %p6054_p11 = scmp.lt.u32.totalorder %s6749_s29, %s6930_s22 }
 0x6a0   : > { %p6055_p1 = scmp.lt.u32.totalorder %s6053_s25, %s6049_s7  ;;  %p6057_p6 = scmp.lt.u32.totalorder %s6049_s7, %s6749_s29 }
 0x6a1   : > { %p6051_p12 = pnand %p6050_p3, %p6931_p10 }
 0x6a2   : > { %p6056_p4 = por %p6055_p1, %p6054_p11 }
 0x6a3   : > { %p6052_p0 = pneg %p6051_p12 }
 0x6a4   : > { %p6058_p7 = por %p6057_p6, %p6056_p4 }
 0x6a6   : > { %p6059_p13 = pnand %p6058_p7, %p6052_p0 }
 0x6a8   : > { %6062 = shalt.err (!%p6059_p13)
}
 0x6a9   : > { %5105 = dma.vmem_to_hbm [thread:$0]  (%p6931_p10), %s6752_s14, 128, %s6749_s29, %s6755_s24  }
 0x6aa   : > { %s6932_s18 = sld [smem:[#allocation29_spill]]  ;;  %s4284_s7 = sshll.u32 %s6526_s6, 4  ;;  %s6787_s7 = int_to_ptr.vmem [resolvable:$true] %s4284_s7 }
 0x6ab   : > { %s6933_s25 = sld [smem:[#allocation31_spill]]  ;;  %s4260_s27 = scalar_lea.sflag [#allocation7], %s6522_s17 }
 0x6ac   : > { %s6063_s29 = scalar_lea.vmem %s6787_s7, 512  ;;  %s6239_s14 = smov [#allocation11]  }
 0x6ad   : > { %p6064_p5 = scmp.ne.s32.totalorder %s6787_s7, %s6063_s29 }
 0x6af   : > { %p6065_p9 = pnand %p6064_p5, %p6931_p10 }
 0x6b0   : > { %s6784_s13 = scalar_lea.hbm %s6932_s18, %s5022_s23  ;;  %s6067_s23 = sshll.u32 %s6239_s14, 4  ;;  %s6068_s23 = int_to_ptr.vmem [resolvable:$false] %s6067_s23 }
 0x6b1   : > { %s6794_s20 = scalar_lea.hbm %s6933_s25, %s5015_s26  ;;  %p6066_p2 = pneg %p6065_p9 }
 0x6b2   : > { %s6069_s6 = scalar_lea.vmem %s6068_s23, 1024  ;;  %p6070_p8 = scmp.lt.s32.totalorder %s6787_s7, %s6068_s23 }
 0x6b3   : > { %p6071_p3 = scmp.lt.s32.totalorder %s6069_s6, %s6063_s29 }
 0x6b5   : > { %p6072_p12 = por %p6071_p3, %p6070_p8 }
 0x6b7   : > { %p6073_p0 = pnand %p6072_p12, %p6066_p2 }
 0x6b9   : > { %6076 = shalt.err (!%p6073_p0)
}
 0x6ba   : > { %s6077_s12 = scalar_lea.hbm %s6784_s13, 512  ;;  %s6081_s30 = scalar_lea.hbm %s6932_s18, 1024 }
 0x6bb   : > { %p6078_p11 = scmp.ne.s32.totalorder %s6784_s13, %s6077_s12  ;;  %p6082_p6 = scmp.lt.u32.totalorder %s6784_s13, %s6932_s18 }
 0x6bc   : > { %p6083_p7 = scmp.lt.u32.totalorder %s6081_s30, %s6077_s12  ;;  %p6085_p5 = scmp.lt.u32.totalorder %s6077_s12, %s6784_s13 }
 0x6bd   : > { %p6079_p1 = pnand %p6078_p11, %p6931_p10 }
 0x6be   : > { %p6084_p13 = por %p6083_p7, %p6082_p6 }
 0x6bf   : > { %p6080_p4 = pneg %p6079_p1 }
 0x6c0   : > { %p6086_p9 = por %p6085_p5, %p6084_p13 }
 0x6c2   : > { %p6087_p2 = pnand %p6086_p9, %p6080_p4 }
 0x6c4   : > { %6090 = shalt.err (!%p6087_p2)
}
 0x6c5   : > { %5104 = dma.vmem_to_hbm [thread:$0]  (%p6931_p10), %s6787_s7, 512, %s6784_s13, %s4260_s27  }
 0x6c6   : > { %s4310_s21 = sshll.u32 %s6530_s8, 4  ;;  %s6240_s14 = smov [#allocation14]   ;;  %s4311_s21 = int_to_ptr.vmem [resolvable:$true] %s4310_s21 }
 0x6c7   : > { %s6091_s29 = scalar_lea.vmem %s4311_s21, 128  ;;  %s6095_s23 = sshll.u32 %s6240_s14, 4  ;;  %s6096_s23 = int_to_ptr.vmem [resolvable:$false] %s6095_s23 }
 0x6c8   : > { %p6092_p8 = scmp.ne.s32.totalorder %s4311_s21, %s6091_s29  ;;  %s6097_s6 = scalar_lea.vmem %s6096_s23, 256 }
 0x6c9   : > { %p6098_p0 = scmp.lt.s32.totalorder %s4311_s21, %s6096_s23  ;;  %p6099_p11 = scmp.lt.s32.totalorder %s6097_s6, %s6091_s29 }
 0x6ca   : > { %p6093_p3 = pnand %p6092_p8, %p6931_p10 }
 0x6cb   : > { %p6100_p1 = por %p6099_p11, %p6098_p0 }
 0x6cc   : > { %p6094_p12 = pneg %p6093_p3 }
 0x6ce   : > { %p6101_p4 = pnand %p6100_p1, %p6094_p12 }
 0x6d0   : > { %6104 = shalt.err (!%p6101_p4)
}
 0x6d1   : > { %s6105_s8 = scalar_lea.hbm %s6794_s20, 128  ;;  %s6109_s27 = scalar_lea.hbm %s6933_s25, 256 }
 0x6d2   : > { %p6106_p6 = scmp.ne.s32.totalorder %s6794_s20, %s6105_s8  ;;  %p6110_p5 = scmp.lt.u32.totalorder %s6794_s20, %s6933_s25 }
 0x6d3   : > { %p6111_p9 = scmp.lt.u32.totalorder %s6109_s27, %s6105_s8  ;;  %p6113_p8 = scmp.lt.u32.totalorder %s6105_s8, %s6794_s20 }
 0x6d4   : > { %p6107_p7 = pnand %p6106_p6, %p6931_p10 }
 0x6d5   : > { %p6112_p2 = por %p6111_p9, %p6110_p5 }
 0x6d6   : > { %p6108_p13 = pneg %p6107_p7 }
 0x6d7   : > { %p6114_p3 = por %p6113_p8, %p6112_p2 }
 0x6d9   : > { %p6115_p12 = pnand %p6114_p3, %p6108_p13 }
 0x6db   : > { %6118 = shalt.err (!%p6115_p12)
}
 0x6dc   : > { %5106 = dma.vmem_to_hbm [thread:$0]  (%p6931_p10), %s4311_s21, 128, %s6794_s20, %s6755_s24  }
 0x6dd PF: > { %s6934_s26 = sld [smem:[#allocation19_spill]]  ;;  %s6935_s30 = sld [smem:[#allocation28_spill]] }
 0x6de   : > { %p5131_p0 = scmp.ge.s32.totalorder %s6221_s15, 2 }
 0x6e3   : > { %s4322_s16 = sand.u32 1, %s6934_s26   ;;  %p6936_p11 = scmp.ne.s32.totalorder %s6935_s30, 0 }
 0x6e4   : > { %s4323_s19 = scalar_lea.sflag [#allocation7], %s4322_s16 }
 0x6e5   : > { %p5118_p1 = pnand %p5131_p0, %p6936_p11 }
 0x6e7   : > { %6172 = dma.done.wait (!%p5118_p1), %s4323_s19, 512  }
 0x6e8   : > { %6174 = vsyncadd (!%p5118_p1), %s4323_s19, 4294966784  ;;  %s6937_s29 = sadd.s32 4294967294, %s6221_s15  }
 0x6e9   : > { %s4331_s14 = sand.u32 1, %s6937_s29  }
 0x6ea   : > { %s4332_s23 = scalar_lea.sflag [#allocation13], %s4331_s14 }
 0x6eb   : > { %6176 = dma.done.wait (!%p5118_p1), %s4332_s23, 256  }
 0x6ec   : > { %6178 = vsyncadd (!%p5118_p1), %s4332_s23, 4294967040  ;;  %s29_s15 = sadd.s32 1, %s6221_s15   ;;  %s6938_s11 = sld [smem:[#allocation20_spill]] }
 0x6ed   : > { %p26_p10 = scmp.ge.s32.totalorder %s29_s15, 6   ;;  %s6939_s29 = sld [smem:[#allocation25_spill]] }
 0x6ee   : > { %s6940_s24 = sld [smem:[#allocation26_spill]]  ;;  %s6941_s20 = sld [smem:[#allocation21_spill]] }
 0x6ef   : > { %s6942_s12 = sld [smem:[#allocation22_spill]]  ;;  %s6943_s13 = sld [smem:[#allocation23_spill]] }
 0x6f0   : > { %s6944_s14 = sld [smem:[#allocation24_spill]]  ;;  %s6945_s27 = smov %s6185_s28 }
 0x6f1   : > { %s6947_s30 = smov %s6197_s9  ;;  %s6948_s9 = smov %s6201_s10 }
 0x6f2   : > { %s6946_s28 = smov %s6938_s11  ;;  %28 = sbr.rel (!%p26_p10) target bundleno = 16 (0x10), region = 137 }
 0x6f4   : > { %s6949_s10 = smov %s6940_s24  ;;  %s6950_s11 = smov %s6941_s20 }
 0x6f9   :  { %4346 = vsyncpa [#allocation6], 1 }
 0x6fa   :  { %4348 = vsyncpa [#allocation6 + $0x1], 1 }
 0x6fb   :  { %4349 = vsyncpa [#allocation9], 1 }
 0x6fc   :  { %4350 = vsyncpa [#allocation7], 1 }
 0x6fd   :  { %4352 = vsyncpa [#allocation7 + $0x1], 1 }
 0x6fe   :  { %4353 = vsyncpa [#allocation13], 1 }
 0x6ff   :  { %4355 = vsyncpa [#allocation13 + $0x1], 1 }

</bundles_post_ra>
